<compile_context>
chip_gen: v5e
topology: v5e:2x2
jax: 0.10.0
libtpu: 0.0.40
codegen_flags: <defaults>
</compile_context>

<pallas_src>
import functools

import jax
import jax.numpy as jnp
from jax.experimental import pallas as pl
from jax.experimental.pallas import tpu as pltpu


@functools.lru_cache(maxsize=None)
def _vmem_limit_bytes():
    """Scoped-VMEM budget derived from the current generation's physical VMEM."""
    try:
        cap = int(pltpu.get_tpu_info().vmem_capacity_bytes)
    except Exception:
        cap = 64 * 1024 * 1024          # conservative fallback (v7x-sized)
    # ~55% of physical: ≈35 MB on v7x (64 MiB), ≈70 MB on v5e/v6e (128 MiB).
    return max(16 * 1024 * 1024, min(int(cap * 0.55), 96 * 1024 * 1024))


# ----------------------------------------------------------------------------
# Fused Conv2d(3x3, stride=1, pad=1) + ReLU + MaxPool2d(2, 2)
# ----------------------------------------------------------------------------
def _conv_relu_pool_kernel(x_ref, w_ref, b_ref, o_ref, *, H, W, Cin, Cout):
    # x_ref : (1, H+2, W+2, Cin)     f32, pre-padded NHWC image
    # w_ref : (9*Cin, Cout)          bf16, taps packed row-major (kh, kw, cin)
    # b_ref : (1, Cout)              f32
    # o_ref : (1, H//2, W//2, Cout)  f32 or bf16
    #
    # Build one (H*W, 9*Cin) patch slab in VMEM and do a single MXU matmul
    # (K=9*Cin) instead of 9 shallow per-tap matmuls + 9 accumulator RMW passes.
    taps = [x_ref[0, kh:kh + H, kw:kw + W, :].reshape(H * W, Cin)
            for kh in range(3) for kw in range(3)]
    patches = jnp.concatenate(taps, axis=-1).astype(jnp.bfloat16)   # (H*W, 9*Cin)
    acc = jnp.dot(patches, w_ref[...], preferred_element_type=jnp.float32)
    y = jnp.maximum(acc + b_ref[...], 0.0)                          # bias + ReLU (f32)
    # 2x2 stride-2 max pool fused into the epilogue (never touches HBM pre-pool).
    y = jnp.max(y.reshape(H // 2, 2, W, Cout), axis=1)              # max over row pairs
    y = jnp.max(y.reshape(H // 2, W // 2, 2, Cout), axis=2)         # max over col pairs
    o_ref[0] = y.astype(o_ref.dtype)


def conv3x3_relu_pool(x_nhwc, w_packed, b, *, out_dtype):
    """Fused conv(3x3,s1,p1) + ReLU + maxpool(2,2); one image per grid step."""
    n, h, w, cin = x_nhwc.shape
    cout = w_packed.shape[-1]
    assert w_packed.shape[0] == 9 * cin
    assert h % 2 == 0 and w % 2 == 0, "MaxPool2d(2,2) requires even H/W"
    # TODO(synk): at 224-class sizes add a row-tile grid axis with a 1-row halo
    # (manual make_async_copy) so the per-step slab/accumulator stays O(row tile)
    # and fits v7x's 64 MiB VMEM; also move the pad + bf16 boundary in-kernel.
    xp = jnp.pad(x_nhwc, ((0, 0), (1, 1), (1, 1), (0, 0)))
    return pl.pallas_call(
        functools.partial(_conv_relu_pool_kernel, H=h, W=w, Cin=cin, Cout=cout),
        out_shape=jax.ShapeDtypeStruct((n, h // 2, w // 2, cout), out_dtype),
        grid=(n,),
        in_specs=[
            pl.BlockSpec((1, h + 2, w + 2, cin), lambda i: (i, 0, 0, 0)),
            pl.BlockSpec((9 * cin, cout), lambda i: (0, 0)),
            pl.BlockSpec((1, cout), lambda i: (0, 0)),
        ],
        out_specs=pl.BlockSpec((1, h // 2, w // 2, cout), lambda i: (i, 0, 0, 0)),
        compiler_params=pltpu.CompilerParams(
            dimension_semantics=("parallel",),
            vmem_limit_bytes=_vmem_limit_bytes()),
    )(xp, w_packed, b.reshape(1, cout).astype(jnp.float32))


# ----------------------------------------------------------------------------
# Fused classifier: Linear(K,256) + ReLU + Linear(256,2), fc2 padded to 128 lanes.
# Grid = (column blocks of fc1 (parallel, 2x128), K reduction (arbitrary)).
# ----------------------------------------------------------------------------
def _fc_fused_kernel(x_ref, w1_ref, b1_ref, w2_ref, b2_ref, o_ref, acc_ref):
    j = pl.program_id(0)                     # fc1 column block (parallel across cores)
    k = pl.program_id(1)                     # K reduction step

    @pl.when(k == 0)
    def _init():
        acc_ref[...] = jnp.zeros_like(acc_ref)

    # K-streamed fc1: weight tiles are double-buffered by the BlockSpec pipeline.
    acc_ref[...] += jnp.dot(x_ref[...], w1_ref[...],
                            preferred_element_type=jnp.float32)

    @pl.when(k == pl.num_programs(1) - 1)
    def _finalize():
        h = jnp.maximum(acc_ref[...] + b1_ref[...], 0.0)          # fc1 bias + ReLU (f32)
        part = jnp.dot(h.astype(w2_ref.dtype), w2_ref[...],
                       preferred_element_type=jnp.float32)
        # fc2 bias goes only into the j==0 partial block (blocks are summed outside).
        part += b2_ref[...] * (j == 0).astype(jnp.float32)
        o_ref[0] = part.astype(o_ref.dtype)                        # lane-dense (128-wide)


def _pick_k_tile(K, max_tk=8192):
    """Largest multiple-of-128 divisor of K up to max_tk (2 MB bf16 (tk,128) block)."""
    if K <= max_tk:
        return K
    best = 0
    for tk in range(128, max_tk + 1, 128):
        if K % tk == 0:
            best = tk
    if best == 0:
        # TODO(synk): pad K to a multiple of 128 instead of one huge weight block.
        return K
    return best


def fc_relu_fc(x, w1, b1, w2_pad, b2_pad, *, n_out):
    M, K = x.shape
    K2, N1 = w1.shape
    N1b, N2p = w2_pad.shape
    assert K == K2 and N1 == N1b and N1 % 128 == 0 and N2p == 128
    nj = N1 // 128                       # fc1 column blocks (2 for N1=256) -> 2 TCs on v7x
    tk = _pick_k_tile(K)
    out = pl.pallas_call(
        _fc_fused_kernel,
        out_shape=jax.ShapeDtypeStruct((nj, M, N2p), jnp.float32),
        grid=(nj, K // tk),
        in_specs=[
            pl.BlockSpec((M, tk), lambda j, k: (0, k)),
            pl.BlockSpec((tk, 128), lambda j, k: (k, j)),
            pl.BlockSpec((1, 128), lambda j, k: (0, j)),
            pl.BlockSpec((128, N2p), lambda j, k: (j, 0)),
            pl.BlockSpec((1, N2p), lambda j, k: (0, 0)),
        ],
        out_specs=pl.BlockSpec((1, M, N2p), lambda j, k: (j, 0, 0)),
        scratch_shapes=[pltpu.VMEM((M, 128), jnp.float32)],
        compiler_params=pltpu.CompilerParams(
            dimension_semantics=("parallel", "arbitrary"),   # j parallel, K reduction
            vmem_limit_bytes=_vmem_limit_bytes()),
    )(x, w1, b1.reshape(1, N1).astype(jnp.float32),
      w2_pad, b2_pad.reshape(1, N2p).astype(jnp.float32))
    # Sum the per-column-block partial logits (tiny (nj, M, 128) reduction) and
    # slice the two real outputs.
    return out.sum(axis=0)[:, :n_out]


# ----------------------------------------------------------------------------
# Model: parameters (kernel layout) + forward
# ----------------------------------------------------------------------------
def init_params(key, h, w):
    # TODO(synk): the PyTorch module hardcodes Linear(128*56*56, 256) (224x224
    # input); fc1 in_features here scales with the test spatial size.
    hp, wp = h // 4, w // 4
    flat = 128 * hp * wp
    ks = jax.random.split(key, 8)
    s = 0.05
    # Weights are generated in PyTorch layout and converted to kernel layout, i.e.
    # exactly how a real checkpoint would be mapped:
    #   conv*_w : torch (O,I,KH,KW) -> (KH,KW,I,O) -> packed (9*I, O), bf16
    #   fc1_w   : torch (256, C*Hp*Wp) NCHW-flatten cols -> rows permuted to
    #             NHWC-flatten order -> (flat, 256), bf16
    #   fc2_w   : torch (2, 256) -> .T, zero-padded to (256, 128) (lane-dense stores)
    conv1_w = jax.random.normal(ks[0], (64, 3, 3, 3), jnp.float32) * s
    conv1_b = jax.random.normal(ks[1], (64,), jnp.float32) * s
    conv2_w = jax.random.normal(ks[2], (128, 64, 3, 3), jnp.float32) * s
    conv2_b = jax.random.normal(ks[3], (128,), jnp.float32) * s
    fc1_w = jax.random.normal(ks[4], (256, flat), jnp.float32) * s
    fc1_b = jax.random.normal(ks[5], (256,), jnp.float32) * s
    fc2_w = jax.random.normal(ks[6], (2, 256), jnp.float32) * s
    fc2_b = jax.random.normal(ks[7], (2,), jnp.float32) * s

    def pack_conv(w_oihw):
        o, i, kh, kw = w_oihw.shape
        w_hwio = jnp.transpose(w_oihw, (2, 3, 1, 0))            # (KH, KW, I, O)
        return w_hwio.reshape(kh * kw * i, o).astype(jnp.bfloat16)

    # Permute fc1 rows: NCHW-flatten (c*Hp*Wp + h*Wp + w) -> NHWC-flatten
    # (h*Wp*C + w*C + c), so the classifier input is a pure reshape of the
    # NHWC conv2 output (no HBM transpose pass in the forward).
    fc1_w_nhwc = (fc1_w.reshape(256, 128, hp, wp)
                  .transpose(2, 3, 1, 0)
                  .reshape(flat, 256)
                  .astype(jnp.bfloat16))
    fc2_w_pad = jnp.zeros((256, 128), jnp.float32).at[:, :2].set(fc2_w.T)
    fc2_b_pad = jnp.zeros((128,), jnp.float32).at[:2].set(fc2_b)
    return {
        "conv1_w": pack_conv(conv1_w),                 # (27, 64)  bf16
        "conv1_b": conv1_b,
        "conv2_w": pack_conv(conv2_w),                 # (576, 128) bf16
        "conv2_b": conv2_b,
        "fc1_w": fc1_w_nhwc,                           # (flat, 256) bf16, NHWC rows
        "fc1_b": fc1_b,
        "fc2_w_pad": fc2_w_pad.astype(jnp.bfloat16),   # (256, 128) bf16, zero-padded
        "fc2_b_pad": fc2_b_pad,                        # (128,) f32
    }


def custom_alexnet_forward(x_nchw, params):
    # features (fused conv+relu+pool kernels, NHWC layout inside)
    x = jnp.transpose(x_nchw, (0, 2, 3, 1))            # NCHW -> NHWC (3-ch input, cheap)
    x = conv3x3_relu_pool(x, params["conv1_w"], params["conv1_b"],
                          out_dtype=jnp.float32)
    x = conv3x3_relu_pool(x, params["conv2_w"], params["conv2_b"],
                          out_dtype=jnp.bfloat16)      # bf16 straight into the classifier
    # fc1_w rows are pre-permuted to NHWC-flatten order -> flatten is a pure reshape.
    xf = x.reshape(x.shape[0], -1)
    # classifier (fc1 K-streamed + column-split, fc2 fused in the epilogue)
    return fc_relu_fc(xf, params["fc1_w"], params["fc1_b"],
                      params["fc2_w_pad"], params["fc2_b_pad"], n_out=2)


if __name__ == "__main__":
    key = jax.random.PRNGKey(0)
    k_x, k_p = jax.random.split(key)

    B, C, H, W = 2, 3, 16, 16                 # small NCHW input (PyTorch conv layout)
    x = jax.random.normal(k_x, (B, C, H, W), jnp.float32)
    params = init_params(k_p, H, W)

    fwd = jax.jit(custom_alexnet_forward)
    out = jax.block_until_ready(fwd(x, params))

    assert out.shape == (B, 2), out.shape
    assert out.dtype == jnp.float32
    assert bool(jnp.isfinite(out).all())
    print("KERNEL_OK")
</pallas_src>

<mosaic_0001>
module attributes {stable_mosaic.version = 11 : i64} {
  func.func @_conv_relu_pool_kernel(%arg0: i32, %arg1: memref<1x18x18x3xf32, #tpu.memory_space<vmem>>, %arg2: memref<27x64xbf16, #tpu.memory_space<vmem>>, %arg3: memref<1x64xf32, #tpu.memory_space<vmem>>, %arg4: memref<1x8x8x64xf32, #tpu.memory_space<vmem>>) attributes {dimension_semantics = [#tpu.dimension_semantics<parallel>], iteration_bounds = array<i64: 2>, scalar_prefetch = 0 : i64, scratch_operands = 0 : i64, tpu.core_type = #tpu.core_type<tc>, window_params = [{transform_indices = @transform_0, window_bounds = array<i64: 1, 18, 18, 3>}, {pipeline_mode = #tpu.pipeline_mode<synchronous>, transform_indices = @transform_1, window_bounds = array<i64: 27, 64>}, {pipeline_mode = #tpu.pipeline_mode<synchronous>, transform_indices = @transform_2, window_bounds = array<i64: 1, 64>}, {transform_indices = @transform_3, window_bounds = array<i64: 1, 8, 8, 64>}]} {
    %c0 = arith.constant 0 : index
    %c0_0 = arith.constant 0 : index
    %c0_1 = arith.constant 0 : index
    %c0_2 = arith.constant 0 : index
    %0 = vector.load %arg1[%c0, %c0_0, %c0_1, %c0_2] : memref<1x18x18x3xf32, #tpu.memory_space<vmem>>, vector<1x16x16x3xf32>
    %1 = vector.shape_cast %0 : vector<1x16x16x3xf32> to vector<16x16x3xf32>
    %2 = vector.shape_cast %1 : vector<16x16x3xf32> to vector<256x3xf32>
    %c0_3 = arith.constant 0 : index
    %c0_4 = arith.constant 0 : index
    %c1 = arith.constant 1 : index
    %c0_5 = arith.constant 0 : index
    %3 = vector.load %arg1[%c0_3, %c0_4, %c1, %c0_5] : memref<1x18x18x3xf32, #tpu.memory_space<vmem>>, vector<1x16x16x3xf32>
    %4 = vector.shape_cast %3 : vector<1x16x16x3xf32> to vector<16x16x3xf32>
    %5 = vector.shape_cast %4 : vector<16x16x3xf32> to vector<256x3xf32>
    %c0_6 = arith.constant 0 : index
    %c0_7 = arith.constant 0 : index
    %c2 = arith.constant 2 : index
    %c0_8 = arith.constant 0 : index
    %6 = vector.load %arg1[%c0_6, %c0_7, %c2, %c0_8] : memref<1x18x18x3xf32, #tpu.memory_space<vmem>>, vector<1x16x16x3xf32>
    %7 = vector.shape_cast %6 : vector<1x16x16x3xf32> to vector<16x16x3xf32>
    %8 = vector.shape_cast %7 : vector<16x16x3xf32> to vector<256x3xf32>
    %c0_9 = arith.constant 0 : index
    %c1_10 = arith.constant 1 : index
    %c0_11 = arith.constant 0 : index
    %c0_12 = arith.constant 0 : index
    %9 = vector.load %arg1[%c0_9, %c1_10, %c0_11, %c0_12] : memref<1x18x18x3xf32, #tpu.memory_space<vmem>>, vector<1x16x16x3xf32>
    %10 = vector.shape_cast %9 : vector<1x16x16x3xf32> to vector<16x16x3xf32>
    %11 = vector.shape_cast %10 : vector<16x16x3xf32> to vector<256x3xf32>
    %c0_13 = arith.constant 0 : index
    %c1_14 = arith.constant 1 : index
    %c1_15 = arith.constant 1 : index
    %c0_16 = arith.constant 0 : index
    %12 = vector.load %arg1[%c0_13, %c1_14, %c1_15, %c0_16] : memref<1x18x18x3xf32, #tpu.memory_space<vmem>>, vector<1x16x16x3xf32>
    %13 = vector.shape_cast %12 : vector<1x16x16x3xf32> to vector<16x16x3xf32>
    %14 = vector.shape_cast %13 : vector<16x16x3xf32> to vector<256x3xf32>
    %c0_17 = arith.constant 0 : index
    %c1_18 = arith.constant 1 : index
    %c2_19 = arith.constant 2 : index
    %c0_20 = arith.constant 0 : index
    %15 = vector.load %arg1[%c0_17, %c1_18, %c2_19, %c0_20] : memref<1x18x18x3xf32, #tpu.memory_space<vmem>>, vector<1x16x16x3xf32>
    %16 = vector.shape_cast %15 : vector<1x16x16x3xf32> to vector<16x16x3xf32>
    %17 = vector.shape_cast %16 : vector<16x16x3xf32> to vector<256x3xf32>
    %c0_21 = arith.constant 0 : index
    %c2_22 = arith.constant 2 : index
    %c0_23 = arith.constant 0 : index
    %c0_24 = arith.constant 0 : index
    %18 = vector.load %arg1[%c0_21, %c2_22, %c0_23, %c0_24] : memref<1x18x18x3xf32, #tpu.memory_space<vmem>>, vector<1x16x16x3xf32>
    %19 = vector.shape_cast %18 : vector<1x16x16x3xf32> to vector<16x16x3xf32>
    %20 = vector.shape_cast %19 : vector<16x16x3xf32> to vector<256x3xf32>
    %c0_25 = arith.constant 0 : index
    %c2_26 = arith.constant 2 : index
    %c1_27 = arith.constant 1 : index
    %c0_28 = arith.constant 0 : index
    %21 = vector.load %arg1[%c0_25, %c2_26, %c1_27, %c0_28] : memref<1x18x18x3xf32, #tpu.memory_space<vmem>>, vector<1x16x16x3xf32>
    %22 = vector.shape_cast %21 : vector<1x16x16x3xf32> to vector<16x16x3xf32>
    %23 = vector.shape_cast %22 : vector<16x16x3xf32> to vector<256x3xf32>
    %c0_29 = arith.constant 0 : index
    %c2_30 = arith.constant 2 : index
    %c2_31 = arith.constant 2 : index
    %c0_32 = arith.constant 0 : index
    %24 = vector.load %arg1[%c0_29, %c2_30, %c2_31, %c0_32] : memref<1x18x18x3xf32, #tpu.memory_space<vmem>>, vector<1x16x16x3xf32>
    %25 = vector.shape_cast %24 : vector<1x16x16x3xf32> to vector<16x16x3xf32>
    %26 = vector.shape_cast %25 : vector<16x16x3xf32> to vector<256x3xf32>
    %27 = tpu.concatenate %2, %5, %8, %11, %14, %17, %20, %23, %26 in 1 : vector<256x3xf32>, vector<256x3xf32>, vector<256x3xf32>, vector<256x3xf32>, vector<256x3xf32>, vector<256x3xf32>, vector<256x3xf32>, vector<256x3xf32>, vector<256x3xf32> -> vector<256x27xf32>
    %28 = arith.truncf %27 : vector<256x27xf32> to vector<256x27xbf16>
    %c0_33 = arith.constant 0 : index
    %c0_34 = arith.constant 0 : index
    %29 = vector.load %arg2[%c0_33, %c0_34] : memref<27x64xbf16, #tpu.memory_space<vmem>>, vector<27x64xbf16>
    %cst = arith.constant dense<0.000000e+00> : vector<256x64xf32>
    %30 = tpu.matmul %28, %29, %cst {dimension_numbers = #tpu.dot_dimension_numbers<[1], [0], [0], [1], [0, 0, 1, 1], [], []>} : vector<256x27xbf16>, vector<27x64xbf16>, vector<256x64xf32> -> vector<256x64xf32>
    %c0_35 = arith.constant 0 : index
    %c0_36 = arith.constant 0 : index
    %31 = vector.load %arg3[%c0_35, %c0_36] : memref<1x64xf32, #tpu.memory_space<vmem>>, vector<1x64xf32>
    %32 = vector.broadcast %31 : vector<1x64xf32> to vector<256x64xf32>
    %33 = arith.addf %30, %32 : vector<256x64xf32>
    %cst_37 = arith.constant 0.000000e+00 : f32
    %34 = vector.broadcast %cst_37 : f32 to vector<256x64xf32>
    %35 = arith.maximumf %33, %34 : vector<256x64xf32>
    %36 = vector.shape_cast %35 : vector<256x64xf32> to vector<8x2x16x64xf32>
    %cst_38 = arith.constant dense<0xFF800000> : vector<8x16x64xf32>
    %37 = vector.multi_reduction <maximumf>, %36, %cst_38 [1] : vector<8x2x16x64xf32> to vector<8x16x64xf32>
    %38 = vector.shape_cast %37 : vector<8x16x64xf32> to vector<8x8x2x64xf32>
    %cst_39 = arith.constant dense<0xFF800000> : vector<8x8x64xf32>
    %39 = vector.multi_reduction <maximumf>, %38, %cst_39 [2] : vector<8x8x2x64xf32> to vector<8x8x64xf32>
    %c0_40 = arith.constant 0 : index
    %c0_41 = arith.constant 0 : index
    %c0_42 = arith.constant 0 : index
    %c0_43 = arith.constant 0 : index
    %40 = vector.load %arg4[%c0_40, %c0_41, %c0_42, %c0_43] : memref<1x8x8x64xf32, #tpu.memory_space<vmem>>, vector<1x8x8x64xf32>
    %41 = vector.shape_cast %40 : vector<1x8x8x64xf32> to vector<8x8x64xf32>
    %42 = vector.shape_cast %39 : vector<8x8x64xf32> to vector<1x8x8x64xf32>
    tpu.vector_store %arg4[%c0_40, %c0_41, %c0_42, %c0_43], %42 {strides = array<i32>} : memref<1x8x8x64xf32, #tpu.memory_space<vmem>>, vector<1x8x8x64xf32>,
    return
  }
  func.func @transform_0(%arg0: i32) -> (i32, i32, i32, i32) {
    %c0_i32 = arith.constant 0 : i32
    %c0_i32_0 = arith.constant 0 : i32
    %c0_i32_1 = arith.constant 0 : i32
    %c0_i32_2 = arith.constant 0 : i32
    return %arg0, %c0_i32, %c0_i32_0, %c0_i32_1 : i32, i32, i32, i32
  }
  func.func @transform_1(%arg0: i32) -> (i32, i32) {
    %c0_i32 = arith.constant 0 : i32
    %c0_i32_0 = arith.constant 0 : i32
    %c0_i32_1 = arith.constant 0 : i32
    return %c0_i32, %c0_i32_0 : i32, i32
  }
  func.func @transform_2(%arg0: i32) -> (i32, i32) {
    %c0_i32 = arith.constant 0 : i32
    %c0_i32_0 = arith.constant 0 : i32
    %c0_i32_1 = arith.constant 0 : i32
    return %c0_i32, %c0_i32_0 : i32, i32
  }
  func.func @transform_3(%arg0: i32) -> (i32, i32, i32, i32) {
    %c0_i32 = arith.constant 0 : i32
    %c0_i32_0 = arith.constant 0 : i32
    %c0_i32_1 = arith.constant 0 : i32
    %c0_i32_2 = arith.constant 0 : i32
    return %arg0, %c0_i32, %c0_i32_0, %c0_i32_1 : i32, i32, i32, i32
  }
}

module attributes {stable_mosaic.version = 11 : i64} {
  func.func @_fc_fused_kernel(%arg0: i32, %arg1: i32, %arg2: memref<2x2048xbf16, #tpu.memory_space<vmem>>, %arg3: memref<2048x128xbf16, #tpu.memory_space<vmem>>, %arg4: memref<1x128xf32, #tpu.memory_space<vmem>>, %arg5: memref<128x128xbf16, #tpu.memory_space<vmem>>, %arg6: memref<1x128xf32, #tpu.memory_space<vmem>>, %arg7: memref<1x2x128xf32, #tpu.memory_space<vmem>>, %arg8: memref<2x128xf32, #tpu.memory_space<vmem>>) attributes {dimension_semantics = [#tpu.dimension_semantics<parallel>, #tpu.dimension_semantics<arbitrary>], iteration_bounds = array<i64: 2, 1>, scalar_prefetch = 0 : i64, scratch_operands = 1 : i64, tpu.core_type = #tpu.core_type<tc>, window_params = [{transform_indices = @transform_0, window_bounds = array<i64: 2, 2048>}, {transform_indices = @transform_1, window_bounds = array<i64: 2048, 128>}, {transform_indices = @transform_2, window_bounds = array<i64: 1, 128>}, {transform_indices = @transform_3, window_bounds = array<i64: 128, 128>}, {pipeline_mode = #tpu.pipeline_mode<synchronous>, transform_indices = @transform_4, window_bounds = array<i64: 1, 128>}, {transform_indices = @transform_5, window_bounds = array<i64: 1, 2, 128>}]} {
    %c0_i32 = arith.constant 0 : i32
    %0 = arith.cmpi eq, %arg1, %c0_i32 : i32
    %1 = arith.extui %0 : i1 to i32
    %c0_i32_0 = arith.constant 0 : i32
    %2 = arith.cmpi ne, %1, %c0_i32_0 : i32
    scf.if %2 {
      %cst_10 = arith.constant 0.000000e+00 : f32
      %12 = vector.broadcast %cst_10 : f32 to vector<2x128xf32>
      %c0_11 = arith.constant 0 : index
      %c0_12 = arith.constant 0 : index
      %13 = vector.load %arg8[%c0_11, %c0_12] : memref<2x128xf32, #tpu.memory_space<vmem>>, vector<2x128xf32>
      tpu.vector_store %arg8[%c0_11, %c0_12], %12 {strides = array<i32>} : memref<2x128xf32, #tpu.memory_space<vmem>>, vector<2x128xf32>,
    } else {
    }
    %c0 = arith.constant 0 : index
    %c0_1 = arith.constant 0 : index
    %3 = vector.load %arg8[%c0, %c0_1] : memref<2x128xf32, #tpu.memory_space<vmem>>, vector<2x128xf32>
    %c0_2 = arith.constant 0 : index
    %c0_3 = arith.constant 0 : index
    %4 = vector.load %arg2[%c0_2, %c0_3] : memref<2x2048xbf16, #tpu.memory_space<vmem>>, vector<2x2048xbf16>
    %c0_4 = arith.constant 0 : index
    %c0_5 = arith.constant 0 : index
    %5 = vector.load %arg3[%c0_4, %c0_5] : memref<2048x128xbf16, #tpu.memory_space<vmem>>, vector<2048x128xbf16>
    %cst = arith.constant dense<0.000000e+00> : vector<2x128xf32>
    %6 = tpu.matmul %4, %5, %cst {dimension_numbers = #tpu.dot_dimension_numbers<[1], [0], [0], [1], [0, 0, 1, 1], [], []>} : vector<2x2048xbf16>, vector<2048x128xbf16>, vector<2x128xf32> -> vector<2x128xf32>
    %7 = arith.addf %3, %6 : vector<2x128xf32>
    %c0_6 = arith.constant 0 : index
    %c0_7 = arith.constant 0 : index
    %8 = vector.load %arg8[%c0_6, %c0_7] : memref<2x128xf32, #tpu.memory_space<vmem>>, vector<2x128xf32>
    tpu.vector_store %arg8[%c0_6, %c0_7], %7 {strides = array<i32>} : memref<2x128xf32, #tpu.memory_space<vmem>>, vector<2x128xf32>,
    %c0_i32_8 = arith.constant 0 : i32
    %9 = arith.cmpi eq, %arg1, %c0_i32_8 : i32
    %10 = arith.extui %9 : i1 to i32
    %c0_i32_9 = arith.constant 0 : i32
    %11 = arith.cmpi ne, %10, %c0_i32_9 : i32
    scf.if %11 {
      %c0_10 = arith.constant 0 : index
      %c0_11 = arith.constant 0 : index
      %12 = vector.load %arg8[%c0_10, %c0_11] : memref<2x128xf32, #tpu.memory_space<vmem>>, vector<2x128xf32>
      %c0_12 = arith.constant 0 : index
      %c0_13 = arith.constant 0 : index
      %13 = vector.load %arg4[%c0_12, %c0_13] : memref<1x128xf32, #tpu.memory_space<vmem>>, vector<1x128xf32>
      %14 = vector.broadcast %13 : vector<1x128xf32> to vector<2x128xf32>
      %15 = arith.addf %12, %14 : vector<2x128xf32>
      %cst_14 = arith.constant 0.000000e+00 : f32
      %16 = vector.broadcast %cst_14 : f32 to vector<2x128xf32>
      %17 = arith.maximumf %15, %16 : vector<2x128xf32>
      %18 = arith.truncf %17 : vector<2x128xf32> to vector<2x128xbf16>
      %c0_15 = arith.constant 0 : index
      %c0_16 = arith.constant 0 : index
      %19 = vector.load %arg5[%c0_15, %c0_16] : memref<128x128xbf16, #tpu.memory_space<vmem>>, vector<128x128xbf16>
      %cst_17 = arith.constant dense<0.000000e+00> : vector<2x128xf32>
      %20 = tpu.matmul %18, %19, %cst_17 {dimension_numbers = #tpu.dot_dimension_numbers<[1], [0], [0], [1], [0, 0, 1, 1], [], []>} : vector<2x128xbf16>, vector<128x128xbf16>, vector<2x128xf32> -> vector<2x128xf32>
      %c0_18 = arith.constant 0 : index
      %c0_19 = arith.constant 0 : index
      %21 = vector.load %arg6[%c0_18, %c0_19] : memref<1x128xf32, #tpu.memory_space<vmem>>, vector<1x128xf32>
      %c0_i32_20 = arith.constant 0 : i32
      %22 = arith.cmpi eq, %arg0, %c0_i32_20 : i32
      %23 = arith.extui %22 : i1 to i32
      %24 = arith.sitofp %23 : i32 to f32
      %25 = vector.broadcast %24 : f32 to vector<1x128xf32>
      %26 = arith.mulf %21, %25 : vector<1x128xf32>
      %27 = vector.broadcast %26 : vector<1x128xf32> to vector<2x128xf32>
      %28 = arith.addf %20, %27 : vector<2x128xf32>
      %c0_21 = arith.constant 0 : index
      %c0_22 = arith.constant 0 : index
      %c0_23 = arith.constant 0 : index
      %29 = vector.load %arg7[%c0_21, %c0_22, %c0_23] : memref<1x2x128xf32, #tpu.memory_space<vmem>>, vector<1x2x128xf32>
      %30 = vector.shape_cast %29 : vector<1x2x128xf32> to vector<2x128xf32>
      %31 = vector.shape_cast %28 : vector<2x128xf32> to vector<1x2x128xf32>
      tpu.vector_store %arg7[%c0_21, %c0_22, %c0_23], %31 {strides = array<i32>} : memref<1x2x128xf32, #tpu.memory_space<vmem>>, vector<1x2x128xf32>,
    } else {
    }
    return
  }
  func.func @transform_0(%arg0: i32, %arg1: i32) -> (i32, i32) {
    %c0_i32 = arith.constant 0 : i32
    %c0_i32_0 = arith.constant 0 : i32
    return %c0_i32, %arg1 : i32, i32
  }
  func.func @transform_1(%arg0: i32, %arg1: i32) -> (i32, i32) {
    %c0_i32 = arith.constant 0 : i32
    return %arg1, %arg0 : i32, i32
  }
  func.func @transform_2(%arg0: i32, %arg1: i32) -> (i32, i32) {
    %c0_i32 = arith.constant 0 : i32
    %c0_i32_0 = arith.constant 0 : i32
    return %c0_i32, %arg0 : i32, i32
  }
  func.func @transform_3(%arg0: i32, %arg1: i32) -> (i32, i32) {
    %c0_i32 = arith.constant 0 : i32
    %c0_i32_0 = arith.constant 0 : i32
    return %arg0, %c0_i32 : i32, i32
  }
  func.func @transform_4(%arg0: i32, %arg1: i32) -> (i32, i32) {
    %c0_i32 = arith.constant 0 : i32
    %c0_i32_0 = arith.constant 0 : i32
    %c0_i32_1 = arith.constant 0 : i32
    return %c0_i32, %c0_i32_0 : i32, i32
  }
  func.func @transform_5(%arg0: i32, %arg1: i32) -> (i32, i32, i32) {
    %c0_i32 = arith.constant 0 : i32
    %c0_i32_0 = arith.constant 0 : i32
    %c0_i32_1 = arith.constant 0 : i32
    return %arg0, %c0_i32, %c0_i32_0 : i32, i32, i32
  }
}

module attributes {stable_mosaic.version = 11 : i64} {
  func.func @_conv_relu_pool_kernel(%arg0: i32, %arg1: memref<1x10x10x64xf32, #tpu.memory_space<vmem>>, %arg2: memref<576x128xbf16, #tpu.memory_space<vmem>>, %arg3: memref<1x128xf32, #tpu.memory_space<vmem>>, %arg4: memref<1x4x4x128xbf16, #tpu.memory_space<vmem>>) attributes {dimension_semantics = [#tpu.dimension_semantics<parallel>], iteration_bounds = array<i64: 2>, scalar_prefetch = 0 : i64, scratch_operands = 0 : i64, tpu.core_type = #tpu.core_type<tc>, window_params = [{transform_indices = @transform_0, window_bounds = array<i64: 1, 10, 10, 64>}, {pipeline_mode = #tpu.pipeline_mode<synchronous>, transform_indices = @transform_1, window_bounds = array<i64: 576, 128>}, {pipeline_mode = #tpu.pipeline_mode<synchronous>, transform_indices = @transform_2, window_bounds = array<i64: 1, 128>}, {transform_indices = @transform_3, window_bounds = array<i64: 1, 4, 4, 128>}]} {
    %c0 = arith.constant 0 : index
    %c0_0 = arith.constant 0 : index
    %c0_1 = arith.constant 0 : index
    %c0_2 = arith.constant 0 : index
    %0 = vector.load %arg1[%c0, %c0_0, %c0_1, %c0_2] : memref<1x10x10x64xf32, #tpu.memory_space<vmem>>, vector<1x8x8x64xf32>
    %1 = vector.shape_cast %0 : vector<1x8x8x64xf32> to vector<8x8x64xf32>
    %2 = vector.shape_cast %1 : vector<8x8x64xf32> to vector<64x64xf32>
    %c0_3 = arith.constant 0 : index
    %c0_4 = arith.constant 0 : index
    %c1 = arith.constant 1 : index
    %c0_5 = arith.constant 0 : index
    %3 = vector.load %arg1[%c0_3, %c0_4, %c1, %c0_5] : memref<1x10x10x64xf32, #tpu.memory_space<vmem>>, vector<1x8x8x64xf32>
    %4 = vector.shape_cast %3 : vector<1x8x8x64xf32> to vector<8x8x64xf32>
    %5 = vector.shape_cast %4 : vector<8x8x64xf32> to vector<64x64xf32>
    %c0_6 = arith.constant 0 : index
    %c0_7 = arith.constant 0 : index
    %c2 = arith.constant 2 : index
    %c0_8 = arith.constant 0 : index
    %6 = vector.load %arg1[%c0_6, %c0_7, %c2, %c0_8] : memref<1x10x10x64xf32, #tpu.memory_space<vmem>>, vector<1x8x8x64xf32>
    %7 = vector.shape_cast %6 : vector<1x8x8x64xf32> to vector<8x8x64xf32>
    %8 = vector.shape_cast %7 : vector<8x8x64xf32> to vector<64x64xf32>
    %c0_9 = arith.constant 0 : index
    %c1_10 = arith.constant 1 : index
    %c0_11 = arith.constant 0 : index
    %c0_12 = arith.constant 0 : index
    %9 = vector.load %arg1[%c0_9, %c1_10, %c0_11, %c0_12] : memref<1x10x10x64xf32, #tpu.memory_space<vmem>>, vector<1x8x8x64xf32>
    %10 = vector.shape_cast %9 : vector<1x8x8x64xf32> to vector<8x8x64xf32>
    %11 = vector.shape_cast %10 : vector<8x8x64xf32> to vector<64x64xf32>
    %c0_13 = arith.constant 0 : index
    %c1_14 = arith.constant 1 : index
    %c1_15 = arith.constant 1 : index
    %c0_16 = arith.constant 0 : index
    %12 = vector.load %arg1[%c0_13, %c1_14, %c1_15, %c0_16] : memref<1x10x10x64xf32, #tpu.memory_space<vmem>>, vector<1x8x8x64xf32>
    %13 = vector.shape_cast %12 : vector<1x8x8x64xf32> to vector<8x8x64xf32>
    %14 = vector.shape_cast %13 : vector<8x8x64xf32> to vector<64x64xf32>
    %c0_17 = arith.constant 0 : index
    %c1_18 = arith.constant 1 : index
    %c2_19 = arith.constant 2 : index
    %c0_20 = arith.constant 0 : index
    %15 = vector.load %arg1[%c0_17, %c1_18, %c2_19, %c0_20] : memref<1x10x10x64xf32, #tpu.memory_space<vmem>>, vector<1x8x8x64xf32>
    %16 = vector.shape_cast %15 : vector<1x8x8x64xf32> to vector<8x8x64xf32>
    %17 = vector.shape_cast %16 : vector<8x8x64xf32> to vector<64x64xf32>
    %c0_21 = arith.constant 0 : index
    %c2_22 = arith.constant 2 : index
    %c0_23 = arith.constant 0 : index
    %c0_24 = arith.constant 0 : index
    %18 = vector.load %arg1[%c0_21, %c2_22, %c0_23, %c0_24] : memref<1x10x10x64xf32, #tpu.memory_space<vmem>>, vector<1x8x8x64xf32>
    %19 = vector.shape_cast %18 : vector<1x8x8x64xf32> to vector<8x8x64xf32>
    %20 = vector.shape_cast %19 : vector<8x8x64xf32> to vector<64x64xf32>
    %c0_25 = arith.constant 0 : index
    %c2_26 = arith.constant 2 : index
    %c1_27 = arith.constant 1 : index
    %c0_28 = arith.constant 0 : index
    %21 = vector.load %arg1[%c0_25, %c2_26, %c1_27, %c0_28] : memref<1x10x10x64xf32, #tpu.memory_space<vmem>>, vector<1x8x8x64xf32>
    %22 = vector.shape_cast %21 : vector<1x8x8x64xf32> to vector<8x8x64xf32>
    %23 = vector.shape_cast %22 : vector<8x8x64xf32> to vector<64x64xf32>
    %c0_29 = arith.constant 0 : index
    %c2_30 = arith.constant 2 : index
    %c2_31 = arith.constant 2 : index
    %c0_32 = arith.constant 0 : index
    %24 = vector.load %arg1[%c0_29, %c2_30, %c2_31, %c0_32] : memref<1x10x10x64xf32, #tpu.memory_space<vmem>>, vector<1x8x8x64xf32>
    %25 = vector.shape_cast %24 : vector<1x8x8x64xf32> to vector<8x8x64xf32>
    %26 = vector.shape_cast %25 : vector<8x8x64xf32> to vector<64x64xf32>
    %27 = tpu.concatenate %2, %5, %8, %11, %14, %17, %20, %23, %26 in 1 : vector<64x64xf32>, vector<64x64xf32>, vector<64x64xf32>, vector<64x64xf32>, vector<64x64xf32>, vector<64x64xf32>, vector<64x64xf32>, vector<64x64xf32>, vector<64x64xf32> -> vector<64x576xf32>
    %28 = arith.truncf %27 : vector<64x576xf32> to vector<64x576xbf16>
    %c0_33 = arith.constant 0 : index
    %c0_34 = arith.constant 0 : index
    %29 = vector.load %arg2[%c0_33, %c0_34] : memref<576x128xbf16, #tpu.memory_space<vmem>>, vector<576x128xbf16>
    %cst = arith.constant dense<0.000000e+00> : vector<64x128xf32>
    %30 = tpu.matmul %28, %29, %cst {dimension_numbers = #tpu.dot_dimension_numbers<[1], [0], [0], [1], [0, 0, 1, 1], [], []>} : vector<64x576xbf16>, vector<576x128xbf16>, vector<64x128xf32> -> vector<64x128xf32>
    %c0_35 = arith.constant 0 : index
    %c0_36 = arith.constant 0 : index
    %31 = vector.load %arg3[%c0_35, %c0_36] : memref<1x128xf32, #tpu.memory_space<vmem>>, vector<1x128xf32>
    %32 = vector.broadcast %31 : vector<1x128xf32> to vector<64x128xf32>
    %33 = arith.addf %30, %32 : vector<64x128xf32>
    %cst_37 = arith.constant 0.000000e+00 : f32
    %34 = vector.broadcast %cst_37 : f32 to vector<64x128xf32>
    %35 = arith.maximumf %33, %34 : vector<64x128xf32>
    %36 = vector.shape_cast %35 : vector<64x128xf32> to vector<4x2x8x128xf32>
    %cst_38 = arith.constant dense<0xFF800000> : vector<4x8x128xf32>
    %37 = vector.multi_reduction <maximumf>, %36, %cst_38 [1] : vector<4x2x8x128xf32> to vector<4x8x128xf32>
    %38 = vector.shape_cast %37 : vector<4x8x128xf32> to vector<4x4x2x128xf32>
    %cst_39 = arith.constant dense<0xFF800000> : vector<4x4x128xf32>
    %39 = vector.multi_reduction <maximumf>, %38, %cst_39 [2] : vector<4x4x2x128xf32> to vector<4x4x128xf32>
    %40 = arith.truncf %39 : vector<4x4x128xf32> to vector<4x4x128xbf16>
    %c0_40 = arith.constant 0 : index
    %c0_41 = arith.constant 0 : index
    %c0_42 = arith.constant 0 : index
    %c0_43 = arith.constant 0 : index
    %41 = vector.load %arg4[%c0_40, %c0_41, %c0_42, %c0_43] : memref<1x4x4x128xbf16, #tpu.memory_space<vmem>>, vector<1x4x4x128xbf16>
    %42 = vector.shape_cast %41 : vector<1x4x4x128xbf16> to vector<4x4x128xbf16>
    %43 = vector.shape_cast %40 : vector<4x4x128xbf16> to vector<1x4x4x128xbf16>
    tpu.vector_store %arg4[%c0_40, %c0_41, %c0_42, %c0_43], %43 {strides = array<i32>} : memref<1x4x4x128xbf16, #tpu.memory_space<vmem>>, vector<1x4x4x128xbf16>,
    return
  }
  func.func @transform_0(%arg0: i32) -> (i32, i32, i32, i32) {
    %c0_i32 = arith.constant 0 : i32
    %c0_i32_0 = arith.constant 0 : i32
    %c0_i32_1 = arith.constant 0 : i32
    %c0_i32_2 = arith.constant 0 : i32
    return %arg0, %c0_i32, %c0_i32_0, %c0_i32_1 : i32, i32, i32, i32
  }
  func.func @transform_1(%arg0: i32) -> (i32, i32) {
    %c0_i32 = arith.constant 0 : i32
    %c0_i32_0 = arith.constant 0 : i32
    %c0_i32_1 = arith.constant 0 : i32
    return %c0_i32, %c0_i32_0 : i32, i32
  }
  func.func @transform_2(%arg0: i32) -> (i32, i32) {
    %c0_i32 = arith.constant 0 : i32
    %c0_i32_0 = arith.constant 0 : i32
    %c0_i32_1 = arith.constant 0 : i32
    return %c0_i32, %c0_i32_0 : i32, i32
  }
  func.func @transform_3(%arg0: i32) -> (i32, i32, i32, i32) {
    %c0_i32 = arith.constant 0 : i32
    %c0_i32_0 = arith.constant 0 : i32
    %c0_i32_1 = arith.constant 0 : i32
    %c0_i32_2 = arith.constant 0 : i32
    return %arg0, %c0_i32, %c0_i32_0, %c0_i32_1 : i32, i32, i32, i32
  }
}

</mosaic_0001>

<bundles_post_ra>
// kernel: custom_alexnet_forward.4
= control target key start
LH: loop header
LB: loop body
LE: loop exit
PB: predicated region body
PF: predicated region fallthrough
CT: control target
= control target key end

     0   :  { %s1681_s12 = smov 0   ;;  %s2088_s0 = inlined_call_operand.vmem [shape: f32[2,10,10,64], index: 0, kind: input, shape index: {}]   ;;  %s2089_s1 = inlined_call_operand.vmem [shape: bf16[576,128], index: 1, kind: input, shape index: {}]   ;;  %s2090_s2 = inlined_call_operand.vmem [shape: f32[1,128], index: 2, kind: input, shape index: {}]   ;;  %s2091_s3 = inlined_call_operand.vmem [shape: bf16[2,4,4,128], index: 3, kind: output, shape index: {}]  }
   0x1 LB: > { %s1302_s13 = sadd.s32 4294967295, %s1658_s12   ;;  %p1306_p0 = scmp.ge.s32.totalorder %s1658_s12, 1  ;;  %s1658_s12 = sphi %s1681_s12, %s13_s12  }
   0x2   : > { %p137_p1 = scmp.lt.s32.totalorder %s1658_s12, 3 }
   0x4   : > { %p138_p2 = pnand %p1306_p0, %p137_p1 }
   0x5   : > { %p161_p3 = scmp.lt.s32.totalorder (!%p138_p2), %s1302_s13, 1  ;;  %s1660_s18 = smov (!%p138_p2), 64  }
   0x6   : > { %141 = sbr.rel (%p138_p2) target bundleno = 409 (0x199), region = 32 }
   0xb   : > { %s2093_s13 = smov (!%p161_p3, %s1302_s13), 1  ;;  %v1516_v15 = vld [vmem:[%s2089_s1 + $0x38] sm:$0xff]  ;;  %v1515_v20 = vld [vmem:[%s2089_s1 + $0x30] sm:$0xff]  ;;  %v1514_v24 = vld [vmem:[%s2089_s1 + $0x28] sm:$0xff]  ;;  %vm374_vm0 = vcmask 523264   ;;  %vm916_vm1 = vcmask 1041408  }
   0xc   : > { %s1561_s14 = smul.u32 160, %s2093_s13  ;;  %1546 = vmatpush.bf16.msra.mxu2 %v1516_v15  ;;  %1545 = vmatpush.bf16.msra.mxu1 %v1516_v15  ;;  %v1540_v21 = vld [vmem:[%s2089_s1 + $0xf8] sm:$0xff]  ;;  %v1513_v29 = vld [vmem:[%s2089_s1 + $0x20] sm:$0xff]  ;;  %v1511_v37 = vld [vmem:[%s2089_s1 + $0x10] sm:$0xff]  ;;  %vm1193_vm2 = vcmask 1041409   ;;  %vm1196_vm3 = vcmask 1042434  }
   0xd   : > { %731 = vmatpush.bf16.msra.mxu0 %v1516_v15  ;;  %818 = vmatpush.bf16.msra.mxu3 %v1540_v21  ;;  %v1512_v32 = vld [vmem:[%s2089_s1 + $0x18] sm:$0xff]  ;;  %v1510_v42 = vld [vmem:[%s2089_s1 + $0x8] sm:$0xff]  ;;  %v1509_v46 = vld [vmem:[%s2089_s1] sm:$0xff]  ;;  %vm1199_vm4 = vcmask 1043459   ;;  %s1508_s21 = sshll.u32 %s2093_s13, 3 }
   0xe   : > { %s1695_s17 = scalar_lea.vmem %s2088_s0, %s1561_s14  ;;  %v1532_v47 = vld [vmem:[%s2089_s1 + $0xb8] sm:$0xff]  ;;  %v1539_v49 = vld [vmem:[%s2089_s1 + $0xf0] sm:$0xff]  ;;  %v1538_v51 = vld [vmem:[%s2089_s1 + $0xe8] sm:$0xff]  ;;  %s2053_s23 = scalar_lea.vmem %s2091_s3, %s1508_s21 }
   0xf   : > { %v1698_v0 = vld [vmem:[%s1695_s17 + $0x21] sm:$0xff]  ;;  %v1701_v1 = vld [vmem:[%s1695_s17 + $0x31] sm:$0xff] }
  0x10   : > { %v1704_v2 = vld [vmem:[%s1695_s17 + $0x41] sm:$0xff]  ;;  %v1571_v3 = vpack.i.bf16 %v1701_v1, %v1698_v0  ;;  %v1709_v4 = vld [vmem:[%s1695_s17 + $0x51] sm:$0xff]  ;;  %1548 = vmatpush.bf16.msra.mxu2 %v1515_v20  ;;  %1547 = vmatpush.bf16.msra.mxu1 %v1515_v20 }
  0x11   : > { %v1581_v5 = vpack.i.bf16 %v1709_v4, %v1704_v2  ;;  %v1715_v6 = vld [vmem:[%s1695_s17 + $0x12] sm:$0xff]  ;;  %v1718_v7 = vld [vmem:[%s1695_s17 + $0x22] sm:$0xff]  ;;  %732 = vmatpush.bf16.msra.mxu0 %v1515_v20  ;;  %819 = vmatpush.bf16.msra.mxu3 %v1539_v49 }
  0x12   : > { %1572 = vrot.lane.b32.xlu0 %v1571_v3, %s1660_s18  ;;  %v1722_v8 = vld [vmem:[%s1695_s17 + $0x61] sm:$0xff]  ;;  %v1725_v9 = vld [vmem:[%s1695_s17 + $0x71] sm:$0xff]  ;;  %v1591_v10 = vpack.i.bf16 %v1718_v7, %v1715_v6 }
  0x13   : > { %1582 = vrot.lane.b32.xlu1 %v1581_v5, %s1660_s18  ;;  %v180_v11 = vld [vmem:[%s1695_s17 + $0x1] sm:$0xff]  ;;  %v1731_v12 = vld [vmem:[%s1695_s17 + $0x11] sm:$0xff]  ;;  %v1576_v13 = vpack.i.bf16 %v1725_v9, %v1722_v8 }
  0x14   : > { %1592 = vrot.lane.b32.xlu2 %v1591_v10, %s1660_s18  ;;  %v1586_v14 = vpack.i.bf16 %v1731_v12, %v180_v11  ;;  %v1743_v16 = vld [vmem:[%s1695_s17 + $0x10] sm:$0xff]  ;;  %v1746_v17 = vld [vmem:[%s1695_s17 + $0x20] sm:$0xff]  ;;  %1550 = vmatpush.bf16.msra.mxu2 %v1514_v24  ;;  %v1524_v52 = vld [vmem:[%s2089_s1 + $0x78] sm:$0xff] }
  0x15   : > { %v1749_v18 = vld [vmem:[%s1695_s17 + $0x32] sm:$0xff]  ;;  %v1752_v19 = vld [vmem:[%s1695_s17 + $0x42] sm:$0xff]  ;;  %v1601_v22 = vpack.i.bf16 %v1746_v17, %v1743_v16  ;;  %1549 = vmatpush.bf16.msra.mxu1 %v1514_v24  ;;  %733 = vmatpush.bf16.msra.mxu0 %v1514_v24 }
  0x16   : > { %v1606_v23 = vpack.i.bf16 %v1752_v19, %v1749_v18  ;;  %v1771_v25 = vld [vmem:[%s1695_s17 + $0x30] sm:$0xff]  ;;  %v1774_v26 = vld [vmem:[%s1695_s17 + $0x40] sm:$0xff]  ;;  %820 = vmatpush.bf16.msra.mxu3 %v1538_v51  ;;  %v1530_v53 = vld [vmem:[%s2089_s1 + $0xa8] sm:$0xff] }
  0x17   : > { %v1777_v27 = vld [vmem:[%s1695_s17 + $0x52] sm:$0xff]  ;;  %v1780_v28 = vld [vmem:[%s1695_s17 + $0x62] sm:$0xff]  ;;  %v1616_v30 = vpack.i.bf16 %v1774_v26, %v1771_v25 }
  0x18   : > { %v1621_v31 = vpack.i.bf16 %v1780_v28, %v1777_v27  ;;  %1552 = vmatpush.bf16.msra.mxu2 %v1513_v29  ;;  %v1796_v33 = vld [vmem:[%s1695_s17 + $0x50] sm:$0xff]  ;;  %v1799_v34 = vld [vmem:[%s1695_s17 + $0x60] sm:$0xff]  ;;  %v1536_v57 = vld [vmem:[%s2089_s1 + $0xd8] sm:$0xff] }
  0x19   : > { %1551 = vmatpush.bf16.msra.mxu1 %v1513_v29  ;;  %734 = vmatpush.bf16.msra.mxu0 %v1513_v29  ;;  %v1802_v35 = vld [vmem:[%s1695_s17 + $0x72] sm:$0xff]  ;;  %v1805_v36 = vld [vmem:[%s1695_s17 + $0x82] sm:$0xff]  ;;  %v1631_v38 = vpack.i.bf16 %v1799_v34, %v1796_v33 }
  0x1a   : > { %1577 = vrot.lane.b32.xlu0 %v1576_v13, %s1660_s18  ;;  %v1814_v39 = vld [vmem:[%s1695_s17 + $0x81] sm:$0xff]  ;;  %v1349_v40 = vld [vmem:[%s1695_s17 + $0x91] sm:$0xff]  ;;  %v1636_v41 = vpack.i.bf16 %v1805_v36, %v1802_v35 }
  0x1b   : > { %1587 = vrot.lane.b32.xlu1 %v1586_v14, %s1660_s18  ;;  %v1641_v43 = vpack.i.bf16 %v1349_v40, %v1814_v39  ;;  %v1826_v44 = vld [vmem:[%s1695_s17 + $0x70] sm:$0xff]  ;;  %v1829_v45 = vld [vmem:[%s1695_s17 + $0x80] sm:$0xff]  ;;  %v1522_v58 = vld [vmem:[%s2089_s1 + $0x68] sm:$0xff] }
  0x1c   : > { %1597 = vrot.lane.b32.xlu2 %v1571_v3, %s1660_s18  ;;  %1554 = vmatpush.bf16.msra.mxu2 %v1512_v32  ;;  %v1646_v48 = vpack.i.bf16 %v1829_v45, %v1826_v44  ;;  %v1531_v50 = vld [vmem:[%s2089_s1 + $0xb0] sm:$0xff]  ;;  %v1537_v54 = vld [vmem:[%s2089_s1 + $0xe0] sm:$0xff]  ;;  %v1528_v60 = vld [vmem:[%s2089_s1 + $0x98] sm:$0xff] }
  0x1d   : > { %1553 = vmatpush.bf16.msra.mxu1 %v1512_v32  ;;  %735 = vmatpush.bf16.msra.mxu0 %v1512_v32  ;;  %v1523_v55 = vld [vmem:[%s2089_s1 + $0x70] sm:$0xff]  ;;  %v1529_v56 = vld [vmem:[%s2089_s1 + $0xa0] sm:$0xff]  ;;  %v1544_v3 = vld [vmem:[%s2089_s1 + $0x118] sm:$0xff] }
  0x1e   : > { %821 = vmatpush.bf16.msra.mxu3 %v1537_v54  ;;  %v1535_v61 = vld [vmem:[%s2089_s1 + $0xd0] sm:$0xff]  ;;  %v1521_v62 = vld [vmem:[%s2089_s1 + $0x60] sm:$0xff]  ;;  %v1520_v10 = vld [vmem:[%s2089_s1 + $0x58] sm:$0xff] }
  0x1f   : > { %v1527_v63 = vld [vmem:[%s2089_s1 + $0x90] sm:$0xff]  ;;  %v1526_v15 = vld [vmem:[%s2089_s1 + $0x88] sm:$0xff]  ;;  %v1533_v20 = vld [vmem:[%s2089_s1 + $0xc0] sm:$0xff] }
  0x20   : > { %1556 = vmatpush.bf16.msra.mxu2 %v1511_v37  ;;  %v1543_v21 = vld [vmem:[%s2089_s1 + $0x110] sm:$0xff]  ;;  %v1525_v29 = vld [vmem:[%s2089_s1 + $0x80] sm:$0xff]  ;;  %v1518_v32 = vld [vmem:[%s2089_s1 + $0x48] sm:$0xff] }
  0x21   : > { %1555 = vmatpush.bf16.msra.mxu1 %v1511_v37  ;;  %736 = vmatpush.bf16.msra.mxu0 %v1511_v37  ;;  %v1519_v24 = vld [vmem:[%s2089_s1 + $0x50] sm:$0xff]  ;;  %v1541_v37 = vld [vmem:[%s2089_s1 + $0x100] sm:$0xff] }
  0x22   : > { %1602 = vrot.lane.b32.xlu0 %v1601_v22, %s1660_s18  ;;  %822 = vmatpush.bf16.msra.mxu3 %v1536_v57 }
  0x23   : > { %1607 = vrot.lane.b32.xlu1 %v1606_v23, %s1660_s18 }
  0x24   : > { %1612 = vrot.lane.b32.xlu2 %v1581_v5, %s1660_s18  ;;  %1558 = vmatpush.bf16.msra.mxu2 %v1510_v42  ;;  %v1534_v5 = vld [vmem:[%s2089_s1 + $0xc8] sm:$0xff] }
  0x25   : > { %1557 = vmatpush.bf16.msra.mxu1 %v1510_v42  ;;  %737 = vmatpush.bf16.msra.mxu0 %v1510_v42 }
  0x26   : > { %823 = vmatpush.bf16.msra.mxu3 %v1535_v61 }
  0x28   : > { %1560 = vmatpush.bf16.msra.mxu2 %v1509_v46 }
  0x29   : > { %1559 = vmatpush.bf16.msra.mxu1 %v1509_v46  ;;  %738 = vmatpush.bf16.msra.mxu0 %v1509_v46 }
  0x2a   : > { %1617 = vrot.lane.b32.xlu0 %v1616_v30, %s1660_s18  ;;  %824 = vmatpush.bf16.msra.mxu3 %v1534_v5 }
  0x2b   : > { %1622 = vrot.lane.b32.xlu1 %v1621_v31, %s1660_s18  ;;  %v1542_v31 = vld [vmem:[%s2089_s1 + $0x108] sm:$0xff] }
  0x2c   : > { %1627 = vrot.lane.b32.xlu2 %v1576_v13, %s1660_s18  ;;  %789 = vmatpush.bf16.msrb.mxu2 %v1532_v47 }
  0x2d   : > { %760 = vmatpush.bf16.msrb.mxu1 %v1524_v52  ;;  %851 = vmatpush.bf16.msrb.mxu0 %v1544_v3 }
  0x2e   : > { %825 = vmatpush.bf16.msra.mxu3 %v1533_v20 }
  0x30   : > { %790 = vmatpush.bf16.msrb.mxu2 %v1531_v50 }
  0x31   : > { %761 = vmatpush.bf16.msrb.mxu1 %v1523_v55  ;;  %852 = vmatpush.bf16.msrb.mxu0 %v1543_v21 }
  0x32   : > { %1632 = vrot.lane.b32.xlu0 %v1631_v38, %s1660_s18  ;;  %v1517_v38 = vld [vmem:[%s2089_s1 + $0x40] sm:$0xff] }
  0x33   : > { %1637 = vrot.lane.b32.xlu1 %v1636_v41, %s1660_s18 }
  0x34   : > { %1642 = vrot.lane.b32.xlu2 %v1641_v43, %s1660_s18  ;;  %791 = vmatpush.bf16.msrb.mxu2 %v1530_v53 }
  0x35   : > { %762 = vmatpush.bf16.msrb.mxu1 %v1522_v58  ;;  %853 = vmatpush.bf16.msrb.mxu0 %v1542_v31 }
  0x38   : > { %792 = vmatpush.bf16.msrb.mxu2 %v1529_v56 }
  0x39   : > { %763 = vmatpush.bf16.msrb.mxu1 %v1521_v62  ;;  %854 = vmatpush.bf16.msrb.mxu0 %v1541_v37 }
  0x3a   : > { %1647 = vrot.lane.b32.xlu0 %v1646_v48, %s1660_s18 }
  0x3c   : > { %793 = vmatpush.bf16.msrb.mxu2 %v1528_v60  ;;  %v172_v60 = vld [vmem:[%s1695_s17] sm:$0xff] }
  0x3d   : > { %764 = vmatpush.bf16.msrb.mxu1 %v1520_v10 }
  0x40   : > { %794 = vmatpush.bf16.msrb.mxu2 %v1527_v63 }
  0x41   : > { %765 = vmatpush.bf16.msrb.mxu1 %v1519_v24 }
  0x44   : > { %795 = vmatpush.bf16.msrb.mxu2 %v1526_v15 }
  0x45   : > { %766 = vmatpush.bf16.msrb.mxu1 %v1518_v32 }
  0x48   : > { %796 = vmatpush.bf16.msrb.mxu2 %v1525_v29 }
  0x49   : > { %767 = vmatpush.bf16.msrb.mxu1 %v1517_v38 }
  0x6e   : > { %v1871_v59 = vpop.permute.xlu2 %1592 }
  0x6f   : > { %v1595_v24 = vunpack.i.h.bf16 %v1871_v59 }
  0x71   : > { %v392_v32 = vsel %vm374_vm0, %v1698_v0, %v1595_v24 }
  0x76   : > { %v1598_v11 = vpop.permute.xlu2 %1597 }
  0x77   : > { %v1600_v13 = vunpack.i.h.bf16 %v1598_v11  ;;  %v1599_v14 = vunpack.i.l.bf16 %v1598_v11 }
  0x79   : > { %v399_v22 = vsel %vm374_vm0, %v1746_v17, %v1599_v14  ;;  %v400_v23 = vsel %vm374_vm0, %v1771_v25, %v1600_v13 }
  0x7a   : > { %v410_v30 = vpack.c.bf16 %v400_v23, %v399_v22 }
  0x7c   : > { %826 = vmatmul.bf16.vlgmr.msra.gmra.mxu3 %v410_v30 }
  0x7e   : > { %v1613_v40 = vpop.permute.xlu2 %1612 }
  0x7f   : > { %v1615_v47 = vunpack.i.h.bf16 %v1613_v40  ;;  %v1614_v48 = vunpack.i.l.bf16 %v1613_v40 }
  0x81   : > { %v401_v52 = vsel %vm374_vm0, %v1774_v26, %v1614_v48  ;;  %v402_v53 = vsel %vm374_vm0, %v1796_v33, %v1615_v47 }
  0x82   : > { %v415_v55 = vpack.c.bf16 %v402_v53, %v401_v52 }
  0x84   : > { %v1573_v41 = vpop.permute.xlu0 %1572 }
  0x85   : > { %v1575_v42 = vunpack.i.h.bf16 %v1573_v41  ;;  %v1574_v43 = vunpack.i.l.bf16 %v1573_v41  ;;  %v1583_v46 = vpop.permute.xlu1 %1582  ;;  %v188_v41 = vld [vmem:[%s1695_s17 + $0x2] sm:$0xff] }
  0x86   : > { %v1585_v10 = vunpack.i.h.bf16 %v1583_v46  ;;  %v1584_v11 = vunpack.i.l.bf16 %v1583_v46  ;;  %v1628_v14 = vpop.permute.xlu2 %1627 }
  0x87   : > { %v377_v49 = vsel %vm374_vm0, %v1746_v17, %v1574_v43  ;;  %v378_v50 = vsel %vm374_vm0, %v1771_v25, %v1575_v42  ;;  %v1630_v21 = vunpack.i.h.bf16 %v1628_v14  ;;  %v1629_v22 = vunpack.i.l.bf16 %v1628_v14 }
  0x88   : > { %v412_v51 = vpack.c.bf16 %v378_v50, %v377_v49  ;;  %v379_v15 = vsel %vm374_vm0, %v1774_v26, %v1584_v11  ;;  %v380_v20 = vsel %vm374_vm0, %v1796_v33, %v1585_v10  ;;  %v1341_v49 = vld [vmem:[%s1695_s17 + $0x90] sm:$0xff] }
  0x89   : > { %v417_v23 = vpack.c.bf16 %v380_v20, %v379_v15  ;;  %v403_v29 = vsel %vm374_vm0, %v1799_v34, %v1629_v22  ;;  %v404_v30 = vsel %vm374_vm0, %v1826_v44, %v1630_v21  ;;  %v1357_v22 = vld [vmem:[%s1695_s17 + $0x92] sm:$0xff] }
  0x8a   : > { %744 = vmatmul.bf16.vlgmr.msra.gmra.mxu1 %v412_v51  ;;  %v420_v26 = vpack.c.bf16 %v404_v30, %v403_v29 }
  0x8c   : > { %v1578_v54 = vpop.permute.xlu0 %1577  ;;  %831 = vmatmul.bf16.gmra.mxu3 %v415_v55 }
  0x8d   : > { %v1580_v56 = vunpack.i.h.bf16 %v1578_v54  ;;  %v1579_v57 = vunpack.i.l.bf16 %v1578_v54  ;;  %v1588_v58 = vpop.permute.xlu1 %1587 }
  0x8e   : > { %v1590_v61 = vunpack.i.h.bf16 %v1588_v58  ;;  %v1589_v17 = vunpack.i.l.bf16 %v1588_v58  ;;  %v416_v58 = vpack.c.bf16 %v1777_v27, %v1752_v19 }
  0x8f   : > { %v381_v25 = vsel %vm374_vm0, %v1799_v34, %v1579_v57  ;;  %v382_v62 = vsel %vm374_vm0, %v1826_v44, %v1580_v56  ;;  %v1643_v44 = vpop.permute.xlu2 %1642 }
  0x90   : > { %v422_v63 = vpack.c.bf16 %v382_v62, %v381_v25  ;;  %v375_v3 = vsel %vm374_vm0, %v172_v60, %v1589_v17  ;;  %v376_v5 = vsel %vm374_vm0, %v1743_v16, %v1590_v61  ;;  %v1594_v16 = vunpack.i.l.bf16 %v1871_v59 }
  0x91   : > { %v407_v13 = vpack.c.bf16 %v376_v5, %v375_v3  ;;  %v411_v59 = vpack.c.bf16 %v1749_v18, %v1718_v7  ;;  %v1644_v43 = vunpack.i.l.bf16 %v1643_v44  ;;  %v1645_v48 = vunpack.i.h.bf16 %v1643_v44 }
  0x92   : > { %754 = vmatmul.bf16.vlgmr.msra.gmra.mxu2 %v422_v63  ;;  %v391_v33 = vsel %vm374_vm0, %v1731_v12, %v1594_v16 }
  0x93   : > { %739 = vmatmul.bf16.vlgmr.msra.gmra.mxu0 %v407_v13  ;;  %v409_v40 = vpack.c.bf16 %v392_v32, %v391_v33  ;;  %v405_v50 = vsel %vm374_vm0, %v1829_v45, %v1644_v43 }
  0x94   : > { %v1603_v31 = vpop.permute.xlu0 %1602 }
  0x95   : > { %v1605_v37 = vunpack.i.h.bf16 %v1603_v31  ;;  %v1604_v38 = vunpack.i.l.bf16 %v1603_v31  ;;  %v1608_v42 = vpop.permute.xlu1 %1607 }
  0x96   : > { %v1610_v46 = vunpack.i.h.bf16 %v1608_v42  ;;  %v1609_v47 = vunpack.i.l.bf16 %v1608_v42 }
  0x97   : > { %v383_v34 = vsel %vm374_vm0, %v188_v41, %v1604_v38  ;;  %v384_v12 = vsel %vm374_vm0, %v1715_v6, %v1605_v37  ;;  %v406_v6 = vsel %vm374_vm0, %v1341_v49, %v1645_v48 }
  0x98   : > { %v408_v0 = vpack.c.bf16 %v384_v12, %v383_v34  ;;  %v393_v51 = vsel %vm374_vm0, %v1701_v1, %v1609_v47  ;;  %v394_v52 = vsel %vm374_vm0, %v1704_v2, %v1610_v46  ;;  %v425_v54 = vpack.c.bf16 %v406_v6, %v405_v50 }
  0x99   : > { %v414_v55 = vpack.c.bf16 %v394_v52, %v393_v51 }
  0x9a   : > { %749 = vmatmul.bf16.gmra.mxu1 %v417_v23 }
  0x9c   : > { %836 = vmatmul.bf16.gmra.mxu3 %v420_v26  ;;  %v1618_v53 = vpop.permute.xlu0 %1617 }
  0x9d   : > { %v1620_v56 = vunpack.i.h.bf16 %v1618_v53  ;;  %v1619_v57 = vunpack.i.l.bf16 %v1618_v53  ;;  %v1623_v45 = vpop.permute.xlu1 %1622 }
  0x9e   : > { %v1625_v61 = vunpack.i.h.bf16 %v1623_v45  ;;  %v1624_v17 = vunpack.i.l.bf16 %v1623_v45 }
  0x9f   : > { %v385_v1 = vsel %vm374_vm0, %v1718_v7, %v1619_v57  ;;  %v386_v2 = vsel %vm374_vm0, %v1749_v18, %v1620_v56  ;;  %v421_v7 = vpack.c.bf16 %v1802_v35, %v1780_v28 }
  0xa0   : > { %v413_v60 = vpack.c.bf16 %v386_v2, %v385_v1  ;;  %v395_v25 = vsel %vm374_vm0, %v1709_v4, %v1624_v17  ;;  %v396_v62 = vsel %vm374_vm0, %v1722_v8, %v1625_v61 }
  0xa1   : > { %v419_v3 = vpack.c.bf16 %v396_v62, %v395_v25 }
  0xa2   : > { %797 = vmatmul.bf16.vlgmr.msrb.gmra.mxu2 %v409_v40 }
  0xa3   : > { %1502 = vmatmul.msk.bf16.vlgmr.msrb.gmra.mxu0 %vm374_vm0, %v411_v59 }
  0xa4   : > { %v1633_v63 = vpop.permute.xlu0 %1632 }
  0xa5   : > { %v1635_v5 = vunpack.i.h.bf16 %v1633_v63  ;;  %v1634_v10 = vunpack.i.l.bf16 %v1633_v63  ;;  %v1638_v11 = vpop.permute.xlu1 %1637 }
  0xa6   : > { %v1640_v8 = vunpack.i.h.bf16 %v1638_v11  ;;  %v1639_v14 = vunpack.i.l.bf16 %v1638_v11 }
  0xa7   : > { %v387_v18 = vsel %vm374_vm0, %v1752_v19, %v1634_v10  ;;  %v388_v4 = vsel %vm374_vm0, %v1777_v27, %v1635_v5  ;;  %v426_v19 = vpack.c.bf16 %v1357_v22, %v1805_v36 }
  0xa8   : > { %v418_v13 = vpack.c.bf16 %v388_v4, %v387_v18  ;;  %v397_v15 = vsel %vm374_vm0, %v1725_v9, %v1639_v14  ;;  %v398_v20 = vsel %vm374_vm0, %v1814_v39, %v1640_v8 }
  0xa9   : > { %v424_v23 = vpack.c.bf16 %v398_v20, %v397_v15 }
  0xaa   : > { %768 = vmatmul.bf16.vlgmr.msrb.gmra.mxu1 %v408_v0 }
  0xac   : > { %841 = vmatmul.bf16.gmra.mxu3 %v425_v54  ;;  %v1648_v21 = vpop.permute.xlu0 %1647 }
  0xad   : > { %v1650_v24 = vunpack.i.h.bf16 %v1648_v21  ;;  %v1649_v16 = vunpack.i.l.bf16 %v1648_v21 }
  0xaf   : > { %v389_v27 = vsel %vm374_vm0, %v1780_v28, %v1649_v16  ;;  %v390_v29 = vsel %vm374_vm0, %v1802_v35, %v1650_v24  ;;  %v2010_v28 = vld [vmem:[%s2090_s2] ss:$0 sm:$0xff] }
  0xb0   : > { %v423_v9 = vpack.c.bf16 %v390_v29, %v389_v27 }
  0xb2   : > { %802 = vmatmul.bf16.gmra.mxu2 %v414_v55 }
  0xb3   : > { %1503 = vmatmul.msk.bf16.gmra.mxu0 %vm374_vm0, %v416_v58 }
  0xba   : > { %773 = vmatmul.bf16.gmra.mxu1 %v413_v60 }
  0xc2   : > { %807 = vmatmul.bf16.gmra.mxu2 %v419_v3 }
  0xc3   : > { %1504 = vmatmul.msk.bf16.gmra.mxu0 %vm374_vm0, %v421_v7 }
  0xca   : > { %778 = vmatmul.bf16.gmra.mxu1 %v418_v13 }
  0xd2   : > { %812 = vmatmul.bf16.gmra.mxu2 %v424_v23 }
  0xd3   : > { %1505 = vmatmul.msk.bf16.gmra.mxu0 %vm374_vm0, %v426_v19 }
  0xda   : > { %783 = vmatmul.bf16.gmra.mxu1 %v423_v9 }
  0xff   : > { %v827_v38 = vpop.f32.mrf.mxu3 }
 0x107   : > { %v745_v30 = vpop.f32.mrf.mxu1  ;;  %v829_v12 = vpop.f32.mrf.mxu3 }
 0x108   : > { %v746_v53 = vadd.f32 %v2010_v28, %v745_v30 }
 0x10f   : > { %v747_v39 = vpop.f32.mrf.mxu1  ;;  %v832_v52 = vpop.f32.mrf.mxu3 }
 0x110   : > { %v740_v31 = vpop.f32.mrf.mxu0  ;;  %v748_v3 = vadd.f32 %v2010_v28, %v747_v39 }
 0x111   : > { %v741_v40 = vadd.f32 %v2010_v28, %v740_v31 }
 0x115   : > { %v1999_v26 = vpop.f32.mrf.mxu2 }
 0x117   : > { %v2001_v33 = vpop.f32.mrf.mxu1  ;;  %v834_v18 = vpop.f32.mrf.mxu3 }
 0x118   : > { %v742_v32 = vpop.f32.mrf.mxu0 }
 0x119   : > { %v743_v43 = vadd.f32 %v2010_v28, %v742_v32 }
 0x11d   : > { %v2003_v36 = vpop.f32.mrf.mxu2 }
 0x11f   : > { %v2005_v37 = vpop.f32.mrf.mxu1 }
 0x120   : > { %v856_v59 = vpop.f32.mrf.mxu0 }
 0x125   : > { %v798_v35 = vpop.f32.mrf.mxu2 }
 0x127   : > { %v769_v41 = vpop.f32.mrf.mxu1 }
 0x128   : > { %v770_v34 = vadd.f32 %v769_v41, %v741_v40  ;;  %v858_v42 = vpop.f32.mrf.mxu0  ;;  %v751_v40 = vadd.f32 %v2010_v28, %v2001_v33 }
 0x12a   : > { %v799_v44 = vadd.f32 %v798_v35, %v770_v34 }
 0x12c   : > { %v828_v47 = vadd.f32 %v827_v38, %v799_v44 }
 0x12d   : > { %v800_v0 = vpop.f32.mrf.mxu2 }
 0x12e   : > { %v857_v50 = vadd.f32 %v856_v59, %v828_v47 }
 0x12f   : > { %v771_v46 = vpop.f32.mrf.mxu1 }
 0x130   : > { %v772_v48 = vadd.f32 %v771_v46, %v743_v43  ;;  %v861_v55 = vpop.f32.mrf.mxu0  ;;  %v876_v57 = vmax.f32 %v857_v50, 0.0 }
 0x132   : > { %v801_v49 = vadd.f32 %v800_v0, %v772_v48  ;;  %v837_v48 = vpop.f32.mrf.mxu3 }
 0x134   : > { %v830_v51 = vadd.f32 %v829_v12, %v801_v49 }
 0x135   : > { %v803_v6 = vpop.f32.mrf.mxu2 }
 0x136   : > { %v859_v54 = vadd.f32 %v858_v42, %v830_v51 }
 0x137   : > { %v774_v56 = vpop.f32.mrf.mxu1 }
 0x138   : > { %v877_v58 = vmax.f32 %v859_v54, 0.0  ;;  %v775_v1 = vadd.f32 %v774_v56, %v746_v53  ;;  %v863_v20 = vpop.f32.mrf.mxu0  ;;  %v753_v53 = vadd.f32 %v2010_v28, %v2005_v37 }
 0x13a   : > { %v884_v2 = vmax.f32 %v876_v57, %v877_v58  ;;  %v804_v45 = vadd.f32 %v803_v6, %v775_v1 }
 0x13c   : > { %v892_v60 = vrot.slane %v884_v2, 2  ;;  %v893_v61 = vrot.slane %v884_v2, 4  ;;  %v894_v17 = vrot.slane %v884_v2, 6  ;;  %v917_v25 = vsel %vm916_vm1, %v884_v2, -inf }
 0x13d   : > { %v918_v62 = vrot.slane %v917_v25, 4  ;;  %v805_v63 = vpop.f32.mrf.mxu2  ;;  %v833_v15 = vadd.f32 %v832_v52, %v804_v45 }
 0x13e   : > { %v924_v5 = vsel %vm916_vm1, %v892_v60, -inf  ;;  %v931_v10 = vsel %vm916_vm1, %v893_v61, -inf  ;;  %v938_v7 = vsel %vm916_vm1, %v894_v17, -inf }
 0x13f   : > { %v919_v4 = vmax.f32 %v917_v25, %v918_v62  ;;  %v925_v11 = vrot.slane %v924_v5, 4  ;;  %v932_v13 = vrot.slane %v931_v10, 4  ;;  %v939_v8 = vrot.slane %v938_v7, 4  ;;  %v776_v14 = vpop.f32.mrf.mxu1 }
 0x140   : > { %v777_v21 = vadd.f32 %v776_v14, %v748_v3  ;;  %v862_v39 = vadd.f32 %v861_v55, %v833_v15  ;;  %v866_v33 = vpop.f32.mrf.mxu0 }
 0x141   : > { %v920_v22 = vrot.slane %v919_v4, 2  ;;  %v926_v23 = vmax.f32 %v924_v5, %v925_v11  ;;  %v933_v24 = vmax.f32 %v931_v10, %v932_v13  ;;  %v940_v16 = vmax.f32 %v938_v7, %v939_v8 }
 0x142   : > { %v806_v19 = vadd.f32 %v805_v63, %v777_v21  ;;  %v878_v46 = vmax.f32 %v862_v39, 0.0 }
 0x143   : > { %v921_v27 = vmax.f32 %v919_v4, %v920_v22  ;;  %v927_v29 = vrot.slane %v926_v23, 2  ;;  %v934_v9 = vrot.slane %v933_v24, 2  ;;  %v941_v30 = vrot.slane %v940_v16, 2 }
 0x144   : > { %v835_v31 = vadd.f32 %v834_v18, %v806_v19 }
 0x145   : > { %v922_v32 = vrot.slane %v921_v27, 1  ;;  %v928_v38 = vmax.f32 %v926_v23, %v927_v29  ;;  %v935_v59 = vmax.f32 %v933_v24, %v934_v9  ;;  %v942_v35 = vmax.f32 %v940_v16, %v941_v30  ;;  %v808_v34 = vpop.f32.mrf.mxu2 }
 0x146   : > { %v864_v41 = vadd.f32 %v863_v20, %v835_v31  ;;  %v756_v29 = vadd.f32 %v2010_v28, %v1999_v26  ;;  %v2036_v31 = vadd.f32 %v2010_v28, %v2003_v36 }
 0x147   : > { %v923_v12 = vmax.f32 %v921_v27, %v922_v32  ;;  %v929_v44 = vrot.slane %v928_v38, 1  ;;  %v936_v42 = vrot.slane %v935_v59, 1  ;;  %v943_v0 = vrot.slane %v942_v35, 1  ;;  %v779_v43 = vpop.f32.mrf.mxu1  ;;  %v839_v27 = vpop.f32.mrf.mxu3 }
 0x148   : > { %v879_v47 = vmax.f32 %v864_v41, 0.0  ;;  %v780_v49 = vadd.f32 %v779_v43, %v751_v40 }
 0x149   : > { %v930_v50 = vmax.f32 %v928_v38, %v929_v44  ;;  %v937_v51 = vmax.f32 %v935_v59, %v936_v42  ;;  %v944_v52 = vmax.f32 %v942_v35, %v943_v0  ;;  %v1029_v6 = vpack.c.bf16 %v923_v12, %v923_v12  ;;  %v868_v35 = vpop.f32.mrf.mxu0 }
 0x14a   : > { %v885_v54 = vmax.f32 %v878_v46, %v879_v47  ;;  %v809_v55 = vadd.f32 %v808_v34, %v780_v49 }
 0x14b   : > { %v1030_v56 = vpack.c.bf16 %v930_v50, %v930_v50  ;;  %v1031_v57 = vpack.c.bf16 %v937_v51, %v937_v51  ;;  %v1032_v58 = vpack.c.bf16 %v944_v52, %v944_v52  ;;  %v1061_v1 = vrot.slane %v1029_v6, 2 }
 0x14c   : > { %v895_v2 = vrot.slane %v885_v54, 2  ;;  %v896_v45 = vrot.slane %v885_v54, 4  ;;  %v897_v60 = vrot.slane %v885_v54, 6  ;;  %v945_v61 = vsel %vm916_vm1, %v885_v54, -inf }
 0x14d   : > { %v1062_v17 = vrot.slane %v1030_v56, 2  ;;  %v1063_v25 = vrot.slane %v1031_v57, 2  ;;  %v1064_v62 = vrot.slane %v1032_v58, 2  ;;  %v1079_v63 = vsel %vm916_vm1, %v1029_v6, %v1061_v1  ;;  %v810_v21 = vpop.f32.mrf.mxu2 }
 0x14e   : > { %1125 = vst [vmem:[#allocation1] ss:$2 sm:$0xff] %v1079_v63  ;;  %v946_v3 = vrot.slane %v945_v61, 4  ;;  %v952_v37 = vsel %vm916_vm1, %v895_v2, -inf  ;;  %v959_v5 = vsel %vm916_vm1, %v896_v45, -inf  ;;  %v966_v10 = vsel %vm916_vm1, %v897_v60, -inf }
 0x14f   : > { %v1082_v7 = vsel %vm916_vm1, %v1030_v56, %v1062_v17  ;;  %v1085_v18 = vsel %vm916_vm1, %v1031_v57, %v1063_v25  ;;  %v1088_v4 = vsel %vm916_vm1, %v1032_v58, %v1064_v62  ;;  %v953_v11 = vrot.slane %v952_v37, 4  ;;  %v781_v13 = vpop.f32.mrf.mxu1 }
 0x150   : > { %1129 = vst [vmem:[#allocation1 + $0x10] ss:$2 sm:$0xff] %v1082_v7  ;;  %v947_v8 = vmax.f32 %v945_v61, %v946_v3  ;;  %v960_v14 = vrot.slane %v959_v5, 4  ;;  %v967_v15 = vrot.slane %v966_v10, 4  ;;  %v838_v20 = vadd.f32 %v837_v48, %v809_v55  ;;  %v842_v3 = vpop.f32.mrf.mxu3 }
 0x151   : > { %1133 = vst [vmem:[#allocation1 + $0x20] ss:$2 sm:$0xff] %v1085_v18  ;;  %v954_v22 = vmax.f32 %v952_v37, %v953_v11  ;;  %v782_v23 = vadd.f32 %v781_v13, %v753_v53 }
 0x152   : > { %1137 = vst [vmem:[#allocation1 + $0x30] ss:$2 sm:$0xff] %v1088_v4  ;;  %v948_v24 = vrot.slane %v947_v8, 2  ;;  %v961_v16 = vmax.f32 %v959_v5, %v960_v14  ;;  %v968_v19 = vmax.f32 %v966_v10, %v967_v15  ;;  %v867_v30 = vadd.f32 %v866_v33, %v838_v20 }
 0x153   : > { %v955_v9 = vrot.slane %v954_v22, 2  ;;  %v811_v39 = vadd.f32 %v810_v21, %v782_v23 }
 0x154   : > { %v949_v32 = vmax.f32 %v947_v8, %v948_v24  ;;  %v962_v38 = vrot.slane %v961_v16, 2  ;;  %v969_v59 = vrot.slane %v968_v19, 2  ;;  %v880_v46 = vmax.f32 %v867_v30, 0.0  ;;  %v871_v8 = vpop.f32.mrf.mxu0 }
 0x155   : > { %v956_v40 = vmax.f32 %v954_v22, %v955_v9  ;;  %v1126_v41 = vld.sshfl [vmem:[#allocation1] sm:$0xff pattern:$0x75643120]  ;;  %v840_v34 = vadd.f32 %v839_v27, %v811_v39  ;;  %v813_v1 = vpop.f32.mrf.mxu2 }
 0x156   : > { %v950_v12 = vrot.slane %v949_v32, 1  ;;  %v963_v44 = vmax.f32 %v961_v16, %v962_v38  ;;  %v970_v42 = vmax.f32 %v968_v19, %v969_v59  ;;  %v1176_v43 = vunpack.c.l.b16 %v1126_v41 }
 0x157   : > { %v957_v26 = vrot.slane %v956_v40, 1  ;;  %v1130_v0 = vld.sshfl [vmem:[#allocation1 + $0x10] sm:$0xff pattern:$0x75643120]  ;;  %v869_v47 = vadd.f32 %v868_v35, %v840_v34  ;;  %v784_v36 = vpop.f32.mrf.mxu1 }
 0x158   : > { %v951_v28 = vmax.f32 %v949_v32, %v950_v12  ;;  %v964_v48 = vrot.slane %v963_v44, 1  ;;  %v971_v49 = vrot.slane %v970_v42, 1  ;;  %v1134_v50 = vld.sshfl [vmem:[#allocation1 + $0x20] sm:$0xff pattern:$0x75643120]  ;;  %v1177_v51 = vunpack.c.l.b16 %v1130_v0 }
 0x159   : > { %v958_v52 = vmax.f32 %v956_v40, %v957_v26  ;;  %v1138_v6 = vld.sshfl [vmem:[#allocation1 + $0x30] sm:$0xff pattern:$0x75643120]  ;;  %v1178_v53 = vunpack.c.l.b16 %v1134_v50  ;;  %v881_v54 = vmax.f32 %v869_v47, 0.0  ;;  %v785_v33 = vadd.f32 %v784_v36, %v756_v29 }
 0x15a   : > { %v965_v55 = vmax.f32 %v963_v44, %v964_v48  ;;  %v972_v56 = vmax.f32 %v970_v42, %v971_v49  ;;  %v1033_v57 = vpack.c.bf16 %v951_v28, %v951_v28  ;;  %v1179_v58 = vunpack.c.l.b16 %v1138_v6  ;;  %v844_v49 = vpop.f32.mrf.mxu3 }
 0x15b   : > { %v1034_v2 = vpack.c.bf16 %v958_v52, %v958_v52  ;;  %v1192_v45 = vrot.slane %v1177_v51, 7  ;;  %v1195_v60 = vrot.slane %v1178_v53, 6  ;;  %v886_v61 = vmax.f32 %v880_v46, %v881_v54 }
 0x15c   : > { %v1035_v17 = vpack.c.bf16 %v965_v55, %v965_v55  ;;  %v1036_v25 = vpack.c.bf16 %v972_v56, %v972_v56  ;;  %v1065_v62 = vrot.slane %v1033_v57, 2  ;;  %v1198_v63 = vrot.slane %v1179_v58, 5  ;;  %v873_v56 = vpop.f32.mrf.mxu0 }
 0x15d   : > { %v1066_v37 = vrot.slane %v1034_v2, 2  ;;  %v1194_v5 = vsel %vm1193_vm2, %v1192_v45, %v1176_v43  ;;  %v898_v10 = vrot.slane %v886_v61, 2  ;;  %v899_v7 = vrot.slane %v886_v61, 4  ;;  %v815_v26 = vpop.f32.mrf.mxu2 }
 0x15e   : > { %v1067_v18 = vrot.slane %v1035_v17, 2  ;;  %v1068_v4 = vrot.slane %v1036_v25, 2  ;;  %v1091_v11 = vsel %vm916_vm1, %v1033_v57, %v1065_v62  ;;  %v1197_v13 = vsel %vm1196_vm3, %v1195_v60, %v1194_v5 }
 0x15f   : > { %v1094_v14 = vsel %vm916_vm1, %v1034_v2, %v1066_v37  ;;  %1140 = vst [vmem:[#allocation1] ss:$2 sm:$0xff] %v1091_v11  ;;  %v1200_v15 = vsel %vm1199_vm4, %v1198_v63, %v1197_v13  ;;  %v900_v20 = vrot.slane %v886_v61, 6  ;;  %v973_v21 = vsel %vm916_vm1, %v886_v61, -inf  ;;  %v786_v19 = vpop.f32.mrf.mxu1 }
 0x160   : > { %v1097_v22 = vsel %vm916_vm1, %v1035_v17, %v1067_v18  ;;  %v1100_v23 = vsel %vm916_vm1, %v1036_v25, %v1068_v4  ;;  %1143 = vst [vmem:[#allocation1 + $0x10] ss:$2 sm:$0xff] %v1094_v14  ;;  %v1219_v24 = vpack.c.b16 %v1200_v15, %v1200_v15  ;;  %v974_v16 = vrot.slane %v973_v21, 4 }
 0x161   : > { %1146 = vst [vmem:[#allocation1 + $0x20] ss:$2 sm:$0xff] %v1097_v22  ;;  %v980_v27 = vsel %vm916_vm1, %v898_v10, -inf  ;;  %v987_v29 = vsel %vm916_vm1, %v899_v7, -inf  ;;  %v994_v9 = vsel %vm916_vm1, %v900_v20, -inf  ;;  %v814_v30 = vadd.f32 %v813_v1, %v785_v33 }
 0x162   : > { %1149 = vst [vmem:[#allocation1 + $0x30] ss:$2 sm:$0xff] %v1100_v23  ;;  %v1223_v39 = vrot.slane %v1219_v24, 2  ;;  %v975_v32 = vmax.f32 %v973_v21, %v974_v16  ;;  %v981_v38 = vrot.slane %v980_v27, 4  ;;  %v988_v59 = vrot.slane %v987_v29, 4 }
 0x163   : > { %v995_v35 = vrot.slane %v994_v9, 4  ;;  %v843_v40 = vadd.f32 %v842_v3, %v814_v30  ;;  %v787_v41 = vadd.f32 %v786_v19, %v2036_v31 }
 0x164   : > { %v1229_v34 = vsel %vm916_vm1, %v1219_v24, %v1223_v39  ;;  %v976_v12 = vrot.slane %v975_v32, 2  ;;  %v982_v44 = vmax.f32 %v980_v27, %v981_v38  ;;  %v989_v42 = vmax.f32 %v987_v29, %v988_v59 }
 0x165   : > { %1243 = vst [vmem:[%s2053_s23] sm:$0x3] %v1229_v34  ;;  %v996_v0 = vmax.f32 %v994_v9, %v995_v35  ;;  %v872_v43 = vadd.f32 %v871_v8, %v843_v40  ;;  %v816_v46 = vadd.f32 %v815_v26, %v787_v41 }
 0x166   : > { %v977_v47 = vmax.f32 %v975_v32, %v976_v12  ;;  %v983_v36 = vrot.slane %v982_v44, 2  ;;  %v990_v28 = vrot.slane %v989_v42, 2  ;;  %v1141_v48 = vld.sshfl [vmem:[#allocation1] sm:$0xff pattern:$0x75643120] }
 0x167   : > { %v997_v50 = vrot.slane %v996_v0, 2  ;;  %v1144_v51 = vld.sshfl [vmem:[#allocation1 + $0x10] sm:$0xff pattern:$0x75643120]  ;;  %v1180_v52 = vunpack.c.l.b16 %v1141_v48  ;;  %v845_v6 = vadd.f32 %v844_v49, %v816_v46  ;;  %v882_v2 = vmax.f32 %v872_v43, 0.0 }
 0x168   : > { %v978_v31 = vrot.slane %v977_v47, 1  ;;  %v984_v53 = vmax.f32 %v982_v44, %v983_v36  ;;  %v991_v54 = vmax.f32 %v989_v42, %v990_v28  ;;  %v1147_v33 = vld.sshfl [vmem:[#allocation1 + $0x20] sm:$0xff pattern:$0x75643120]  ;;  %v1181_v55 = vunpack.c.l.b16 %v1144_v51 }
 0x169   : > { %v998_v57 = vmax.f32 %v996_v0, %v997_v50  ;;  %v1150_v58 = vld.sshfl [vmem:[#allocation1 + $0x30] sm:$0xff pattern:$0x75643120]  ;;  %v1182_v1 = vunpack.c.l.b16 %v1147_v33  ;;  %v874_v45 = vadd.f32 %v873_v56, %v845_v6 }
 0x16a   : > { %v979_v60 = vmax.f32 %v977_v47, %v978_v31  ;;  %v985_v61 = vrot.slane %v984_v53, 1  ;;  %v992_v17 = vrot.slane %v991_v54, 1  ;;  %v1183_v25 = vunpack.c.l.b16 %v1150_v58 }
 0x16b   : > { %v999_v62 = vrot.slane %v998_v57, 1  ;;  %v1201_v63 = vrot.slane %v1181_v55, 7  ;;  %v1203_v3 = vrot.slane %v1182_v1, 6  ;;  %v883_v37 = vmax.f32 %v874_v45, 0.0 }
 0x16c   : > { %v986_v5 = vmax.f32 %v984_v53, %v985_v61  ;;  %v993_v10 = vmax.f32 %v991_v54, %v992_v17  ;;  %v1037_v7 = vpack.c.bf16 %v979_v60, %v979_v60  ;;  %v1205_v11 = vrot.slane %v1183_v25, 5 }
 0x16d   : > { %v1000_v18 = vmax.f32 %v998_v57, %v999_v62  ;;  %v1202_v4 = vsel %vm1193_vm2, %v1201_v63, %v1180_v52  ;;  %v887_v13 = vmax.f32 %v882_v2, %v883_v37 }
 0x16e   : > { %v1038_v8 = vpack.c.bf16 %v986_v5, %v986_v5  ;;  %v1039_v14 = vpack.c.bf16 %v993_v10, %v993_v10  ;;  %v1069_v15 = vrot.slane %v1037_v7, 2  ;;  %v1204_v20 = vsel %vm1196_vm3, %v1203_v3, %v1202_v4 }
 0x16f   : > { %v1040_v21 = vpack.c.bf16 %v1000_v18, %v1000_v18  ;;  %v1206_v22 = vsel %vm1199_vm4, %v1205_v11, %v1204_v20  ;;  %v901_v23 = vrot.slane %v887_v13, 2  ;;  %v902_v24 = vrot.slane %v887_v13, 4 }
 0x170   : > { %v1070_v16 = vrot.slane %v1038_v8, 2  ;;  %v1071_v19 = vrot.slane %v1039_v14, 2  ;;  %v1103_v27 = vsel %vm916_vm1, %v1037_v7, %v1069_v15  ;;  %v1220_v29 = vpack.c.b16 %v1206_v22, %v1206_v22 }
 0x171   : > { %v1072_v9 = vrot.slane %v1040_v21, 2  ;;  %1152 = vst [vmem:[#allocation1] ss:$2 sm:$0xff] %v1103_v27  ;;  %v903_v30 = vrot.slane %v887_v13, 6  ;;  %v1001_v39 = vsel %vm916_vm1, %v887_v13, -inf  ;;  %v1008_v32 = vsel %vm916_vm1, %v901_v23, -inf }
 0x172   : > { %v1106_v38 = vsel %vm916_vm1, %v1038_v8, %v1070_v16  ;;  %v1109_v59 = vsel %vm916_vm1, %v1039_v14, %v1071_v19  ;;  %v1224_v35 = vrot.slane %v1220_v29, 2  ;;  %v1002_v40 = vrot.slane %v1001_v39, 4 }
 0x173   : > { %v1112_v41 = vsel %vm916_vm1, %v1040_v21, %v1072_v9  ;;  %1155 = vst [vmem:[#allocation1 + $0x10] ss:$2 sm:$0xff] %v1106_v38  ;;  %v1009_v34 = vrot.slane %v1008_v32, 4  ;;  %v1015_v12 = vsel %vm916_vm1, %v902_v24, -inf  ;;  %v1022_v44 = vsel %vm916_vm1, %v903_v30, -inf }
 0x174   : > { %1158 = vst [vmem:[#allocation1 + $0x20] ss:$2 sm:$0xff] %v1109_v59  ;;  %v1232_v42 = vsel %vm916_vm1, %v1220_v29, %v1224_v35  ;;  %v1003_v26 = vmax.f32 %v1001_v39, %v1002_v40  ;;  %v1016_v0 = vrot.slane %v1015_v12, 4  ;;  %v1023_v43 = vrot.slane %v1022_v44, 4 }
 0x175   : > { %1161 = vst [vmem:[#allocation1 + $0x30] ss:$2 sm:$0xff] %v1112_v41  ;;  %v1010_v46 = vmax.f32 %v1008_v32, %v1009_v34 }
 0x176   : > { %1244 = vst [vmem:[%s2053_s23 + $0x2] sm:$0x3] %v1232_v42  ;;  %v1004_v47 = vrot.slane %v1003_v26, 2  ;;  %v1017_v36 = vmax.f32 %v1015_v12, %v1016_v0  ;;  %v1024_v28 = vmax.f32 %v1022_v44, %v1023_v43 }
 0x177   : > { %v1011_v48 = vrot.slane %v1010_v46, 2 }
 0x178   : > { %v1005_v49 = vmax.f32 %v1003_v26, %v1004_v47  ;;  %v1018_v50 = vrot.slane %v1017_v36, 2  ;;  %v1025_v51 = vrot.slane %v1024_v28, 2  ;;  %v1153_v6 = vld.sshfl [vmem:[#allocation1] sm:$0xff pattern:$0x75643120] }
 0x179   : > { %v1012_v52 = vmax.f32 %v1010_v46, %v1011_v48  ;;  %v1184_v17 = vunpack.c.l.b16 %v1153_v6 }
 0x17a   : > { %v1006_v31 = vrot.slane %v1005_v49, 1  ;;  %v1019_v53 = vmax.f32 %v1017_v36, %v1018_v50  ;;  %v1026_v54 = vmax.f32 %v1024_v28, %v1025_v51  ;;  %v1156_v33 = vld.sshfl [vmem:[#allocation1 + $0x10] sm:$0xff pattern:$0x75643120] }
 0x17b   : > { %v1013_v55 = vrot.slane %v1012_v52, 1  ;;  %v1159_v56 = vld.sshfl [vmem:[#allocation1 + $0x20] sm:$0xff pattern:$0x75643120]  ;;  %v1185_v57 = vunpack.c.l.b16 %v1156_v33 }
 0x17c   : > { %v1007_v58 = vmax.f32 %v1005_v49, %v1006_v31  ;;  %v1020_v1 = vrot.slane %v1019_v53, 1  ;;  %v1027_v2 = vrot.slane %v1026_v54, 1  ;;  %v1162_v45 = vld.sshfl [vmem:[#allocation1 + $0x30] sm:$0xff pattern:$0x75643120]  ;;  %v1186_v60 = vunpack.c.l.b16 %v1159_v56 }
 0x17d   : > { %v1014_v61 = vmax.f32 %v1012_v52, %v1013_v55  ;;  %v1187_v25 = vunpack.c.l.b16 %v1162_v45  ;;  %v1207_v62 = vrot.slane %v1185_v57, 7 }
 0x17e   : > { %v1021_v63 = vmax.f32 %v1019_v53, %v1020_v1  ;;  %v1028_v3 = vmax.f32 %v1026_v54, %v1027_v2  ;;  %v1041_v37 = vpack.c.bf16 %v1007_v58, %v1007_v58  ;;  %v1209_v5 = vrot.slane %v1186_v60, 6 }
 0x17f   : > { %v1042_v10 = vpack.c.bf16 %v1014_v61, %v1014_v61  ;;  %v1208_v7 = vsel %vm1193_vm2, %v1207_v62, %v1184_v17  ;;  %v1211_v18 = vrot.slane %v1187_v25, 5 }
 0x180   : > { %v1043_v4 = vpack.c.bf16 %v1021_v63, %v1021_v63  ;;  %v1044_v11 = vpack.c.bf16 %v1028_v3, %v1028_v3  ;;  %v1073_v13 = vrot.slane %v1041_v37, 2  ;;  %v1210_v8 = vsel %vm1196_vm3, %v1209_v5, %v1208_v7 }
 0x181   : > { %v1074_v14 = vrot.slane %v1042_v10, 2  ;;  %v1212_v15 = vsel %vm1199_vm4, %v1211_v18, %v1210_v8 }
 0x182   : > { %v1075_v20 = vrot.slane %v1043_v4, 2  ;;  %v1076_v21 = vrot.slane %v1044_v11, 2  ;;  %v1115_v22 = vsel %vm916_vm1, %v1041_v37, %v1073_v13  ;;  %v1221_v23 = vpack.c.b16 %v1212_v15, %v1212_v15 }
 0x183   : > { %v1118_v24 = vsel %vm916_vm1, %v1042_v10, %v1074_v14  ;;  %1164 = vst [vmem:[#allocation1] ss:$2 sm:$0xff] %v1115_v22 }
 0x184   : > { %v1121_v16 = vsel %vm916_vm1, %v1043_v4, %v1075_v20  ;;  %v1124_v19 = vsel %vm916_vm1, %v1044_v11, %v1076_v21  ;;  %1167 = vst [vmem:[#allocation1 + $0x10] ss:$2 sm:$0xff] %v1118_v24  ;;  %v1225_v27 = vrot.slane %v1221_v23, 2 }
 0x185   : > { %1170 = vst [vmem:[#allocation1 + $0x20] ss:$2 sm:$0xff] %v1121_v16 }
 0x186   : > { %1173 = vst [vmem:[#allocation1 + $0x30] ss:$2 sm:$0xff] %v1124_v19  ;;  %v1235_v29 = vsel %vm916_vm1, %v1221_v23, %v1225_v27 }
 0x187   : > { %1245 = vst [vmem:[%s2053_s23 + $0x4] sm:$0x3] %v1235_v29 }
 0x18a   : > { %v1165_v9 = vld.sshfl [vmem:[#allocation1] sm:$0xff pattern:$0x75643120] }
 0x18b   : > { %v1168_v30 = vld.sshfl [vmem:[#allocation1 + $0x10] sm:$0xff pattern:$0x75643120]  ;;  %v1188_v35 = vunpack.c.l.b16 %v1165_v9 }
 0x18c   : > { %v1171_v39 = vld.sshfl [vmem:[#allocation1 + $0x20] sm:$0xff pattern:$0x75643120]  ;;  %v1189_v32 = vunpack.c.l.b16 %v1168_v30 }
 0x18d   : > { %v1174_v38 = vld.sshfl [vmem:[#allocation1 + $0x30] sm:$0xff pattern:$0x75643120]  ;;  %v1190_v59 = vunpack.c.l.b16 %v1171_v39 }
 0x18e   : > { %v1191_v40 = vunpack.c.l.b16 %v1174_v38  ;;  %v1213_v41 = vrot.slane %v1189_v32, 7 }
 0x18f   : > { %v1215_v34 = vrot.slane %v1190_v59, 6 }
 0x190   : > { %v1214_v12 = vsel %vm1193_vm2, %v1213_v41, %v1188_v35  ;;  %v1217_v44 = vrot.slane %v1191_v40, 5 }
 0x191   : > { %v1216_v42 = vsel %vm1196_vm3, %v1215_v34, %v1214_v12 }
 0x192   : > { %v1218_v26 = vsel %vm1199_vm4, %v1217_v44, %v1216_v42 }
 0x193   : > { %v1222_v0 = vpack.c.b16 %v1218_v26, %v1218_v26 }
 0x195   : > { %v1226_v43 = vrot.slane %v1222_v0, 2 }
 0x197   : > { %v1238_v46 = vsel %vm916_vm1, %v1222_v0, %v1226_v43 }
 0x198   : > { %1246 = vst [vmem:[%s2053_s23 + $0x6] sm:$0x3] %v1238_v46 }
 0x199 PF: > { %s13_s12 = sadd.s32 1, %s1658_s12  }
 0x19a   : > { %p10_p4 = scmp.ge.s32.totalorder %s13_s12, 4  }
 0x19c   :  { %12 = sbr.rel (!%p10_p4) target bundleno = 1 (0x1), region = 67 }

// kernel: custom_alexnet_forward.3
= control target key start
LH: loop header
LB: loop body
LE: loop exit
PB: predicated region body
PF: predicated region fallthrough
CT: control target
= control target key end

     0   :  { %8 = vsyncpa [#allocation3], 0  ;;  %s5425_s0 = inlined_call_operand.vmem [shape: f32[2,18,18,3], index: 0, kind: input, shape index: {}]   ;;  %s5426_s1 = inlined_call_operand.hbm [shape: bf16[27,64], index: 1, kind: input, shape index: {}]   ;;  %s5427_s2 = inlined_call_operand.hbm [shape: f32[1,64], index: 2, kind: input, shape index: {}]   ;;  %s5428_s3 = inlined_call_operand.vmem [shape: f32[2,8,8,64], index: 3, kind: output, shape index: {}]  }
   0x1   :  { %9 = vsyncpa [#allocation5], 0  ;;  %s3855_s12 = smov 0  }
   0x2 LB: > { %s125_s15 = sshll.u32 %s5426_s1, 4  ;;  %s2824_s16 = sadd.s32 4294967295, %s3820_s12   ;;  %s3820_s12 = sphi %s3855_s12, %s15_s12   ;;  %s126_s15 = int_to_ptr.hbm [resolvable:$true] %s125_s15 }
   0x3   : > { %p2826_p0 = scmp.ge.s32.totalorder %s3820_s12, 1  ;;  %p114_p1 = scmp.lt.s32.totalorder %s3820_s12, 3 }
   0x4   : > { %p3079_p2 = scmp.eq.s32.totalorder %s2824_s16, 0  ;;  %s3822_s18 = smov [#allocation2]  }
   0x5   : > { %p3866_p3 = pnand %p2826_p0, %p114_p1  ;;  %s127_s19 = sshll.u32 %s3822_s18, 4  ;;  %s128_s19 = int_to_ptr.vmem [resolvable:$true] %s127_s19 }
   0x6   : > { %s140_s22 = sshll.u32 %s5427_s2, 4  ;;  %s3823_s23 = smov [#allocation4]   ;;  %s141_s22 = int_to_ptr.hbm [resolvable:$true] %s140_s22 }
   0x7   : > { %p3072_p4 = pneg %p3866_p3  ;;  %s142_s24 = sshll.u32 %s3823_s23, 4  ;;  %s143_s24 = int_to_ptr.vmem [resolvable:$true] %s142_s24 }
   0x8   : > { %s3824_s25 = smov 64   ;;  %s3825_s26 = smov 4  }
   0x9   : > { %p3073_p5 = pnand %p3079_p2, %p3072_p4  ;;  %163 = sbr.rel (%p3866_p3) target bundleno = 714 (0x2ca), region = 32 }
   0xb   : > { %3075 = dma.hbm_to_vmem [thread:$0]  (!%p3073_p5), %s126_s15, 256, %s128_s19, [#allocation3], %s3824_s25, %s3824_s25, %s3825_s26  }
   0xc   : > { %3078 = dma.hbm_to_vmem [thread:$0]  (!%p3073_p5), %s141_s22, 16, %s143_s24, [#allocation5]  }
   0xe   : > { %3811 = dma.done.wait (%p3079_p2), [#allocation3], 256  }
   0xf   : > { %3813 = vsyncadd (%p3079_p2), [#allocation3], 4294967040 }
  0x10   : > { %3815 = dma.done.wait (%p3079_p2), [#allocation5], 16  }
  0x11   : > { %3817 = vsyncadd (%p3079_p2), [#allocation5], 4294967280  ;;  %p193_p6 = scmp.lt.s32.totalorder %s2824_s16, 1  ;;  %s3826_s4 = smov 3   ;;  %vm1518_vm0 = vcmask 23552   ;;  %vm1551_vm1 = vcmask 48128  }
  0x12   : > { %s3827_s5 = smov 6   ;;  %s3828_s6 = smov 9   ;;  %vm1584_vm2 = vcmask 72704   ;;  %vm1617_vm3 = vcmask 97280   ;;  %vm1650_vm4 = vcmask 121856   ;;  %vm1683_vm5 = vcmask 146432  }
  0x13   : > { %s5481_s16 = smov (!%p193_p6, %s2824_s16), 1  ;;  %s3829_s7 = smov 12   ;;  %vm1866_vm6 = vcmask 1044480   ;;  %vm1867_vm7 = vcmask 1045504   ;;  %vm1716_vm8 = vcmask 171008   ;;  %vm1749_vm9 = vcmask 195584  }
  0x14   : > { %s3063_s27 = smul.u32 432, %s5481_s16  ;;  %s3830_s8 = smov 15   ;;  %vm1817_vm10 = vcmask 220160   ;;  %vm1994_vm11 = vcmask 523264   ;;  %vm2155_vm12 = vcmask 517120   ;;  %vm2668_vm13 = vcmask 1041409  }
  0x15   : > { %s3831_s9 = smov 18   ;;  %s3832_s10 = smov 21   ;;  %vm2670_vm14 = vcmask 1042434   ;;  %vm2672_vm15 = vcmask 1043459  }
  0x16   : > { %s3888_s30 = scalar_lea.vmem %s5425_s0, %s3063_s27  ;;  %s3833_s11 = smov 24  }
  0x17   : > { %v244_v0 = vld [vmem:[%s3888_s30 + $0x61] sm:$0xff]  ;;  %v245_v1 = vld [vmem:[%s3888_s30 + $0x69] sm:$0xff]  ;;  %v240_v2 = vld [vmem:[%s3888_s30 + $0x31] sm:$0xff]  ;;  %s3054_s13 = sshll.u32 %s5481_s16, 6 }
  0x18   : > { %v3893_v3 = vpack.i.bf16 %v245_v1, %v244_v0  ;;  %v241_v4 = vld [vmem:[%s3888_s30 + $0x39] sm:$0xff]  ;;  %v236_v5 = vld [vmem:[%s3888_s30 + $0x1] sm:$0xff]  ;;  %v237_v6 = vld [vmem:[%s3888_s30 + $0x9] sm:$0xff]  ;;  %s5215_s16 = scalar_lea.vmem %s5428_s3, %s3054_s13 }
  0x19   : > { %v3898_v7 = vpack.i.bf16 %v241_v4, %v240_v2  ;;  %v3104_v8 = vpack.i.bf16 %v237_v6, %v236_v5  ;;  %v246_v9 = vld [vmem:[%s3888_s30 + $0x79] sm:$0xff]  ;;  %v247_v10 = vld [vmem:[%s3888_s30 + $0x81] sm:$0xff]  ;;  %v242_v11 = vld [vmem:[%s3888_s30 + $0x49] sm:$0xff] }
  0x1a   : > { %3125 = vrot.lane.b32.xlu2 %v3893_v3, %s3826_s4  ;;  %v243_v12 = vld [vmem:[%s3888_s30 + $0x51] sm:$0xff]  ;;  %v238_v13 = vld [vmem:[%s3888_s30 + $0x19] sm:$0xff]  ;;  %v239_v14 = vld [vmem:[%s3888_s30 + $0x21] sm:$0xff]  ;;  %v3911_v15 = vpack.i.bf16 %v247_v10, %v246_v9 }
  0x1b   : > { %3115 = vrot.lane.b32.xlu1 %v3898_v7, %s3826_s4  ;;  %3105 = vrot.lane.b32.xlu0 %v3104_v8, %s3826_s4  ;;  %v3913_v16 = vpack.i.bf16 %v243_v12, %v242_v11  ;;  %v3915_v17 = vpack.i.bf16 %v239_v14, %v238_v13  ;;  %v252_v18 = vld [vmem:[%s3888_s30 + $0xc1] sm:$0xff]  ;;  %v253_v19 = vld [vmem:[%s3888_s30 + $0xc9] sm:$0xff] }
  0x1c   : > { %v250_v20 = vld [vmem:[%s3888_s30 + $0xa9] sm:$0xff]  ;;  %v251_v21 = vld [vmem:[%s3888_s30 + $0xb1] sm:$0xff]  ;;  %v249_v23 = vld [vmem:[%s3888_s30 + $0x99] sm:$0xff]  ;;  %v3929_v24 = vpack.i.bf16 %v253_v19, %v252_v18 }
  0x1d   : > { %v248_v22 = vld [vmem:[%s3888_s30 + $0x91] sm:$0xff]  ;;  %v3931_v25 = vpack.i.bf16 %v251_v21, %v250_v20  ;;  %v258_v27 = vld [vmem:[%s3888_s30 + $0x109] sm:$0xff]  ;;  %v257_v30 = vld [vmem:[%s3888_s30 + $0xf9] sm:$0xff] }
  0x1e   : > { %v3933_v26 = vpack.i.bf16 %v249_v23, %v248_v22  ;;  %v259_v28 = vld [vmem:[%s3888_s30 + $0x111] sm:$0xff]  ;;  %v254_v31 = vld [vmem:[%s3888_s30 + $0xd9] sm:$0xff]  ;;  %v255_v32 = vld [vmem:[%s3888_s30 + $0xe1] sm:$0xff] }
  0x1f   : > { %v256_v29 = vld [vmem:[%s3888_s30 + $0xf1] sm:$0xff]  ;;  %v3947_v33 = vpack.i.bf16 %v259_v28, %v258_v27  ;;  %v3951_v35 = vpack.i.bf16 %v255_v32, %v254_v31  ;;  %v265_v37 = vld [vmem:[%s3888_s30 + $0x159] sm:$0xff]  ;;  %v263_v39 = vld [vmem:[%s3888_s30 + $0x141] sm:$0xff] }
  0x20   : > { %v3949_v34 = vpack.i.bf16 %v257_v30, %v256_v29  ;;  %v264_v36 = vld [vmem:[%s3888_s30 + $0x151] sm:$0xff]  ;;  %v262_v38 = vld [vmem:[%s3888_s30 + $0x139] sm:$0xff]  ;;  %v260_v40 = vld [vmem:[%s3888_s30 + $0x121] sm:$0xff] }
  0x21   : > { %v261_v41 = vld [vmem:[%s3888_s30 + $0x129] sm:$0xff]  ;;  %v3965_v42 = vpack.i.bf16 %v265_v37, %v264_v36  ;;  %v3967_v43 = vpack.i.bf16 %v263_v39, %v262_v38  ;;  %v270_v45 = vld [vmem:[%s3888_s30 + $0x1a] sm:$0xff]  ;;  %v267_v50 = vld [vmem:[%s3888_s30 + $0x171] sm:$0xff] }
  0x22   : > { %3130 = vrot.lane.b32.xlu2 %v3911_v15, %s3826_s4  ;;  %v3969_v44 = vpack.i.bf16 %v261_v41, %v260_v40  ;;  %v271_v46 = vld [vmem:[%s3888_s30 + $0x22] sm:$0xff]  ;;  %v269_v48 = vld [vmem:[%s3888_s30 + $0xa] sm:$0xff]  ;;  %v275_v57 = vld [vmem:[%s3888_s30 + $0x52] sm:$0xff] }
  0x23   : > { %3120 = vrot.lane.b32.xlu1 %v3913_v16, %s3826_s4  ;;  %3110 = vrot.lane.b32.xlu0 %v3915_v17, %s3826_s4  ;;  %v268_v47 = vld [vmem:[%s3888_s30 + $0x2] sm:$0xff]  ;;  %v3983_v51 = vpack.i.bf16 %v271_v46, %v270_v45  ;;  %v277_v55 = vld [vmem:[%s3888_s30 + $0x6a] sm:$0xff] }
  0x24   : > { %v266_v49 = vld [vmem:[%s3888_s30 + $0x169] sm:$0xff]  ;;  %v3184_v52 = vpack.i.bf16 %v269_v48, %v268_v47  ;;  %v272_v58 = vld [vmem:[%s3888_s30 + $0x32] sm:$0xff]  ;;  %v273_v59 = vld [vmem:[%s3888_s30 + $0x3a] sm:$0xff] }
  0x25   : > { %v3985_v53 = vpack.i.bf16 %v267_v50, %v266_v49  ;;  %v276_v54 = vld [vmem:[%s3888_s30 + $0x62] sm:$0xff]  ;;  %v274_v56 = vld [vmem:[%s3888_s30 + $0x4a] sm:$0xff]  ;;  %v4002_v62 = vpack.i.bf16 %v273_v59, %v272_v58  ;;  %v283_v0 = vld [vmem:[%s3888_s30 + $0xb2] sm:$0xff] }
  0x26   : > { %v3998_v60 = vpack.i.bf16 %v277_v55, %v276_v54  ;;  %v4000_v61 = vpack.i.bf16 %v275_v57, %v274_v56  ;;  %v282_v63 = vld [vmem:[%s3888_s30 + $0xaa] sm:$0xff]  ;;  %v280_v1 = vld [vmem:[%s3888_s30 + $0x92] sm:$0xff]  ;;  %v281_v2 = vld [vmem:[%s3888_s30 + $0x9a] sm:$0xff] }
  0x27   : > { %v278_v4 = vld [vmem:[%s3888_s30 + $0x7a] sm:$0xff]  ;;  %v279_v5 = vld [vmem:[%s3888_s30 + $0x82] sm:$0xff]  ;;  %v4016_v6 = vpack.i.bf16 %v283_v0, %v282_v63  ;;  %v4018_v8 = vpack.i.bf16 %v281_v2, %v280_v1  ;;  %v288_v10 = vld [vmem:[%s3888_s30 + $0xf2] sm:$0xff] }
  0x28   : > { %v4020_v9 = vpack.i.bf16 %v279_v5, %v278_v4  ;;  %v289_v11 = vld [vmem:[%s3888_s30 + $0xfa] sm:$0xff]  ;;  %v287_v13 = vld [vmem:[%s3888_s30 + $0xe2] sm:$0xff]  ;;  %v285_v18 = vld [vmem:[%s3888_s30 + $0xca] sm:$0xff] }
  0x29   : > { %v286_v12 = vld [vmem:[%s3888_s30 + $0xda] sm:$0xff]  ;;  %v284_v14 = vld [vmem:[%s3888_s30 + $0xc2] sm:$0xff]  ;;  %v4034_v19 = vpack.i.bf16 %v289_v11, %v288_v10  ;;  %v293_v28 = vld [vmem:[%s3888_s30 + $0x12a] sm:$0xff] }
  0x2a   : > { %3145 = vrot.lane.b32.xlu2 %v3929_v24, %s3826_s4  ;;  %v4036_v20 = vpack.i.bf16 %v287_v13, %v286_v12  ;;  %v4038_v21 = vpack.i.bf16 %v285_v18, %v284_v14  ;;  %v294_v22 = vld [vmem:[%s3888_s30 + $0x13a] sm:$0xff]  ;;  %v295_v23 = vld [vmem:[%s3888_s30 + $0x142] sm:$0xff]  ;;  %v290_v29 = vld [vmem:[%s3888_s30 + $0x10a] sm:$0xff] }
  0x2b   : > { %3140 = vrot.lane.b32.xlu1 %v3931_v25, %s3826_s4  ;;  %3135 = vrot.lane.b32.xlu0 %v3933_v26, %s3826_s4  ;;  %5446 = vst [vmem:[#allocation8_spill] sm:$0xff] %v4034_v19  ;;  %v292_v27 = vld [vmem:[%s3888_s30 + $0x122] sm:$0xff]  ;;  %v291_v30 = vld [vmem:[%s3888_s30 + $0x112] sm:$0xff]  ;;  %v4052_v31 = vpack.i.bf16 %v295_v23, %v294_v22 }
  0x2c   : > { %5447 = vst [vmem:[#allocation9_spill] sm:$0xff] %v4036_v20  ;;  %v4054_v32 = vpack.i.bf16 %v293_v28, %v292_v27  ;;  %v4056_v36 = vpack.i.bf16 %v291_v30, %v290_v29  ;;  %v4061_v37 = vld [vmem:[%s3888_s30 + $0x18] sm:$0xff]  ;;  %v4068_v38 = vld [vmem:[%s3888_s30 + $0x20] sm:$0xff]  ;;  %v298_v39 = vld [vmem:[%s3888_s30 + $0x16a] sm:$0xff] }
  0x2d   : > { %5448 = vst [vmem:[#allocation10_spill] sm:$0xff] %v4052_v31  ;;  %v299_v40 = vld [vmem:[%s3888_s30 + $0x172] sm:$0xff]  ;;  %v297_v45 = vld [vmem:[%s3888_s30 + $0x15a] sm:$0xff]  ;;  %v3264_v46 = vpack.i.bf16 %v4068_v38, %v4061_v37  ;;  %v2843_v50 = vld [vmem:[%s3888_s30 + $0x68] sm:$0xff] }
  0x2e   : > { %5449 = vst [vmem:[#allocation11_spill] sm:$0xff] %v4054_v32  ;;  %v296_v41 = vld [vmem:[%s3888_s30 + $0x152] sm:$0xff]  ;;  %v4076_v47 = vpack.i.bf16 %v299_v40, %v298_v39  ;;  %v2842_v49 = vld [vmem:[%s3888_s30 + $0x60] sm:$0xff]  ;;  %v4112_v63 = vld [vmem:[%s3888_s30 + $0xa8] sm:$0xff] }
  0x2f   : > { %5450 = vst [vmem:[#allocation12_spill] sm:$0xff] %v4056_v36  ;;  %v4078_v48 = vpack.i.bf16 %v297_v45, %v296_v41  ;;  %v4091_v54 = vld [vmem:[%s3888_s30 + $0x50] sm:$0xff]  ;;  %v4097_v56 = vld [vmem:[%s3888_s30 + $0x38] sm:$0xff]  ;;  %v4099_v57 = vpack.i.bf16 %v2843_v50, %v2842_v49  ;;  %v2845_v10 = vld [vmem:[%s3888_s30 + $0x80] sm:$0xff] }
  0x30   : > { %5451 = vst [vmem:[#allocation13_spill] sm:$0xff] %v4076_v47  ;;  %v4094_v55 = vld [vmem:[%s3888_s30 + $0x30] sm:$0xff]  ;;  %v4125_v4 = vld [vmem:[%s3888_s30 + $0x98] sm:$0xff]  ;;  %v4158_v39 = vld [vmem:[%s3888_s30 + $0xe0] sm:$0xff] }
  0x31   : > { %5452 = vst [vmem:[#allocation14_spill] sm:$0xff] %v4078_v48  ;;  %v4107_v59 = vpack.i.bf16 %v4097_v56, %v4094_v55  ;;  %v4119_v0 = vld [vmem:[%s3888_s30 + $0xb0] sm:$0xff]  ;;  %v2844_v5 = vld [vmem:[%s3888_s30 + $0x78] sm:$0xff]  ;;  %v2850_v40 = vld [vmem:[%s3888_s30 + $0xc0] sm:$0xff] }
  0x32   : > { %3160 = vrot.lane.b32.xlu2 %v3947_v33, %s3826_s4  ;;  %5453 = vst [vmem:[#allocation15_spill] sm:$0xff] %v4099_v57  ;;  %v4122_v1 = vld [vmem:[%s3888_s30 + $0x90] sm:$0xff]  ;;  %v3294_v13 = vpack.i.bf16 %v4119_v0, %v4112_v63  ;;  %v4141_v23 = vpack.i.bf16 %v2845_v10, %v2844_v5  ;;  %v4152_v28 = vld [vmem:[%s3888_s30 + $0xf8] sm:$0xff]  ;;  %v2851_v41 = vld [vmem:[%s3888_s30 + $0xc8] sm:$0xff] }
  0x33   : > { %3155 = vrot.lane.b32.xlu1 %v3949_v34, %s3826_s4  ;;  %3150 = vrot.lane.b32.xlu0 %v3951_v35, %s3826_s4  ;;  %5455 = vst [vmem:[#allocation17_spill] sm:$0xff] %v4107_v59  ;;  %v4139_v22 = vpack.i.bf16 %v4125_v4, %v4122_v1  ;;  %v4145_v27 = vld [vmem:[%s3888_s30 + $0xf0] sm:$0xff]  ;;  %v4155_v29 = vld [vmem:[%s3888_s30 + $0xd8] sm:$0xff] }
  0x34   : > { %5457 = vst [vmem:[#allocation19_spill] sm:$0xff] %v4141_v23 }
  0x35   : > { %5456 = vst [vmem:[#allocation18_spill] sm:$0xff] %v4139_v22 }
  0x3a   : > { %3175 = vrot.lane.b32.xlu2 %v3965_v42, %s3826_s4 }
  0x3b   : > { %3170 = vrot.lane.b32.xlu1 %v3967_v43, %s3826_s4  ;;  %3165 = vrot.lane.b32.xlu0 %v3969_v44, %s3826_s4 }
  0x42   : > { %3190 = vrot.lane.b32.xlu2 %v3983_v51, %s3827_s5 }
  0x43   : > { %3185 = vrot.lane.b32.xlu1 %v3184_v52, %s3827_s5  ;;  %3180 = vrot.lane.b32.xlu0 %v3985_v53, %s3826_s4  ;;  %v4088_v52 = vld [vmem:[%s3888_s30 + $0x48] sm:$0xff] }
  0x44   : > { %v4103_v58 = vpack.i.bf16 %v4091_v54, %v4088_v52 }
  0x46   : > { %5454 = vst [vmem:[#allocation16_spill] sm:$0xff] %v4103_v58 }
  0x4a   : > { %3205 = vrot.lane.b32.xlu2 %v3998_v60, %s3827_s5 }
  0x4b   : > { %3200 = vrot.lane.b32.xlu1 %v4000_v61, %s3827_s5  ;;  %3195 = vrot.lane.b32.xlu0 %v4002_v62, %s3827_s5 }
  0x52   : > { %3220 = vrot.lane.b32.xlu2 %v4016_v6, %s3827_s5 }
  0x53   : > { %3215 = vrot.lane.b32.xlu1 %v4018_v8, %s3827_s5  ;;  %3210 = vrot.lane.b32.xlu0 %v4020_v9, %s3827_s5 }
  0x5a   : > { %3235 = vrot.lane.b32.xlu2 %v4034_v19, %s3827_s5 }
  0x5b   : > { %3230 = vrot.lane.b32.xlu1 %v4036_v20, %s3827_s5  ;;  %3225 = vrot.lane.b32.xlu0 %v4038_v21, %s3827_s5 }
  0x62   : > { %3250 = vrot.lane.b32.xlu2 %v4052_v31, %s3827_s5 }
  0x63   : > { %3245 = vrot.lane.b32.xlu1 %v4054_v32, %s3827_s5  ;;  %3240 = vrot.lane.b32.xlu0 %v4056_v36, %s3827_s5  ;;  %v4208_v32 = vld [vmem:[%s3888_s30 + $0x168] sm:$0xff] }
  0x6a   : > { %3265 = vrot.lane.b32.xlu2 %v3264_v46, %s3828_s6 }
  0x6b   : > { %3260 = vrot.lane.b32.xlu1 %v4076_v47, %s3827_s5  ;;  %3255 = vrot.lane.b32.xlu0 %v4078_v48, %s3827_s5 }
  0x72   : > { %3280 = vrot.lane.b32.xlu2 %v4099_v57, %s3828_s6 }
  0x73   : > { %3275 = vrot.lane.b32.xlu1 %v4103_v58, %s3828_s6  ;;  %3270 = vrot.lane.b32.xlu0 %v4107_v59, %s3828_s6  ;;  %v2866_v59 = vld [vmem:[%s3888_s30 + $0x180] sm:$0xff] }
  0x74   : > { %v3126_v2 = vpop.permute.xlu2 %3125 }
  0x75   : > { %v3128_v11 = vunpack.i.h.bf16 %v3126_v2  ;;  %v3127_v12 = vunpack.i.l.bf16 %v3126_v2 }
  0x77   : > { %v4132_v14 = vsel %vm1518_vm0, %v2842_v49, %v3127_v12  ;;  %v4135_v18 = vsel %vm1518_vm0, %v2843_v50, %v3128_v11  ;;  %v3309_v49 = vpack.i.bf16 %v4152_v28, %v4145_v27  ;;  %v3304_v11 = vpack.i.bf16 %v4158_v39, %v4155_v29 }
  0x78   : > { %v3299_v12 = vpack.i.bf16 %v2851_v41, %v2850_v40 }
  0x7a   : > { %3295 = vrot.lane.b32.xlu2 %v3294_v13, %s3828_s6  ;;  %v4174_v13 = vld [vmem:[%s3888_s30 + $0x138] sm:$0xff] }
  0x7b   : > { %3290 = vrot.lane.b32.xlu1 %v4139_v22, %s3828_s6  ;;  %3285 = vrot.lane.b32.xlu0 %v4141_v23, %s3828_s6 }
  0x7c   : > { %v3131_v30 = vpop.permute.xlu2 %3130 }
  0x7d   : > { %v3133_v45 = vunpack.i.h.bf16 %v3131_v30  ;;  %v3132_v46 = vunpack.i.l.bf16 %v3131_v30  ;;  %v4179_v30 = vld [vmem:[%s3888_s30 + $0x140] sm:$0xff] }
  0x7f   : > { %v4165_v50 = vsel %vm1518_vm0, %v2844_v5, %v3132_v46  ;;  %v4168_v2 = vsel %vm1518_vm0, %v2845_v10, %v3133_v45  ;;  %v4182_v5 = vld [vmem:[%s3888_s30 + $0x120] sm:$0xff]  ;;  %v4185_v45 = vld [vmem:[%s3888_s30 + $0x128] sm:$0xff] }
  0x80   : > { %5458 = vst [vmem:[#allocation20_spill] sm:$0xff] %v4182_v5  ;;  %v4188_v46 = vld [vmem:[%s3888_s30 + $0x108] sm:$0xff]  ;;  %v3319_v23 = vpack.i.bf16 %v4185_v45, %v4182_v5 }
  0x81   : > { %5459 = vst [vmem:[#allocation21_spill] sm:$0xff] %v4185_v45 }
  0x82   : > { %3310 = vrot.lane.b32.xlu2 %v3309_v49, %s3828_s6  ;;  %5460 = vst [vmem:[#allocation22_spill] sm:$0xff] %v4188_v46  ;;  %v2857_v49 = vld [vmem:[%s3888_s30 + $0x110] sm:$0xff] }
  0x83   : > { %3305 = vrot.lane.b32.xlu1 %v3304_v11, %s3828_s6  ;;  %3300 = vrot.lane.b32.xlu0 %v3299_v12, %s3828_s6  ;;  %v3324_v12 = vpack.i.bf16 %v4179_v30, %v4174_v13  ;;  %v3314_v47 = vpack.i.bf16 %v2857_v49, %v4188_v46 }
  0x84   : > { %v3146_v10 = vpop.permute.xlu2 %3145 }
  0x85   : > { %v3148_v22 = vunpack.i.h.bf16 %v3146_v10  ;;  %v3147_v11 = vunpack.i.l.bf16 %v3146_v10  ;;  %v2867_v10 = vld [vmem:[%s3888_s30 + $0x188] sm:$0xff] }
  0x86   : > { %v3339_v19 = vpack.i.bf16 %v2867_v10, %v2866_v59 }
  0x87   : > { %v4194_v58 = vsel %vm1518_vm0, %v2850_v40, %v3147_v11  ;;  %v4197_v57 = vsel %vm1518_vm0, %v2851_v41, %v3148_v22  ;;  %v4213_v11 = vld [vmem:[%s3888_s30 + $0x170] sm:$0xff]  ;;  %v4219_v41 = vld [vmem:[%s3888_s30 + $0x158] sm:$0xff] }
  0x88   : > { %v4216_v22 = vld [vmem:[%s3888_s30 + $0x150] sm:$0xff]  ;;  %v3334_v36 = vpack.i.bf16 %v4213_v11, %v4208_v32 }
  0x89   : > { %v3329_v45 = vpack.i.bf16 %v4219_v41, %v4216_v22 }
  0x8a   : > { %3325 = vrot.lane.b32.xlu2 %v3324_v12, %s3828_s6 }
  0x8b   : > { %3320 = vrot.lane.b32.xlu1 %v3319_v23, %s3828_s6  ;;  %3315 = vrot.lane.b32.xlu0 %v3314_v47, %s3828_s6 }
  0x8c   : > { %v4210_v40 = vpop.permute.xlu2 %3160 }
  0x8d   : > { %v3163_v31 = vunpack.i.h.bf16 %v4210_v40  ;;  %v3116_v48 = vpop.permute.xlu1 %3115  ;;  %v4222_v12 = vpop.permute.xlu0 %3105 }
  0x8e   : > { %v3118_v20 = vunpack.i.h.bf16 %v3116_v48  ;;  %v3117_v23 = vunpack.i.l.bf16 %v3116_v48 }
  0x8f   : > { %v4225_v47 = vsel %vm1518_vm0, %v2857_v49, %v3163_v31 }
  0x90   : > { %v4233_v5 = vsel %vm1518_vm0, %v4094_v55, %v3117_v23  ;;  %v4237_v46 = vsel %vm1518_vm0, %v4097_v56, %v3118_v20 }
  0x92   : > { %3340 = vrot.lane.b32.xlu2 %v3339_v19, %s3828_s6 }
  0x93   : > { %3335 = vrot.lane.b32.xlu1 %v3334_v36, %s3828_s6  ;;  %3330 = vrot.lane.b32.xlu0 %v3329_v45, %s3828_s6 }
  0x94   : > { %v4242_v31 = vpop.permute.xlu2 %3175 }
  0x95   : > { %v4244_v48 = vpop.permute.xlu1 %3120  ;;  %v3111_v59 = vpop.permute.xlu0 %3110 }
  0x96   : > { %v3113_v49 = vunpack.i.h.bf16 %v3111_v59  ;;  %v3112_v10 = vunpack.i.l.bf16 %v3111_v59 }
  0x98   : > { %v1521_v45 = vsel %vm1518_vm0, %v4061_v37, %v3112_v10  ;;  %v1522_v23 = vsel %vm1518_vm0, %v4068_v38, %v3113_v49 }
  0x9a   : > { %3355 = vrot.lane.b32.xlu2 %v3913_v16, %s3829_s7 }
  0x9b   : > { %3350 = vrot.lane.b32.xlu1 %v3898_v7, %s3829_s7  ;;  %3345 = vrot.lane.b32.xlu0 %v3915_v17, %s3829_s7 }
  0x9c   : > { %v3191_v19 = vpop.permute.xlu2 %3190 }
  0x9d   : > { %v3193_v20 = vunpack.i.h.bf16 %v3191_v19  ;;  %v3192_v36 = vunpack.i.l.bf16 %v3191_v19  ;;  %v3141_v55 = vpop.permute.xlu1 %3140  ;;  %v4252_v56 = vpop.permute.xlu0 %3135 }
  0x9f   : > { %v4259_v16 = vsel %vm1551_vm1, %v1521_v45, %v3192_v36  ;;  %v4262_v7 = vsel %vm1551_vm1, %v1522_v23, %v3193_v20  ;;  %v3142_v20 = vunpack.i.l.bf16 %v3141_v55 }
  0xa2   : > { %3370 = vrot.lane.b32.xlu2 %v3933_v26, %s3829_s7  ;;  %v3143_v26 = vunpack.i.h.bf16 %v3141_v55 }
  0xa3   : > { %3365 = vrot.lane.b32.xlu1 %v3911_v15, %s3829_s7  ;;  %3360 = vrot.lane.b32.xlu0 %v3893_v3, %s3829_s7 }
  0xa4   : > { %v3206_v17 = vpop.permute.xlu2 %3205 }
  0xa5   : > { %v3208_v37 = vunpack.i.h.bf16 %v3206_v17  ;;  %v3207_v59 = vunpack.i.l.bf16 %v3206_v17  ;;  %v3156_v10 = vpop.permute.xlu1 %3155  ;;  %v4270_v38 = vpop.permute.xlu0 %3150  ;;  %v3108_v17 = vunpack.i.h.bf16 %v4222_v12 }
  0xa6   : > { %v3157_v23 = vunpack.i.l.bf16 %v3156_v10 }
  0xa7   : > { %v4274_v49 = vsel %vm1551_vm1, %v4132_v14, %v3207_v59  ;;  %v4278_v19 = vsel %vm1551_vm1, %v4135_v18, %v3208_v37  ;;  %v1533_v18 = vsel %vm1518_vm0, %v4112_v63, %v3142_v20  ;;  %v3107_v37 = vunpack.i.l.bf16 %v4222_v12  ;;  %v205_v59 = vld [vmem:[%s3888_s30 + $0x8] sm:$0xff] }
  0xaa   : > { %3385 = vrot.lane.b32.xlu2 %v3951_v35, %s3829_s7  ;;  %v1534_v35 = vsel %vm1518_vm0, %v4119_v0, %v3143_v26  ;;  %v204_v0 = vld [vmem:[%s3888_s30] sm:$0xff] }
  0xab   : > { %3380 = vrot.lane.b32.xlu1 %v3929_v24, %s3829_s7  ;;  %3375 = vrot.lane.b32.xlu0 %v3931_v25, %s3829_s7  ;;  %v3158_v25 = vunpack.i.h.bf16 %v3156_v10 }
  0xac   : > { %v3221_v3 = vpop.permute.xlu2 %3220 }
  0xad   : > { %v3223_v15 = vunpack.i.h.bf16 %v3221_v3  ;;  %v3222_v14 = vunpack.i.l.bf16 %v3221_v3  ;;  %v3171_v36 = vpop.permute.xlu1 %3170  ;;  %v4286_v45 = vpop.permute.xlu0 %3165  ;;  %v1540_v12 = vsel %vm1518_vm0, %v4152_v28, %v3158_v25 }
  0xaf   : > { %v4293_v55 = vsel %vm1551_vm1, %v1533_v18, %v3222_v14  ;;  %v4296_v24 = vsel %vm1551_vm1, %v1534_v35, %v3223_v15 }
  0xb0   : > { %5461 = vst [vmem:[#allocation23_spill] sm:$0xff] %v4293_v55  ;;  %v3173_v55 = vunpack.i.h.bf16 %v3171_v36 }
  0xb1   : > { %5462 = vst [vmem:[#allocation24_spill] sm:$0xff] %v4296_v24  ;;  %v3122_v24 = vunpack.i.l.bf16 %v4244_v48 }
  0xb2   : > { %3400 = vrot.lane.b32.xlu2 %v3969_v44, %s3829_s7  ;;  %v1539_v44 = vsel %vm1518_vm0, %v4145_v27, %v3157_v23 }
  0xb3   : > { %3395 = vrot.lane.b32.xlu1 %v3947_v33, %s3829_s7  ;;  %3390 = vrot.lane.b32.xlu0 %v3949_v34, %s3829_s7  ;;  %v1519_v33 = vsel %vm1518_vm0, %v204_v0, %v3107_v37  ;;  %v1520_v34 = vsel %vm1518_vm0, %v205_v59, %v3108_v17  ;;  %v3123_v37 = vunpack.i.h.bf16 %v4244_v48  ;;  %v1525_v17 = vsel %vm1518_vm0, %v4088_v52, %v3122_v24  ;;  %v2898_v59 = vld [vmem:[%s3888_s30 + $0x181] sm:$0xff] }
  0xb4   : > { %v3236_v26 = vpop.permute.xlu2 %3235 }
  0xb5   : > { %v3238_v20 = vunpack.i.h.bf16 %v3236_v26  ;;  %v3237_v3 = vunpack.i.l.bf16 %v3236_v26  ;;  %v3186_v15 = vpop.permute.xlu1 %3185  ;;  %v4308_v10 = vpop.permute.xlu0 %3180  ;;  %v1526_v52 = vsel %vm1518_vm0, %v4091_v54, %v3123_v37  ;;  %v3138_v54 = vunpack.i.h.bf16 %v4252_v56 }
  0xb6   : > { %v3188_v14 = vunpack.i.h.bf16 %v3186_v15  ;;  %v3187_v18 = vunpack.i.l.bf16 %v3186_v15  ;;  %v3172_v15 = vunpack.i.l.bf16 %v3171_v36  ;;  %v3137_v37 = vunpack.i.l.bf16 %v4252_v56 }
  0xb7   : > { %v4317_v35 = vsel %vm1551_vm1, %v1539_v44, %v3237_v3  ;;  %v4320_v26 = vsel %vm1551_vm1, %v1540_v12, %v3238_v20  ;;  %v2899_v20 = vld [vmem:[%s3888_s30 + $0x189] sm:$0xff]  ;;  %v1532_v56 = vsel %vm1518_vm0, %v4125_v4, %v3138_v54  ;;  %v3153_v4 = vunpack.i.h.bf16 %v4270_v38 }
  0xb8   : > { %v1552_v23 = vsel %vm1551_vm1, %v1519_v33, %v3187_v18  ;;  %v1553_v25 = vsel %vm1551_vm1, %v1520_v34, %v3188_v14  ;;  %v1545_v36 = vsel %vm1518_vm0, %v4174_v13, %v3172_v15  ;;  %v4348_v13 = vpack.i.bf16 %v2899_v20, %v2898_v59 }
  0xba   : > { %3415 = vrot.lane.b32.xlu2 %v3985_v53, %s3829_s7  ;;  %v1546_v53 = vsel %vm1518_vm0, %v4179_v30, %v3173_v55 }
  0xbb   : > { %3410 = vrot.lane.b32.xlu1 %v3965_v42, %s3829_s7  ;;  %3405 = vrot.lane.b32.xlu0 %v3967_v43, %s3829_s7 }
  0xbc   : > { %v3251_v0 = vpop.permute.xlu2 %3250 }
  0xbd   : > { %v3253_v3 = vunpack.i.h.bf16 %v3251_v0  ;;  %v3252_v48 = vunpack.i.l.bf16 %v3251_v0  ;;  %v3201_v44 = vpop.permute.xlu1 %3200  ;;  %v3196_v12 = vpop.permute.xlu0 %3195 }
  0xbe   : > { %v3203_v42 = vunpack.i.h.bf16 %v3201_v44  ;;  %v3202_v14 = vunpack.i.l.bf16 %v3201_v44  ;;  %v3198_v18 = vunpack.i.h.bf16 %v3196_v12  ;;  %v3197_v43 = vunpack.i.l.bf16 %v3196_v12 }
  0xbf   : > { %v4343_v24 = vsel %vm1551_vm1, %v1545_v36, %v3252_v48  ;;  %v4346_v33 = vsel %vm1551_vm1, %v1546_v53, %v3253_v3  ;;  %v1531_v3 = vsel %vm1518_vm0, %v4122_v1, %v3137_v37 }
  0xc0   : > { %v1558_v30 = vsel %vm1551_vm1, %v1525_v17, %v3202_v14  ;;  %v1559_v55 = vsel %vm1551_vm1, %v1526_v52, %v3203_v42  ;;  %v4354_v34 = vsel %vm1551_vm1, %v4233_v5, %v3197_v43  ;;  %v4358_v15 = vsel %vm1551_vm1, %v4237_v46, %v3198_v18 }
  0xc2   : > { %3430 = vrot.lane.b32.xlu2 %v4002_v62, %s3830_s8 }
  0xc3   : > { %3425 = vrot.lane.b32.xlu1 %v3983_v51, %s3830_s8  ;;  %3420 = vrot.lane.b32.xlu0 %v4348_v13, %s3829_s7 }
  0xc4   : > { %v3266_v5 = vpop.permute.xlu2 %3265 }
  0xc5   : > { %v3268_v17 = vunpack.i.h.bf16 %v3266_v5  ;;  %v3267_v0 = vunpack.i.l.bf16 %v3266_v5  ;;  %v3216_v46 = vpop.permute.xlu1 %3215  ;;  %v3211_v59 = vpop.permute.xlu0 %3210 }
  0xc6   : > { %v3218_v20 = vunpack.i.h.bf16 %v3216_v46  ;;  %v3217_v36 = vunpack.i.l.bf16 %v3216_v46  ;;  %v3213_v53 = vunpack.i.h.bf16 %v3211_v59  ;;  %v3212_v62 = vunpack.i.l.bf16 %v3211_v59  ;;  %v5463_v46 = vld [vmem:[#allocation22_spill] sm:$0xff] }
  0xc7   : > { %v4373_v51 = vsel %vm1584_vm2, %v1552_v23, %v3267_v0  ;;  %v4376_v48 = vsel %vm1584_vm2, %v1553_v25, %v3268_v17  ;;  %v3152_v23 = vunpack.i.l.bf16 %v4270_v38  ;;  %v1538_v38 = vsel %vm1518_vm0, %v4158_v39, %v3153_v4  ;;  %v5465_v4 = vld [vmem:[#allocation21_spill] sm:$0xff] }
  0xc8   : > { %v1564_v44 = vsel %vm1551_vm1, %v1531_v3, %v3217_v36  ;;  %v1565_v12 = vsel %vm1551_vm1, %v1532_v56, %v3218_v20  ;;  %v4382_v42 = vsel %vm1551_vm1, %v4165_v50, %v3212_v62  ;;  %v4386_v1 = vsel %vm1551_vm1, %v4168_v2, %v3213_v53  ;;  %v5464_v56 = vld [vmem:[#allocation20_spill] sm:$0xff] }
  0xc9   : > { %v3162_v39 = vunpack.i.l.bf16 %v4210_v40 }
  0xca   : > { %3445 = vrot.lane.b32.xlu2 %v4020_v9, %s3830_s8  ;;  %v1537_v9 = vsel %vm1518_vm0, %v4155_v29, %v3152_v23 }
  0xcb   : > { %3440 = vrot.lane.b32.xlu1 %v3998_v60, %s3830_s8  ;;  %3435 = vrot.lane.b32.xlu0 %v4000_v61, %s3830_s8 }
  0xcc   : > { %v3281_v25 = vpop.permute.xlu2 %3280 }
  0xcd   : > { %v3283_v50 = vunpack.i.h.bf16 %v3281_v25  ;;  %v3282_v14 = vunpack.i.l.bf16 %v3281_v25  ;;  %v3231_v18 = vpop.permute.xlu1 %3230  ;;  %v3226_v43 = vpop.permute.xlu0 %3225 }
  0xce   : > { %v3233_v2 = vunpack.i.h.bf16 %v3231_v18  ;;  %v3232_v52 = vunpack.i.l.bf16 %v3231_v18  ;;  %v3228_v54 = vunpack.i.h.bf16 %v3226_v43  ;;  %v3227_v37 = vunpack.i.l.bf16 %v3226_v43 }
  0xcf   : > { %v4401_v60 = vsel %vm1584_vm2, %v1558_v30, %v3282_v14  ;;  %v4404_v61 = vsel %vm1584_vm2, %v1559_v55, %v3283_v50  ;;  %v3168_v30 = vunpack.i.h.bf16 %v4286_v45  ;;  %v3167_v55 = vunpack.i.l.bf16 %v4286_v45 }
  0xd0   : > { %v1570_v5 = vsel %vm1551_vm1, %v1537_v9, %v3232_v52  ;;  %v1571_v17 = vsel %vm1551_vm1, %v1538_v38, %v3233_v2  ;;  %v4410_v0 = vsel %vm1551_vm1, %v4194_v58, %v3227_v37  ;;  %v4414_v29 = vsel %vm1551_vm1, %v4197_v57, %v3228_v54  ;;  %v5467_v54 = vld [vmem:[#allocation8_spill] sm:$0xff]  ;;  %v5468_v37 = vld [vmem:[#allocation9_spill] sm:$0xff] }
  0xd1   : > { %v1541_v57 = vsel %vm1518_vm0, %v5463_v46, %v3162_v39  ;;  %v1543_v45 = vsel %vm1518_vm0, %v5464_v56, %v3167_v55  ;;  %v3178_v43 = vunpack.i.h.bf16 %v4242_v31  ;;  %v3177_v2 = vunpack.i.l.bf16 %v4242_v31 }
  0xd2   : > { %3460 = vrot.lane.b32.xlu2 %v4038_v21, %s3830_s8  ;;  %v3182_v52 = vunpack.i.l.bf16 %v4308_v10 }
  0xd3   : > { %3455 = vrot.lane.b32.xlu1 %v4016_v6, %s3830_s8  ;;  %3450 = vrot.lane.b32.xlu0 %v4018_v8, %s3830_s8  ;;  %v1544_v6 = vsel %vm1518_vm0, %v5465_v4, %v3168_v30  ;;  %v1548_v31 = vsel %vm1518_vm0, %v4219_v41, %v3178_v43  ;;  %v5470_v4 = vld [vmem:[#allocation10_spill] sm:$0xff]  ;;  %v2931_v43 = vld [vmem:[%s3888_s30 + $0x18a] sm:$0xff] }
  0xd4   : > { %v3296_v58 = vpop.permute.xlu2 %3295 }
  0xd5   : > { %v3298_v59 = vunpack.i.h.bf16 %v3296_v58  ;;  %v3297_v20 = vunpack.i.l.bf16 %v3296_v58  ;;  %v3246_v40 = vpop.permute.xlu1 %3245  ;;  %v3241_v36 = vpop.permute.xlu0 %3240 }
  0xd6   : > { %v3248_v53 = vunpack.i.h.bf16 %v3246_v40  ;;  %v3247_v21 = vunpack.i.l.bf16 %v3246_v40  ;;  %v3243_v62 = vunpack.i.h.bf16 %v3241_v36  ;;  %v3242_v3 = vunpack.i.l.bf16 %v3241_v36 }
  0xd7   : > { %v4432_v8 = vsel %vm1584_vm2, %v1564_v44, %v3297_v20  ;;  %v4435_v23 = vsel %vm1584_vm2, %v1565_v12, %v3298_v59  ;;  %v5466_v44 = vld [vmem:[#allocation12_spill] sm:$0xff]  ;;  %v3183_v12 = vunpack.i.h.bf16 %v4308_v10  ;;  %v1549_v20 = vsel %vm1518_vm0, %v4208_v32, %v3182_v52 }
  0xd8   : > { %v1576_v25 = vsel %vm1551_vm1, %v1543_v45, %v3247_v21  ;;  %v1577_v50 = vsel %vm1551_vm1, %v1544_v6, %v3248_v53  ;;  %v4440_v14 = vsel %vm1551_vm1, %v1541_v57, %v3242_v3  ;;  %v4444_v18 = vsel %vm1551_vm1, %v4225_v47, %v3243_v62  ;;  %v5469_v45 = vld [vmem:[#allocation14_spill] sm:$0xff] }
  0xd9   : > { %v1547_v47 = vsel %vm1518_vm0, %v4216_v22, %v3177_v2  ;;  %v1550_v40 = vsel %vm1518_vm0, %v4213_v11, %v3183_v12  ;;  %v2930_v6 = vld [vmem:[%s3888_s30 + $0x182] sm:$0xff]  ;;  %vm2674_vm0 = vcmask 1044484  }
  0xda   : > { %3475 = vrot.lane.b32.xlu2 %v5466_v44, %s3830_s8 }
  0xdb   : > { %3470 = vrot.lane.b32.xlu1 %v5467_v54, %s3830_s8  ;;  %3465 = vrot.lane.b32.xlu0 %v5468_v37, %s3830_s8 }
  0xdc   : > { %v3311_v9 = vpop.permute.xlu2 %3310 }
  0xdd   : > { %v3313_v38 = vunpack.i.h.bf16 %v3311_v9  ;;  %v3312_v39 = vunpack.i.l.bf16 %v3311_v9  ;;  %v3261_v30 = vpop.permute.xlu1 %3260  ;;  %v3256_v55 = vpop.permute.xlu0 %3255 }
  0xde   : > { %v3263_v58 = vunpack.i.h.bf16 %v3261_v30  ;;  %v3262_v10 = vunpack.i.l.bf16 %v3261_v30  ;;  %v3258_v57 = vunpack.i.h.bf16 %v3256_v55  ;;  %v3257_v59 = vunpack.i.l.bf16 %v3256_v55 }
  0xdf   : > { %v4465_v36 = vsel %vm1584_vm2, %v1570_v5, %v3312_v39  ;;  %v4468_v53 = vsel %vm1584_vm2, %v1571_v17, %v3313_v38  ;;  %v5471_v5 = vld [vmem:[#allocation11_spill] sm:$0xff]  ;;  %v4492_v39 = vpack.i.bf16 %v2931_v43, %v2930_v6 }
  0xe0   : > { %v1582_v21 = vsel %vm1551_vm1, %v1549_v20, %v3262_v10  ;;  %v1583_v62 = vsel %vm1551_vm1, %v1550_v40, %v3263_v58  ;;  %v4473_v3 = vsel %vm1551_vm1, %v1547_v47, %v3257_v59  ;;  %v4476_v56 = vsel %vm1551_vm1, %v1548_v31, %v3258_v57 }
  0xe1   : > { %vm2676_vm1 = vcmask 1045509  }
  0xe2   : > { %3490 = vrot.lane.b32.xlu2 %v5469_v45, %s3830_s8 }
  0xe3   : > { %3485 = vrot.lane.b32.xlu1 %v5470_v4, %s3830_s8  ;;  %3480 = vrot.lane.b32.xlu0 %v5471_v5, %s3830_s8 }
  0xe4   : > { %v3326_v17 = vpop.permute.xlu2 %3325 }
  0xe5   : > { %v3328_v2 = vunpack.i.h.bf16 %v3326_v17  ;;  %v3327_v44 = vunpack.i.l.bf16 %v3326_v17  ;;  %v3276_v12 = vpop.permute.xlu1 %3275  ;;  %v3271_v52 = vpop.permute.xlu0 %3270 }
  0xe6   : > { %v3278_v54 = vunpack.i.h.bf16 %v3276_v12  ;;  %v3277_v37 = vunpack.i.l.bf16 %v3276_v12  ;;  %v3273_v9 = vunpack.i.h.bf16 %v3271_v52  ;;  %v3272_v47 = vunpack.i.l.bf16 %v3271_v52 }
  0xe7   : > { %v4487_v31 = vsel %vm1584_vm2, %v1576_v25, %v3327_v44  ;;  %v4490_v38 = vsel %vm1584_vm2, %v1577_v50, %v3328_v2  ;;  %v5472_v25 = vld [vmem:[#allocation17_spill] sm:$0xff]  ;;  %v5476_v44 = vld [vmem:[#allocation16_spill] sm:$0xff] }
  0xe8   : > { %v1589_v30 = vsel %vm1584_vm2, %v4354_v34, %v3277_v37  ;;  %v1590_v55 = vsel %vm1584_vm2, %v4358_v15, %v3278_v54  ;;  %v4500_v58 = vsel %vm1584_vm2, %v4259_v16, %v3272_v47  ;;  %v4504_v10 = vsel %vm1584_vm2, %v4262_v7, %v3273_v9  ;;  %v5473_v34 = vld [vmem:[#allocation13_spill] sm:$0xff] }
  0xea   : > { %3505 = vrot.lane.b32.xlu2 %v5472_v25, %s3831_s9 }
  0xeb   : > { %3500 = vrot.lane.b32.xlu1 %v4492_v39, %s3830_s8  ;;  %3495 = vrot.lane.b32.xlu0 %v5473_v34, %s3830_s8 }
  0xec   : > { %v3341_v50 = vpop.permute.xlu2 %3340 }
  0xed   : > { %v3343_v15 = vunpack.i.h.bf16 %v3341_v50  ;;  %v3342_v57 = vunpack.i.l.bf16 %v3341_v50  ;;  %v3291_v59 = vpop.permute.xlu1 %3290  ;;  %v3286_v16 = vpop.permute.xlu0 %3285  ;;  %v3529_v50 = vpack.i.bf16 %v4145_v27, %v4112_v63  ;;  %v5479_v63 = vld [vmem:[#allocation18_spill] sm:$0xff] }
  0xee   : > { %v3293_v20 = vunpack.i.h.bf16 %v3291_v59  ;;  %v3292_v40 = vunpack.i.l.bf16 %v3291_v59  ;;  %v3288_v45 = vunpack.i.h.bf16 %v3286_v16  ;;  %v3287_v7 = vunpack.i.l.bf16 %v3286_v16  ;;  %v5478_v59 = vld [vmem:[#allocation24_spill] sm:$0xff] }
  0xef   : > { %v4513_v4 = vsel %vm1584_vm2, %v1582_v21, %v3342_v57  ;;  %v4516_v5 = vsel %vm1584_vm2, %v1583_v62, %v3343_v15  ;;  %v5474_v21 = vld [vmem:[#allocation19_spill] sm:$0xff]  ;;  %v2989_v16 = vld [vmem:[%s3888_s30 + $0x159] sm:$0xff] }
  0xf0   : > { %v1595_v17 = vsel %vm1584_vm2, %v4382_v42, %v3292_v40  ;;  %v1596_v6 = vsel %vm1584_vm2, %v4386_v1, %v3293_v20  ;;  %v4524_v43 = vsel %vm1584_vm2, %v4274_v49, %v3287_v7  ;;  %v4528_v2 = vsel %vm1584_vm2, %v4278_v19, %v3288_v45  ;;  %v5475_v62 = vld [vmem:[#allocation15_spill] sm:$0xff] }
  0xf1   : > { %v3534_v19 = vpack.i.bf16 %v4216_v22, %v4152_v28  ;;  %v5477_v22 = vld [vmem:[#allocation23_spill] sm:$0xff] }
  0xf2   : > { %3520 = vrot.lane.b32.xlu2 %v5474_v21, %s3831_s9 }
  0xf3   : > { %3515 = vrot.lane.b32.xlu1 %v5475_v62, %s3831_s9  ;;  %3510 = vrot.lane.b32.xlu0 %v5476_v44, %s3831_s9 }
  0xf4   : > { %v3356_v42 = vpop.permute.xlu2 %3355 }
  0xf5   : > { %v3358_v1 = vunpack.i.h.bf16 %v3356_v42  ;;  %v3357_v12 = vunpack.i.l.bf16 %v3356_v42  ;;  %v3306_v49 = vpop.permute.xlu1 %3305  ;;  %v3301_v52 = vpop.permute.xlu0 %3300 }
  0xf6   : > { %v3308_v54 = vunpack.i.h.bf16 %v3306_v49  ;;  %v3307_v37 = vunpack.i.l.bf16 %v3306_v49  ;;  %v3303_v9 = vunpack.i.h.bf16 %v3301_v52  ;;  %v3302_v47 = vunpack.i.l.bf16 %v3301_v52 }
  0xf7   : > { %v4539_v25 = vsel %vm1617_vm3, %v1589_v30, %v3357_v12  ;;  %v4542_v34 = vsel %vm1617_vm3, %v1590_v55, %v3358_v1  ;;  %v2988_v55 = vld [vmem:[%s3888_s30 + $0x151] sm:$0xff] }
  0xf8   : > { %v1601_v15 = vsel %vm1584_vm2, %v4410_v0, %v3307_v37  ;;  %v1602_v28 = vsel %vm1584_vm2, %v4414_v29, %v3308_v54  ;;  %v4552_v57 = vsel %vm1584_vm2, %v5477_v22, %v3302_v47  ;;  %v4556_v30 = vsel %vm1584_vm2, %v5478_v59, %v3303_v9  ;;  %v2980_v0 = vld [vmem:[%s3888_s30 + $0xf1] sm:$0xff]  ;;  %v2981_v29 = vld [vmem:[%s3888_s30 + $0xf9] sm:$0xff] }
  0xf9   : > { %v3549_v21 = vpack.i.bf16 %v2989_v16, %v2988_v55  ;;  %v3544_v52 = vpack.i.bf16 %v2981_v29, %v2980_v0  ;;  %v2964_v9 = vld [vmem:[%s3888_s30 + $0x31] sm:$0xff]  ;;  %v2965_v47 = vld [vmem:[%s3888_s30 + $0x39] sm:$0xff] }
  0xfa   : > { %3535 = vrot.lane.b32.xlu2 %v3534_v19, %s3831_s9  ;;  %v3539_v19 = vpack.i.bf16 %v5463_v46, %v4219_v41  ;;  %v3020_v41 = vld [vmem:[%s3888_s30 + $0x152] sm:$0xff]  ;;  %v3564_v55 = vpack.i.bf16 %v2965_v47, %v2964_v9 }
  0xfb   : > { %3530 = vrot.lane.b32.xlu1 %v3529_v50, %s3831_s9  ;;  %3525 = vrot.lane.b32.xlu0 %v5479_v63, %s3831_s9  ;;  %v3013_v50 = vld [vmem:[%s3888_s30 + $0xfa] sm:$0xff] }
  0xfc   : > { %v3371_v27 = vpop.permute.xlu2 %3370 }
  0xfd   : > { %v3373_v20 = vunpack.i.h.bf16 %v3371_v27  ;;  %v3372_v40 = vunpack.i.l.bf16 %v3371_v27  ;;  %v3321_v45 = vpop.permute.xlu1 %3320  ;;  %v3316_v7 = vpop.permute.xlu0 %3315 }
  0xfe   : > { %v3323_v62 = vunpack.i.h.bf16 %v3321_v45  ;;  %v3322_v44 = vunpack.i.l.bf16 %v3321_v45  ;;  %v3318_v42 = vunpack.i.h.bf16 %v3316_v7  ;;  %v3317_v1 = vunpack.i.l.bf16 %v3316_v7 }
  0xff   : > { %v4567_v12 = vsel %vm1617_vm3, %v1595_v17, %v3372_v40  ;;  %v4570_v49 = vsel %vm1617_vm3, %v1596_v6, %v3373_v20 }
 0x100   : > { %v1607_v54 = vsel %vm1584_vm2, %v4440_v14, %v3322_v44  ;;  %v1608_v37 = vsel %vm1584_vm2, %v4444_v18, %v3323_v62  ;;  %v4580_v17 = vsel %vm1584_vm2, %v4317_v35, %v3317_v1  ;;  %v4584_v6 = vsel %vm1584_vm2, %v4320_v26, %v3318_v42  ;;  %v3021_v14 = vld [vmem:[%s3888_s30 + $0x15a] sm:$0xff]  ;;  %v3012_v18 = vld [vmem:[%s3888_s30 + $0xf2] sm:$0xff] }
 0x101   : > { %v3559_v40 = vpack.i.bf16 %v3021_v14, %v3020_v41  ;;  %v3554_v45 = vpack.i.bf16 %v3013_v50, %v3012_v18  ;;  %v3005_v44 = vld [vmem:[%s3888_s30 + $0x9a] sm:$0xff]  ;;  %v2972_v1 = vld [vmem:[%s3888_s30 + $0x91] sm:$0xff] }
 0x102   : > { %3550 = vrot.lane.b32.xlu2 %v3549_v21, %s3832_s10 }
 0x103   : > { %3545 = vrot.lane.b32.xlu1 %v3544_v52, %s3832_s10  ;;  %3540 = vrot.lane.b32.xlu0 %v3539_v19, %s3831_s9  ;;  %v2973_v52 = vld [vmem:[%s3888_s30 + $0x99] sm:$0xff] }
 0x104   : > { %v3386_v46 = vpop.permute.xlu2 %3385 }
 0x105   : > { %v3388_v35 = vunpack.i.h.bf16 %v3386_v46  ;;  %v3387_v22 = vunpack.i.l.bf16 %v3386_v46  ;;  %v3336_v59 = vpop.permute.xlu1 %3335  ;;  %v3331_v26 = vpop.permute.xlu0 %3330 }
 0x106   : > { %v3338_v16 = vunpack.i.h.bf16 %v3336_v59  ;;  %v3337_v63 = vunpack.i.l.bf16 %v3336_v59  ;;  %v3333_v27 = vunpack.i.h.bf16 %v3331_v26  ;;  %v3332_v0 = vunpack.i.l.bf16 %v3331_v26 }
 0x107   : > { %v4596_v29 = vsel %vm1617_vm3, %v1601_v15, %v3387_v22  ;;  %v4599_v20 = vsel %vm1617_vm3, %v1602_v28, %v3388_v35  ;;  %v3004_v28 = vld [vmem:[%s3888_s30 + $0x92] sm:$0xff]  ;;  %v3569_v59 = vpack.i.bf16 %v2973_v52, %v2972_v1 }
 0x108   : > { %v1613_v7 = vsel %vm1584_vm2, %v4473_v3, %v3337_v63  ;;  %v1614_v21 = vsel %vm1584_vm2, %v4476_v56, %v3338_v16  ;;  %v4607_v62 = vsel %vm1584_vm2, %v4343_v24, %v3332_v0  ;;  %v4611_v15 = vsel %vm1584_vm2, %v4346_v33, %v3333_v27  ;;  %v2996_v3 = vld [vmem:[%s3888_s30 + $0x32] sm:$0xff]  ;;  %v2997_v56 = vld [vmem:[%s3888_s30 + $0x3a] sm:$0xff] }
 0x109   : > { %v3579_v47 = vpack.i.bf16 %v3005_v44, %v3004_v28  ;;  %v3574_v22 = vpack.i.bf16 %v2997_v56, %v2996_v3  ;;  %v2943_v27 = vld [vmem:[%s3888_s30 + $0xb0] sm:$0xff]  ;;  %vm2678_vm2 = vcmask 1046534  }
 0x10a   : > { %3565 = vrot.lane.b32.xlu2 %v3564_v55, %s3832_s10  ;;  %v2951_v0 = vld [vmem:[%s3888_s30 + $0x110] sm:$0xff]  ;;  %v3589_v52 = vpack.i.bf16 %v2943_v27, %v4213_v11 }
 0x10b   : > { %3560 = vrot.lane.b32.xlu1 %v3559_v40, %s3833_s11  ;;  %3555 = vrot.lane.b32.xlu0 %v3554_v45, %s3833_s11  ;;  %v3022_v11 = vld [vmem:[%s3888_s30 + $0x16a] sm:$0xff] }
 0x10c   : > { %v3401_v42 = vpop.permute.xlu2 %3400 }
 0x10d   : > { %v3403_v24 = vunpack.i.h.bf16 %v3401_v42  ;;  %v3402_v19 = vunpack.i.l.bf16 %v3401_v42  ;;  %v3351_v9 = vpop.permute.xlu1 %3350  ;;  %v3346_v33 = vpop.permute.xlu0 %3345 }
 0x10e   : > { %v3353_v41 = vunpack.i.h.bf16 %v3351_v9  ;;  %v3352_v46 = vunpack.i.l.bf16 %v3351_v9  ;;  %v3348_v14 = vunpack.i.h.bf16 %v3346_v33  ;;  %v3347_v18 = vunpack.i.l.bf16 %v3346_v33  ;;  %v3023_v33 = vld [vmem:[%s3888_s30 + $0x172] sm:$0xff] }
 0x10f   : > { %v4623_v50 = vsel %vm1617_vm3, %v1607_v54, %v3402_v19  ;;  %v4626_v35 = vsel %vm1617_vm3, %v1608_v37, %v3403_v24  ;;  %v2982_v54 = vld [vmem:[%s3888_s30 + $0x109] sm:$0xff]  ;;  %v2983_v37 = vld [vmem:[%s3888_s30 + $0x111] sm:$0xff]  ;;  %v3584_v24 = vpack.i.bf16 %v4208_v32, %v2951_v0 }
 0x110   : > { %v1620_v26 = vsel %vm1617_vm3, %v4500_v58, %v3352_v46  ;;  %v1621_v55 = vsel %vm1617_vm3, %v4504_v10, %v3353_v41  ;;  %v4634_v16 = vsel %vm1617_vm3, %v4373_v51, %v3347_v18  ;;  %v4638_v63 = vsel %vm1617_vm3, %v4376_v48, %v3348_v14  ;;  %v3014_v32 = vld [vmem:[%s3888_s30 + $0x10a] sm:$0xff] }
 0x111   : > { %v3594_v28 = vpack.i.bf16 %v2983_v37, %v2982_v54  ;;  %v2991_v41 = vld [vmem:[%s3888_s30 + $0x171] sm:$0xff]  ;;  %v3609_v18 = vpack.i.bf16 %v3023_v33, %v3022_v11 }
 0x112   : > { %3580 = vrot.lane.b32.xlu2 %v3579_v47, %s3833_s11  ;;  %v2990_v47 = vld [vmem:[%s3888_s30 + $0x169] sm:$0xff] }
 0x113   : > { %3575 = vrot.lane.b32.xlu1 %v3574_v22, %s3833_s11  ;;  %3570 = vrot.lane.b32.xlu0 %v3569_v59, %s3832_s10 }
 0x114   : > { %v3416_v58 = vpop.permute.xlu2 %3415 }
 0x115   : > { %v3418_v10 = vunpack.i.h.bf16 %v3416_v58  ;;  %v3417_v40 = vunpack.i.l.bf16 %v3416_v58  ;;  %v3366_v45 = vpop.permute.xlu1 %3365  ;;  %v3361_v51 = vpop.permute.xlu0 %3360 }
 0x116   : > { %v3368_v48 = vunpack.i.h.bf16 %v3366_v45  ;;  %v3367_v44 = vunpack.i.l.bf16 %v3366_v45  ;;  %v3363_v3 = vunpack.i.h.bf16 %v3361_v51  ;;  %v3362_v42 = vunpack.i.l.bf16 %v3361_v51 }
 0x117   : > { %v4648_v56 = vsel %vm1617_vm3, %v1613_v7, %v3417_v40  ;;  %v4651_v1 = vsel %vm1617_vm3, %v1614_v21, %v3418_v10  ;;  %v3599_v10 = vpack.i.bf16 %v2991_v41, %v2990_v47 }
 0x118   : > { %v1626_v19 = vsel %vm1617_vm3, %v4524_v43, %v3367_v44  ;;  %v1627_v9 = vsel %vm1617_vm3, %v4528_v2, %v3368_v48  ;;  %v4661_v7 = vsel %vm1617_vm3, %v4401_v60, %v3362_v42  ;;  %v4665_v21 = vsel %vm1617_vm3, %v4404_v61, %v3363_v3  ;;  %v3015_v2 = vld [vmem:[%s3888_s30 + $0x112] sm:$0xff] }
 0x119   : > { %v3604_v0 = vpack.i.bf16 %v3015_v2, %v3014_v32  ;;  %v2975_v44 = vld [vmem:[%s3888_s30 + $0xb1] sm:$0xff] }
 0x11a   : > { %3595 = vrot.lane.b32.xlu2 %v3594_v28, %s3832_s10  ;;  %v2999_v28 = vld [vmem:[%s3888_s30 + $0x52] sm:$0xff] }
 0x11b   : > { %3590 = vrot.lane.b32.xlu1 %v3589_v52, %s3831_s9  ;;  %3585 = vrot.lane.b32.xlu0 %v3584_v24, %s3831_s9  ;;  %v2967_v3 = vld [vmem:[%s3888_s30 + $0x51] sm:$0xff] }
 0x11c   : > { %v3431_v43 = vpop.permute.xlu2 %3430 }
 0x11d   : > { %v3433_v60 = vunpack.i.h.bf16 %v3431_v43  ;;  %v3432_v46 = vunpack.i.l.bf16 %v3431_v43  ;;  %v3381_v14 = vpop.permute.xlu1 %3380  ;;  %v3376_v61 = vpop.permute.xlu0 %3375 }
 0x11e   : > { %v3383_v22 = vunpack.i.h.bf16 %v3381_v14  ;;  %v3382_v59 = vunpack.i.l.bf16 %v3381_v14  ;;  %v3378_v54 = vunpack.i.h.bf16 %v3376_v61  ;;  %v3377_v37 = vunpack.i.l.bf16 %v3376_v61 }
 0x11f   : > { %v4677_v58 = vsel %vm1650_vm4, %v1620_v26, %v3432_v46  ;;  %v4680_v27 = vsel %vm1650_vm4, %v1621_v55, %v3433_v60  ;;  %v2998_v55 = vld [vmem:[%s3888_s30 + $0x4a] sm:$0xff] }
 0x120   : > { %v1632_v40 = vsel %vm1617_vm3, %v4552_v57, %v3382_v59  ;;  %v1633_v45 = vsel %vm1617_vm3, %v4556_v30, %v3383_v22  ;;  %v4688_v51 = vsel %vm1617_vm3, %v4432_v8, %v3377_v37  ;;  %v4692_v26 = vsel %vm1617_vm3, %v4435_v23, %v3378_v54  ;;  %v2974_v57 = vld [vmem:[%s3888_s30 + $0xa9] sm:$0xff]  ;;  %v3007_v54 = vld [vmem:[%s3888_s30 + $0xb2] sm:$0xff] }
 0x121   : > { %v2966_v30 = vld [vmem:[%s3888_s30 + $0x49] sm:$0xff]  ;;  %v3624_v23 = vpack.i.bf16 %v2999_v28, %v2998_v55  ;;  %v3619_v41 = vpack.i.bf16 %v2975_v44, %v2974_v57 }
 0x122   : > { %3610 = vrot.lane.b32.xlu2 %v3609_v18, %s3833_s11  ;;  %v3614_v60 = vpack.i.bf16 %v2967_v3, %v2966_v30  ;;  %v2961_v18 = vld [vmem:[%s3888_s30 + $0x188] sm:$0xff] }
 0x123   : > { %3605 = vrot.lane.b32.xlu1 %v3604_v0, %s3833_s11  ;;  %3600 = vrot.lane.b32.xlu0 %v3599_v10, %s3832_s10  ;;  %v2953_v59 = vld [vmem:[%s3888_s30 + $0x128] sm:$0xff] }
 0x124   : > { %v3446_v48 = vpop.permute.xlu2 %3445 }
 0x125   : > { %v3448_v42 = vunpack.i.h.bf16 %v3446_v48  ;;  %v3447_v8 = vunpack.i.l.bf16 %v3446_v48  ;;  %v3396_v52 = vpop.permute.xlu1 %3395  ;;  %v3391_v24 = vpop.permute.xlu0 %3390 }
 0x126   : > { %v3398_v11 = vunpack.i.h.bf16 %v3396_v52  ;;  %v3397_v33 = vunpack.i.l.bf16 %v3396_v52  ;;  %v3393_v32 = vunpack.i.h.bf16 %v3391_v24  ;;  %v3392_v43 = vunpack.i.l.bf16 %v3391_v24 }
 0x127   : > { %v4704_v2 = vsel %vm1650_vm4, %v1626_v19, %v3447_v8  ;;  %v4707_v47 = vsel %vm1650_vm4, %v1627_v9, %v3448_v42  ;;  %v2960_v9 = vld [vmem:[%s3888_s30 + $0x180] sm:$0xff] }
 0x128   : > { %v1638_v46 = vsel %vm1617_vm3, %v4580_v17, %v3397_v33  ;;  %v1639_v14 = vsel %vm1617_vm3, %v4584_v6, %v3398_v11  ;;  %v4715_v61 = vsel %vm1617_vm3, %v4465_v36, %v3392_v43  ;;  %v4719_v19 = vsel %vm1617_vm3, %v4468_v53, %v3393_v32  ;;  %v2952_v17 = vld [vmem:[%s3888_s30 + $0x120] sm:$0xff]  ;;  %v3006_v6 = vld [vmem:[%s3888_s30 + $0xaa] sm:$0xff] }
 0x129   : > { %v3639_v53 = vpack.i.bf16 %v2961_v18, %v2960_v9  ;;  %v3634_v3 = vpack.i.bf16 %v2953_v59, %v2952_v17  ;;  %v3629_v42 = vpack.i.bf16 %v3007_v54, %v3006_v6  ;;  %v2984_v11 = vld [vmem:[%s3888_s30 + $0x121] sm:$0xff] }
 0x12a   : > { %3625 = vrot.lane.b32.xlu2 %v3624_v23, %s3833_s11  ;;  %v3017_v23 = vld [vmem:[%s3888_s30 + $0x12a] sm:$0xff] }
 0x12b   : > { %3620 = vrot.lane.b32.xlu1 %v3619_v41, %s3832_s10  ;;  %3615 = vrot.lane.b32.xlu0 %v3614_v60, %s3832_s10 }
 0x12c   : > { %v3461_v22 = vpop.permute.xlu2 %3460 }
 0x12d   : > { %v3463_v37 = vunpack.i.h.bf16 %v3461_v22  ;;  %v3462_v36 = vunpack.i.l.bf16 %v3461_v22  ;;  %v3411_v0 = vpop.permute.xlu1 %3410  ;;  %v3406_v10 = vpop.permute.xlu0 %3405 }
 0x12e   : > { %v3413_v55 = vunpack.i.h.bf16 %v3411_v0  ;;  %v3412_v28 = vunpack.i.l.bf16 %v3411_v0  ;;  %v3408_v57 = vunpack.i.h.bf16 %v3406_v10  ;;  %v3407_v48 = vunpack.i.l.bf16 %v3406_v10 }
 0x12f   : > { %v4731_v44 = vsel %vm1650_vm4, %v1632_v40, %v3462_v36  ;;  %v4734_v30 = vsel %vm1650_vm4, %v1633_v45, %v3463_v37  ;;  %v3016_v45 = vld [vmem:[%s3888_s30 + $0x122] sm:$0xff] }
 0x130   : > { %v4738_v8 = vsel %vm1617_vm3, %v4607_v62, %v3412_v28  ;;  %v4742_v52 = vsel %vm1617_vm3, %v4611_v15, %v3413_v55  ;;  %v4746_v24 = vsel %vm1617_vm3, %v4487_v31, %v3407_v48  ;;  %v4750_v40 = vsel %vm1617_vm3, %v4490_v38, %v3408_v57  ;;  %v2985_v15 = vld [vmem:[%s3888_s30 + $0x129] sm:$0xff] }
 0x131   : > { %v3654_v41 = vpack.i.bf16 %v3017_v23, %v3016_v45  ;;  %v3644_v59 = vpack.i.bf16 %v2985_v15, %v2984_v11  ;;  %v2969_v36 = vld [vmem:[%s3888_s30 + $0x69] sm:$0xff] }
 0x132   : > { %3640 = vrot.lane.b32.xlu2 %v3639_v53, %s3831_s9  ;;  %v3008_v23 = vld [vmem:[%s3888_s30 + $0xc2] sm:$0xff] }
 0x133   : > { %3635 = vrot.lane.b32.xlu1 %v3634_v3, %s3831_s9  ;;  %3630 = vrot.lane.b32.xlu0 %v3629_v42, %s3833_s11  ;;  %v2977_v15 = vld [vmem:[%s3888_s30 + $0xc9] sm:$0xff] }
 0x134   : > { %v3476_v62 = vpop.permute.xlu2 %3475 }
 0x135   : > { %v3478_v33 = vunpack.i.h.bf16 %v3476_v62  ;;  %v3477_v32 = vunpack.i.l.bf16 %v3476_v62  ;;  %v3426_v31 = vpop.permute.xlu1 %3425  ;;  %v3421_v43 = vpop.permute.xlu0 %3420  ;;  %v3009_v62 = vld [vmem:[%s3888_s30 + $0xca] sm:$0xff] }
 0x136   : > { %v3428_v38 = vunpack.i.h.bf16 %v3426_v31  ;;  %v3427_v60 = vunpack.i.l.bf16 %v3426_v31  ;;  %v3423_v9 = vunpack.i.h.bf16 %v3421_v43  ;;  %v3422_v18 = vunpack.i.l.bf16 %v3421_v43 }
 0x137   : > { %v4760_v17 = vsel %vm1650_vm4, %v1638_v46, %v3477_v32  ;;  %v4763_v22 = vsel %vm1650_vm4, %v1639_v14, %v3478_v33  ;;  %v2968_v14 = vld [vmem:[%s3888_s30 + $0x61] sm:$0xff] }
 0x138   : > { %v4767_v6 = vsel %vm1650_vm4, %v4634_v16, %v3427_v60  ;;  %v4771_v54 = vsel %vm1650_vm4, %v4638_v63, %v3428_v38  ;;  %v4775_v37 = vsel %vm1617_vm3, %v4513_v4, %v3422_v18  ;;  %v4779_v46 = vsel %vm1617_vm3, %v4516_v5, %v3423_v9  ;;  %v2944_v63 = vld [vmem:[%s3888_s30 + $0xc0] sm:$0xff]  ;;  %v2945_v4 = vld [vmem:[%s3888_s30 + $0xc8] sm:$0xff] }
 0x139   : > { %v3669_v5 = vpack.i.bf16 %v2969_v36, %v2968_v14  ;;  %v2962_v36 = vld [vmem:[%s3888_s30 + $0x198] sm:$0xff]  ;;  %vm2680_vm3 = vcmask 1047559  }
 0x13a   : > { %3655 = vrot.lane.b32.xlu2 %v3654_v41, %s3833_s11 }
 0x13b   : > { %3650 = vrot.lane.b32.xlu1 %v4348_v13, %s3832_s10  ;;  %3645 = vrot.lane.b32.xlu0 %v3644_v59, %s3832_s10  ;;  %v3664_v13 = vpack.i.bf16 %v2945_v4, %v2944_v63  ;;  %v2987_v63 = vld [vmem:[%s3888_s30 + $0x141] sm:$0xff] }
 0x13c   : > { %v4787_v16 = vpop.permute.xlu2 %3490 }
 0x13d   : > { %v3441_v0 = vpop.permute.xlu1 %3440  ;;  %v3436_v10 = vpop.permute.xlu0 %3435 }
 0x13e   : > { %v3443_v53 = vunpack.i.h.bf16 %v3441_v0  ;;  %v3442_v55 = vunpack.i.l.bf16 %v3441_v0  ;;  %v3438_v28 = vunpack.i.h.bf16 %v3436_v10  ;;  %v3437_v57 = vunpack.i.l.bf16 %v3436_v10  ;;  %v2954_v0 = vld [vmem:[%s3888_s30 + $0x138] sm:$0xff]  ;;  %v2955_v10 = vld [vmem:[%s3888_s30 + $0x140] sm:$0xff] }
 0x140   : > { %v1657_v48 = vsel %vm1650_vm4, %v4661_v7, %v3442_v55  ;;  %v1658_v3 = vsel %vm1650_vm4, %v4665_v21, %v3443_v53  ;;  %v4797_v42 = vsel %vm1650_vm4, %v4539_v25, %v3437_v57  ;;  %v4801_v45 = vsel %vm1650_vm4, %v4542_v34, %v3438_v28  ;;  %v3000_v7 = vld [vmem:[%s3888_s30 + $0x62] sm:$0xff]  ;;  %v3001_v21 = vld [vmem:[%s3888_s30 + $0x6a] sm:$0xff] }
 0x141   : > { %v2976_v25 = vld [vmem:[%s3888_s30 + $0xc1] sm:$0xff]  ;;  %v3684_v34 = vpack.i.bf16 %v3009_v62, %v3008_v23 }
 0x142   : > { %3670 = vrot.lane.b32.xlu2 %v3669_v5, %s3832_s10  ;;  %v3674_v60 = vpack.i.bf16 %v2977_v15, %v2976_v25  ;;  %v3018_v15 = vld [vmem:[%s3888_s30 + $0x13a] sm:$0xff] }
 0x143   : > { %3665 = vrot.lane.b32.xlu1 %v3664_v13, %s3831_s9  ;;  %3660 = vrot.lane.b32.xlu0 %v4492_v39, %s3833_s11  ;;  %v3679_v39 = vpack.i.bf16 %v3001_v21, %v3000_v7  ;;  %v3689_v7 = vpack.i.bf16 %v2955_v10, %v2954_v0  ;;  %v3834_v0 = vmov 65535  }
 0x144   : > { %v4810_v11 = vpop.permute.xlu2 %3505  ;;  %v1868_v10 = vsel %vm1866_vm6, 4294967295, %v3834_v0 }
 0x145   : > { %v3456_v33 = vpop.permute.xlu1 %3455  ;;  %v3451_v32 = vpop.permute.xlu0 %3450 }
 0x146   : > { %v3458_v31 = vunpack.i.h.bf16 %v3456_v33  ;;  %v3457_v43 = vunpack.i.l.bf16 %v3456_v33  ;;  %v3453_v41 = vunpack.i.h.bf16 %v3451_v32  ;;  %v3452_v38 = vunpack.i.l.bf16 %v3451_v32  ;;  %v3019_v32 = vld [vmem:[%s3888_s30 + $0x142] sm:$0xff] }
 0x148   : > { %v4817_v9 = vsel %vm1650_vm4, %v4688_v51, %v3457_v43  ;;  %v4821_v18 = vsel %vm1650_vm4, %v4692_v26, %v3458_v31  ;;  %v4825_v59 = vsel %vm1650_vm4, %v4567_v12, %v3452_v38  ;;  %v4829_v14 = vsel %vm1650_vm4, %v4570_v49, %v3453_v41  ;;  %v2986_v51 = vld [vmem:[%s3888_s30 + $0x139] sm:$0xff]  ;;  %v2995_v31 = vld [vmem:[%s3888_s30 + $0x1a1] sm:$0xff] }
 0x149   : > { %v2963_v26 = vld [vmem:[%s3888_s30 + $0x1a0] sm:$0xff]  ;;  %v3699_v57 = vpack.i.bf16 %v2987_v63, %v2986_v51  ;;  %v3056_v51 = vld [vmem:[#allocation2 + $0x8] sm:$0x30] }
 0x14a   : > { %3685 = vrot.lane.b32.xlu2 %v3684_v34, %s3833_s11  ;;  %v3694_v62 = vpack.i.bf16 %v2963_v26, %v2962_v36  ;;  %v2994_v34 = vld [vmem:[%s3888_s30 + $0x199] sm:$0xff]  ;;  %v3034_v36 = vld [vmem:[#allocation2 + $0x8] sm:$0xf] }
 0x14b   : > { %3680 = vrot.lane.b32.xlu1 %v3679_v39, %s3833_s11  ;;  %3675 = vrot.lane.b32.xlu0 %v3674_v60, %s3832_s10  ;;  %v3709_v39 = vpack.i.bf16 %v3019_v32, %v3018_v15  ;;  %v3704_v60 = vpack.i.bf16 %v2995_v31, %v2994_v34  ;;  %v3035_v26 = vor.u32 %v3056_v51, %v3034_v36  ;;  %v3002_v51 = vld [vmem:[%s3888_s30 + $0x7a] sm:$0xff] }
 0x14c   : > { %v3521_v4 = vpop.permute.xlu2 %3520 }
 0x14d   : > { %v3523_v12 = vunpack.i.h.bf16 %v3521_v4  ;;  %v3522_v5 = vunpack.i.l.bf16 %v3521_v4  ;;  %v3471_v53 = vpop.permute.xlu1 %3470  ;;  %v4840_v49 = vpop.permute.xlu0 %3465 }
 0x14e   : > { %v3473_v55 = vunpack.i.h.bf16 %v3471_v53  ;;  %v3472_v28 = vunpack.i.l.bf16 %v3471_v53  ;;  %v2979_v53 = vld [vmem:[%s3888_s30 + $0xe1] sm:$0xff] }
 0x14f   : > { %v4843_v13 = vsel %vm1683_vm5, %v1657_v48, %v3522_v5  ;;  %v4846_v23 = vsel %vm1683_vm5, %v1658_v3, %v3523_v12  ;;  %v3026_v48 = vld [vmem:[%s3888_s30 + $0x19a] sm:$0xff]  ;;  %v3027_v3 = vld [vmem:[%s3888_s30 + $0x1a2] sm:$0xff]  ;;  %v1869_v12 = vsel %vm1867_vm7, %v1868_v10, 0 }
 0x150   : > { %v4850_v21 = vsel %vm1650_vm4, %v4715_v61, %v3472_v28  ;;  %v4854_v25 = vsel %vm1650_vm4, %v4719_v19, %v3473_v55  ;;  %v3714_v38 = vpack.i.bf16 %v3027_v3, %v3026_v48  ;;  %v2978_v5 = vld [vmem:[%s3888_s30 + $0xd9] sm:$0xff]  ;;  %v1871_v55 = vand.u32 %v3035_v26, %v1869_v12  ;;  %v2971_v28 = vld [vmem:[%s3888_s30 + $0x81] sm:$0xff] }
 0x151   : > { %v3729_v15 = vpack.i.bf16 %v2979_v53, %v2978_v5  ;;  %v3003_v26 = vld [vmem:[%s3888_s30 + $0x82] sm:$0xff] }
 0x152   : > { %3700 = vrot.lane.b32.xlu2 %v3699_v57, %s3832_s10  ;;  %v2946_v57 = vld [vmem:[%s3888_s30 + $0xd8] sm:$0xff]  ;;  %3058 = vmatpush.bf16.msra.mxu2 %v1871_v55  ;;  %v3734_v5 = vpack.i.bf16 %v3003_v26, %v3002_v51 }
 0x153   : > { %3695 = vrot.lane.b32.xlu1 %v3694_v62, %s3831_s9  ;;  %3690 = vrot.lane.b32.xlu0 %v3689_v7, %s3831_s9  ;;  %v2947_v62 = vld [vmem:[%s3888_s30 + $0xe0] sm:$0xff] }
 0x154   : > { %v4862_v33 = vpop.permute.xlu2 %3535  ;;  %3059 = vmatpush.bf16.msra.mxu3 %v1871_v55  ;;  %1879 = vmatpush.bf16.msra.mxu0 %v1871_v55 }
 0x155   : > { %v4867_v61 = vpop.permute.xlu1 %3485  ;;  %v3481_v43 = vpop.permute.xlu0 %3480  ;;  %3057 = vmatpush.bf16.msra.mxu1 %v1871_v55 }
 0x156   : > { %v3483_v41 = vunpack.i.h.bf16 %v3481_v43  ;;  %v3482_v19 = vunpack.i.l.bf16 %v3481_v43  ;;  %v3055_v43 = vld [vmem:[#allocation2] sm:$0xff] }
 0x157   : > { %3061 = vmatpush.bf16.msra.mxu2 %v3055_v43 }
 0x158   : > { %v4871_v63 = vsel %vm1650_vm4, %v4623_v50, %v3482_v19  ;;  %v4875_v4 = vsel %vm1650_vm4, %v4626_v35, %v3483_v41  ;;  %v2970_v50 = vld [vmem:[%s3888_s30 + $0x79] sm:$0xff]  ;;  %v3719_v19 = vpack.i.bf16 %v2947_v62, %v2946_v57  ;;  %3062 = vmatpush.bf16.msra.mxu3 %v3055_v43  ;;  %1880 = vmatpush.bf16.msra.mxu0 %v3055_v43 }
 0x159   : > { %v3724_v41 = vpack.i.bf16 %v2971_v28, %v2970_v50  ;;  %3060 = vmatpush.bf16.msra.mxu1 %v3055_v43 }
 0x15a   : > { %3715 = vrot.lane.b32.xlu2 %v3714_v38, %s3833_s11 }
 0x15b   : > { %3710 = vrot.lane.b32.xlu1 %v3709_v39, %s3833_s11  ;;  %3705 = vrot.lane.b32.xlu0 %v3704_v60, %s3832_s10 }
 0x15c   : > { %v4886_v48 = vpop.permute.xlu2 %3550 }
 0x15d   : > { %v3501_v35 = vpop.permute.xlu1 %3500  ;;  %v3496_v7 = vpop.permute.xlu0 %3495 }
 0x15e   : > { %v3503_v3 = vunpack.i.h.bf16 %v3501_v35  ;;  %v3502_v32 = vunpack.i.l.bf16 %v3501_v35  ;;  %v3498_v34 = vunpack.i.h.bf16 %v3496_v7  ;;  %v3497_v31 = vunpack.i.l.bf16 %v3496_v7 }
 0x15f   : > { %v3487_v35 = vunpack.i.l.bf16 %v4867_v61 }
 0x160   : > { %v4890_v38 = vsel %vm1650_vm4, %v4775_v37, %v3502_v32  ;;  %v4894_v39 = vsel %vm1650_vm4, %v4779_v46, %v3503_v3  ;;  %v4898_v60 = vsel %vm1650_vm4, %v4648_v56, %v3497_v31  ;;  %v4902_v36 = vsel %vm1650_vm4, %v4651_v1, %v3498_v34  ;;  %v3010_v37 = vld [vmem:[%s3888_s30 + $0xda] sm:$0xff]  ;;  %v3011_v46 = vld [vmem:[%s3888_s30 + $0xe2] sm:$0xff] }
 0x161   : > { %v3739_v12 = vpack.i.bf16 %v3011_v46, %v3010_v37  ;;  %v3467_v3 = vunpack.i.l.bf16 %v4840_v49  ;;  %v3538_v32 = vunpack.i.h.bf16 %v4862_v33  ;;  %v3537_v31 = vunpack.i.l.bf16 %v4862_v33 }
 0x162   : > { %3730 = vrot.lane.b32.xlu2 %v3729_v15, %s3832_s10  ;;  %v1675_v43 = vsel %vm1650_vm4, %v4746_v24, %v3487_v35  ;;  %v3553_v37 = vunpack.i.h.bf16 %v4886_v48 }
 0x163   : > { %3725 = vrot.lane.b32.xlu1 %v3724_v41, %s3832_s10  ;;  %3720 = vrot.lane.b32.xlu0 %v3719_v19, %s3831_s9  ;;  %v3552_v41 = vunpack.i.l.bf16 %v4886_v48  ;;  %v1667_v51 = vsel %vm1650_vm4, %v4596_v29, %v3467_v3  ;;  %v1708_v24 = vsel %vm1683_vm5, %v1675_v43, %v3538_v32  ;;  %v3508_v43 = vunpack.i.h.bf16 %v4810_v11 }
 0x164   : > { %v4913_v53 = vpop.permute.xlu2 %3565 }
 0x165   : > { %v3516_v56 = vpop.permute.xlu1 %3515  ;;  %v4911_v0 = vpop.permute.xlu0 %3510 }
 0x166   : > { %v3518_v10 = vunpack.i.h.bf16 %v3516_v56  ;;  %v3517_v1 = vunpack.i.l.bf16 %v3516_v56 }
 0x168   : > { %v4917_v50 = vsel %vm1683_vm5, %v4797_v42, %v3517_v1  ;;  %v4921_v55 = vsel %vm1683_vm5, %v4801_v45, %v3518_v10  ;;  %v3488_v42 = vunpack.i.h.bf16 %v4867_v61  ;;  %v3468_v45 = vunpack.i.h.bf16 %v4840_v49 }
 0x16a   : > { %v1676_v61 = vsel %vm1650_vm4, %v4750_v40, %v3488_v42  ;;  %v1668_v33 = vsel %vm1650_vm4, %v4599_v20, %v3468_v45  ;;  %v1741_v40 = vsel %vm1716_vm8, %v1708_v24, %v3552_v41  ;;  %v3507_v41 = vunpack.i.l.bf16 %v4810_v11 }
 0x16b   : > { %3740 = vrot.lane.b32.xlu1 %v3739_v12, %s3833_s11  ;;  %3735 = vrot.lane.b32.xlu0 %v3734_v5, %s3833_s11  ;;  %v1701_v10 = vsel %vm1683_vm5, %v1668_v33, %v3537_v31  ;;  %v1685_v11 = vsel %vm1683_vm5, %v4771_v54, %v3508_v43 }
 0x16c   : > { %v4929_v62 = vpop.permute.xlu2 %3580  ;;  %v1684_v33 = vsel %vm1683_vm5, %v4767_v6, %v3507_v41  ;;  %v3493_v41 = vunpack.i.h.bf16 %v4787_v16 }
 0x16d   : > { %v4925_v28 = vpop.permute.xlu1 %3530  ;;  %v4927_v57 = vpop.permute.xlu0 %3525  ;;  %v3583_v24 = vunpack.i.h.bf16 %v4929_v62 }
 0x16e   : > { %v3533_v19 = vunpack.i.h.bf16 %v4925_v28 }
 0x170   : > { %v1700_v48 = vsel %vm1683_vm5, %v1667_v51, %v3533_v19  ;;  %v3527_v51 = vunpack.i.l.bf16 %v4927_v57 }
 0x172   : > { %v1692_v6 = vsel %vm1683_vm5, %v4704_v2, %v3527_v51 }
 0x174   : > { %v4952_v26 = vpop.permute.xlu2 %3595 }
 0x175   : > { %v3546_v7 = vpop.permute.xlu1 %3545  ;;  %v4932_v15 = vpop.permute.xlu0 %3540 }
 0x176   : > { %v3542_v34 = vunpack.i.l.bf16 %v4932_v15  ;;  %v3548_v49 = vunpack.i.h.bf16 %v3546_v7  ;;  %v3547_v46 = vunpack.i.l.bf16 %v3546_v7 }
 0x178   : > { %v1709_v56 = vsel %vm1683_vm5, %v1676_v61, %v3542_v34  ;;  %v1733_v20 = vsel %vm1716_vm8, %v1700_v48, %v3547_v46  ;;  %v1734_v42 = vsel %vm1716_vm8, %v1701_v10, %v3548_v49  ;;  %v3568_v46 = vunpack.i.h.bf16 %v4913_v53 }
 0x179   : > { %v1742_v45 = vsel %vm1716_vm8, %v1709_v56, %v3553_v37  ;;  %v3567_v49 = vunpack.i.l.bf16 %v4913_v53  ;;  %v3528_v37 = vunpack.i.h.bf16 %v4927_v57  ;;  %v3582_v56 = vunpack.i.l.bf16 %v4929_v62 }
 0x17b   : > { %v1693_v54 = vsel %vm1683_vm5, %v4707_v47, %v3528_v37 }
 0x17d   : > { %v3561_v1 = vpop.permute.xlu1 %3560  ;;  %v3556_v12 = vpop.permute.xlu0 %3555 }
 0x17e   : > { %v3563_v5 = vunpack.i.h.bf16 %v3561_v1  ;;  %v3562_v29 = vunpack.i.l.bf16 %v3561_v1  ;;  %v3558_v35 = vunpack.i.h.bf16 %v3556_v12  ;;  %v3557_v7 = vunpack.i.l.bf16 %v3556_v12 }
 0x180   : > { %v1766_v3 = vsel %vm1749_vm9, %v1733_v20, %v3557_v7  ;;  %v1767_v32 = vsel %vm1749_vm9, %v1734_v42, %v3558_v35  ;;  %v1774_v34 = vsel %vm1749_vm9, %v1741_v40, %v3562_v29  ;;  %v1775_v31 = vsel %vm1749_vm9, %v1742_v45, %v3563_v5  ;;  %v3611_v40 = vpop.permute.xlu2 %3610 }
 0x181   : > { %v1790_v19 = vpack.c.bf16 %v1767_v32, %v1766_v3  ;;  %v1794_v61 = vpack.c.bf16 %v1775_v31, %v1774_v34  ;;  %v1717_v5 = vsel %vm1716_vm8, %v1684_v33, %v3567_v49  ;;  %v1718_v29 = vsel %vm1716_vm8, %v1685_v11, %v3568_v46 }
 0x182   : > { %v3543_v34 = vunpack.i.h.bf16 %v4932_v15  ;;  %v3597_v46 = vunpack.i.l.bf16 %v4952_v26  ;;  %v1678_v11 = vsel %vm1650_vm4, %v4742_v52, %v3493_v41 }
 0x183   : > { %3044 = vmatmul.msk.bf16.vlgmr.msra.gmra.mxu2 %vm1817_vm10, %v1790_v19  ;;  %3048 = vmatmul.msk.bf16.vlgmr.msra.gmra.mxu3 %vm1817_vm10, %v1794_v61  ;;  %v3492_v19 = vunpack.i.l.bf16 %v4787_v16  ;;  %v3598_v61 = vunpack.i.h.bf16 %v4952_v26  ;;  %v3613_v16 = vunpack.i.h.bf16 %v3611_v40 }
 0x184   : > { %v1702_v51 = vsel %vm1683_vm5, %v4850_v21, %v3543_v34 }
 0x185   : > { %v3576_v10 = vpop.permute.xlu1 %3575  ;;  %v3571_v53 = vpop.permute.xlu0 %3570  ;;  %v1677_v15 = vsel %vm1650_vm4, %v4738_v8, %v3492_v19 }
 0x186   : > { %v3578_v48 = vunpack.i.h.bf16 %v3576_v10  ;;  %v3577_v1 = vunpack.i.l.bf16 %v3576_v10  ;;  %v3573_v57 = vunpack.i.h.bf16 %v3571_v53  ;;  %v3572_v12 = vunpack.i.l.bf16 %v3571_v53 }
 0x188   : > { %v1725_v35 = vsel %vm1716_vm8, %v1692_v6, %v3572_v12  ;;  %v1726_v62 = vsel %vm1716_vm8, %v1693_v54, %v3573_v57  ;;  %v1750_v7 = vsel %vm1749_vm9, %v1717_v5, %v3577_v1  ;;  %v1751_v20 = vsel %vm1749_vm9, %v1718_v29, %v3578_v48  ;;  %v3626_v31 = vpop.permute.xlu2 %3625 }
 0x189   : > { %v1782_v42 = vpack.c.bf16 %v1751_v20, %v1750_v7  ;;  %v1758_v45 = vsel %vm1749_vm9, %v1725_v35, %v3582_v56  ;;  %v1759_v3 = vsel %vm1749_vm9, %v1726_v62, %v3583_v24  ;;  %v3612_v24 = vunpack.i.l.bf16 %v3611_v40 }
 0x18a   : > { %v1786_v32 = vpack.c.bf16 %v1759_v3, %v1758_v45  ;;  %v3513_v7 = vunpack.i.h.bf16 %v4911_v0  ;;  %v3512_v20 = vunpack.i.l.bf16 %v4911_v0  ;;  %v3627_v45 = vunpack.i.l.bf16 %v3626_v31 }
 0x18b   : > { %3036 = vmatmul.msk.bf16.vlgmr.msra.gmra.mxu0 %vm1817_vm10, %v1782_v42  ;;  %v3628_v42 = vunpack.i.h.bf16 %v3626_v31  ;;  %v3532_v31 = vunpack.i.l.bf16 %v4925_v28 }
 0x18c   : > { %3040 = vmatmul.msk.bf16.vlgmr.msra.gmra.mxu1 %vm1817_vm10, %v1786_v32  ;;  %v1687_v41 = vsel %vm1683_vm5, %v4680_v27, %v3513_v7 }
 0x18d   : > { %v4993_v2 = vpop.permute.xlu1 %3590  ;;  %v3586_v47 = vpop.permute.xlu0 %3585 }
 0x18e   : > { %v3587_v43 = vunpack.i.l.bf16 %v3586_v47  ;;  %v3592_v49 = vunpack.i.l.bf16 %v4993_v2  ;;  %v3588_v37 = vunpack.i.h.bf16 %v3586_v47 }
 0x190   : > { %v1703_v33 = vsel %vm1683_vm5, %v4854_v25, %v3587_v43  ;;  %v1711_v57 = vsel %vm1683_vm5, %v1678_v11, %v3592_v49  ;;  %v1710_v21 = vsel %vm1683_vm5, %v1677_v15, %v3588_v37  ;;  %v1735_v25 = vsel %vm1716_vm8, %v1702_v51, %v3597_v46  ;;  %v5019_v35 = vpop.permute.xlu2 %3640 }
 0x191   : > { %v1736_v12 = vsel %vm1716_vm8, %v1703_v33, %v3598_v61  ;;  %v1686_v43 = vsel %vm1683_vm5, %v4677_v58, %v3512_v20  ;;  %v3593_v49 = vunpack.i.h.bf16 %v4993_v2  ;;  %v1694_v11 = vsel %vm1683_vm5, %v4825_v59, %v3532_v31 }
 0x192   : > { %v3642_v7 = vunpack.i.l.bf16 %v5019_v35 }
 0x195   : > { %v3606_v56 = vpop.permute.xlu1 %3605  ;;  %v3601_v10 = vpop.permute.xlu0 %3600 }
 0x196   : > { %v3608_v26 = vunpack.i.h.bf16 %v3606_v56  ;;  %v3607_v53 = vunpack.i.l.bf16 %v3606_v56  ;;  %v3603_v48 = vunpack.i.h.bf16 %v3601_v10  ;;  %v3602_v1 = vunpack.i.l.bf16 %v3601_v10 }
 0x198   : > { %v1743_v8 = vsel %vm1716_vm8, %v1710_v21, %v3602_v1  ;;  %v1744_v52 = vsel %vm1716_vm8, %v1711_v57, %v3603_v48  ;;  %v1768_v40 = vsel %vm1749_vm9, %v1735_v25, %v3607_v53  ;;  %v1769_v5 = vsel %vm1749_vm9, %v1736_v12, %v3608_v26  ;;  %v3656_v15 = vpop.permute.xlu2 %3655 }
 0x199   : > { %v1791_v29 = vpack.c.bf16 %v1769_v5, %v1768_v40  ;;  %v1776_v6 = vsel %vm1749_vm9, %v1743_v8, %v3612_v24  ;;  %v1777_v54 = vsel %vm1749_vm9, %v1744_v52, %v3613_v16  ;;  %v1695_v16 = vsel %vm1683_vm5, %v4829_v14, %v3593_v49 }
 0x19a   : > { %v1795_v62 = vpack.c.bf16 %v1777_v54, %v1776_v6  ;;  %v3658_v57 = vunpack.i.h.bf16 %v3656_v15  ;;  %v3657_v59 = vunpack.i.l.bf16 %v3656_v15 }
 0x19b   : > { %3045 = vmatmul.msk.bf16.gmra.mxu2 %vm1817_vm10, %v1791_v29 }
 0x19c   : > { %3049 = vmatmul.msk.bf16.gmra.mxu3 %vm1817_vm10, %v1795_v62  ;;  %v3643_v62 = vunpack.i.h.bf16 %v5019_v35 }
 0x19d   : > { %v3621_v3 = vpop.permute.xlu1 %3620  ;;  %v3616_v32 = vpop.permute.xlu0 %3615 }
 0x19e   : > { %v3618_v47 = vunpack.i.h.bf16 %v3616_v32  ;;  %v3617_v34 = vunpack.i.l.bf16 %v3616_v32  ;;  %v3623_v51 = vunpack.i.h.bf16 %v3621_v3  ;;  %v3622_v33 = vunpack.i.l.bf16 %v3621_v3 }
 0x19f   : > { %v1713_v32 = vsel %vm1683_vm5, %v4902_v36, %v3643_v62 }
 0x1a0   : > { %v1719_v19 = vsel %vm1716_vm8, %v1686_v43, %v3617_v34  ;;  %v1720_v0 = vsel %vm1716_vm8, %v1687_v41, %v3618_v47  ;;  %v1727_v28 = vsel %vm1716_vm8, %v1694_v11, %v3622_v33  ;;  %v1728_v2 = vsel %vm1716_vm8, %v1695_v16, %v3623_v51  ;;  %v3671_v14 = vpop.permute.xlu2 %3670 }
 0x1a1   : > { %v1752_v61 = vsel %vm1749_vm9, %v1719_v19, %v3627_v45  ;;  %v1753_v46 = vsel %vm1749_vm9, %v1720_v0, %v3628_v42  ;;  %v3672_v31 = vunpack.i.l.bf16 %v3671_v14 }
 0x1a2   : > { %v1783_v37 = vpack.c.bf16 %v1753_v46, %v1752_v61  ;;  %v3673_v46 = vunpack.i.h.bf16 %v3671_v14 }
 0x1a3   : > { %v1721_v16 = vsel %vm1716_vm8, %v4917_v50, %v3672_v31 }
 0x1a4   : > { %3037 = vmatmul.msk.bf16.gmra.mxu0 %vm1817_vm10, %v1783_v37 }
 0x1a5   : > { %v3636_v58 = vpop.permute.xlu1 %3635  ;;  %v3631_v27 = vpop.permute.xlu0 %3630 }
 0x1a6   : > { %v3633_v24 = vunpack.i.h.bf16 %v3631_v27  ;;  %v3632_v56 = vunpack.i.l.bf16 %v3631_v27  ;;  %v3638_v48 = vunpack.i.h.bf16 %v3636_v58  ;;  %v3637_v1 = vunpack.i.l.bf16 %v3636_v58 }
 0x1a8   : > { %v1760_v10 = vsel %vm1749_vm9, %v1727_v28, %v3632_v56  ;;  %v1761_v26 = vsel %vm1749_vm9, %v1728_v2, %v3633_v24  ;;  %v1704_v52 = vsel %vm1683_vm5, %v4760_v17, %v3637_v1  ;;  %v1705_v40 = vsel %vm1683_vm5, %v4763_v22, %v3638_v48  ;;  %v3686_v43 = vpop.permute.xlu2 %3685 }
 0x1a9   : > { %v1787_v53 = vpack.c.bf16 %v1761_v26, %v1760_v10  ;;  %v1712_v22 = vsel %vm1683_vm5, %v4898_v60, %v3642_v7  ;;  %v3688_v51 = vunpack.i.h.bf16 %v3686_v43  ;;  %v3687_v33 = vunpack.i.l.bf16 %v3686_v43 }
 0x1aa   : > { %v1722_v24 = vsel %vm1716_vm8, %v4921_v55, %v3673_v46 }
 0x1ab   : > { %3041 = vmatmul.msk.bf16.gmra.mxu1 %vm1817_vm10, %v1787_v53 }
 0x1ad   : > { %v3651_v21 = vpop.permute.xlu1 %3650  ;;  %v3646_v25 = vpop.permute.xlu0 %3645 }
 0x1ae   : > { %v3648_v12 = vunpack.i.h.bf16 %v3646_v25  ;;  %v3647_v8 = vunpack.i.l.bf16 %v3646_v25  ;;  %v3653_v42 = vunpack.i.h.bf16 %v3651_v21  ;;  %v3652_v45 = vunpack.i.l.bf16 %v3651_v21 }
 0x1b0   : > { %v1737_v5 = vsel %vm1716_vm8, %v1704_v52, %v3647_v8  ;;  %v1738_v29 = vsel %vm1716_vm8, %v1705_v40, %v3648_v12  ;;  %v1745_v41 = vsel %vm1716_vm8, %v1712_v22, %v3652_v45  ;;  %v1746_v35 = vsel %vm1716_vm8, %v1713_v32, %v3653_v42  ;;  %v3701_v48 = vpop.permute.xlu2 %3700 }
 0x1b1   : > { %v1770_v6 = vsel %vm1749_vm9, %v1737_v5, %v3657_v59  ;;  %v1771_v54 = vsel %vm1749_vm9, %v1738_v29, %v3658_v57  ;;  %v3703_v8 = vunpack.i.h.bf16 %v3701_v48  ;;  %v3702_v52 = vunpack.i.l.bf16 %v3701_v48 }
 0x1b2   : > { %v1792_v20 = vpack.c.bf16 %v1771_v54, %v1770_v6 }
 0x1b4   : > { %3046 = vmatmul.msk.bf16.gmra.mxu2 %vm1817_vm10, %v1792_v20 }
 0x1b5   : > { %v3666_v17 = vpop.permute.xlu1 %3665  ;;  %v3661_v3 = vpop.permute.xlu0 %3660 }
 0x1b6   : > { %v3663_v47 = vunpack.i.h.bf16 %v3661_v3  ;;  %v3662_v34 = vunpack.i.l.bf16 %v3661_v3  ;;  %v3668_v49 = vunpack.i.h.bf16 %v3666_v17  ;;  %v3667_v37 = vunpack.i.l.bf16 %v3666_v17 }
 0x1b8   : > { %v1778_v19 = vsel %vm1749_vm9, %v1745_v41, %v3662_v34  ;;  %v1779_v0 = vsel %vm1749_vm9, %v1746_v35, %v3663_v47  ;;  %v1696_v56 = vsel %vm1683_vm5, %v4817_v9, %v3667_v37  ;;  %v1697_v28 = vsel %vm1683_vm5, %v4821_v18, %v3668_v49  ;;  %v3716_v25 = vpop.permute.xlu2 %3715 }
 0x1b9   : > { %v1796_v61 = vpack.c.bf16 %v1779_v0, %v1778_v19  ;;  %v3718_v54 = vunpack.i.h.bf16 %v3716_v25  ;;  %v3717_v62 = vunpack.i.l.bf16 %v3716_v25 }
 0x1bb   : > { %3050 = vmatmul.msk.bf16.gmra.mxu3 %vm1817_vm10, %v1796_v61 }
 0x1bd   : > { %v3681_v60 = vpop.permute.xlu1 %3680  ;;  %v3676_v36 = vpop.permute.xlu0 %3675 }
 0x1be   : > { %v3683_v15 = vunpack.i.h.bf16 %v3681_v60  ;;  %v3682_v58 = vunpack.i.l.bf16 %v3681_v60  ;;  %v3678_v27 = vunpack.i.h.bf16 %v3676_v36  ;;  %v3677_v11 = vunpack.i.l.bf16 %v3676_v36 }
 0x1c0   : > { %v1729_v2 = vsel %vm1716_vm8, %v1696_v56, %v3677_v11  ;;  %v1730_v10 = vsel %vm1716_vm8, %v1697_v28, %v3678_v27  ;;  %v1754_v26 = vsel %vm1749_vm9, %v1721_v16, %v3682_v58  ;;  %v1755_v53 = vsel %vm1749_vm9, %v1722_v24, %v3683_v15  ;;  %v3731_v46 = vpop.permute.xlu2 %3730 }
 0x1c1   : > { %v1784_v1 = vpack.c.bf16 %v1755_v53, %v1754_v26  ;;  %v1762_v50 = vsel %vm1749_vm9, %v1729_v2, %v3687_v33  ;;  %v1763_v55 = vsel %vm1749_vm9, %v1730_v10, %v3688_v51  ;;  %v3733_v37 = vunpack.i.h.bf16 %v3731_v46 }
 0x1c2   : > { %v1788_v57 = vpack.c.bf16 %v1763_v55, %v1762_v50  ;;  %v3732_v60 = vunpack.i.l.bf16 %v3731_v46  ;;  %v5115_v50 = vld [vmem:[#allocation4] ss:$0 sm:$0xff] }
 0x1c3   : > { %3038 = vmatmul.msk.bf16.gmra.mxu0 %vm1817_vm10, %v1784_v1 }
 0x1c4   : > { %3042 = vmatmul.msk.bf16.gmra.mxu1 %vm1817_vm10, %v1788_v57 }
 0x1c5   : > { %v3696_v9 = vpop.permute.xlu1 %3695  ;;  %v3691_v18 = vpop.permute.xlu0 %3690 }
 0x1c6   : > { %v3693_v59 = vunpack.i.h.bf16 %v3691_v18  ;;  %v3692_v21 = vunpack.i.l.bf16 %v3691_v18  ;;  %v3698_v14 = vunpack.i.h.bf16 %v3696_v9  ;;  %v3697_v12 = vunpack.i.l.bf16 %v3696_v9 }
 0x1c8   : > { %v1706_v40 = vsel %vm1683_vm5, %v4871_v63, %v3692_v21  ;;  %v1707_v5 = vsel %vm1683_vm5, %v4875_v4, %v3693_v59  ;;  %v1714_v17 = vsel %vm1683_vm5, %v4890_v38, %v3697_v12  ;;  %v1715_v3 = vsel %vm1683_vm5, %v4894_v39, %v3698_v14 }
 0x1c9   : > { %v1739_v22 = vsel %vm1716_vm8, %v1706_v40, %v3702_v52  ;;  %v1740_v63 = vsel %vm1716_vm8, %v1707_v5, %v3703_v8 }
 0x1cd   : > { %v3711_v29 = vpop.permute.xlu1 %3710  ;;  %v3706_v6 = vpop.permute.xlu0 %3705 }
 0x1ce   : > { %v3713_v7 = vunpack.i.h.bf16 %v3711_v29  ;;  %v3712_v20 = vunpack.i.l.bf16 %v3711_v29  ;;  %v3708_v42 = vunpack.i.h.bf16 %v3706_v6  ;;  %v3707_v45 = vunpack.i.l.bf16 %v3706_v6 }
 0x1d0   : > { %v1747_v4 = vsel %vm1716_vm8, %v1714_v17, %v3707_v45  ;;  %v1748_v32 = vsel %vm1716_vm8, %v1715_v3, %v3708_v42  ;;  %v1772_v47 = vsel %vm1749_vm9, %v1739_v22, %v3712_v20  ;;  %v1773_v34 = vsel %vm1749_vm9, %v1740_v63, %v3713_v7 }
 0x1d1   : > { %v1793_v43 = vpack.c.bf16 %v1773_v34, %v1772_v47  ;;  %v1780_v41 = vsel %vm1749_vm9, %v1747_v4, %v3717_v62  ;;  %v1781_v38 = vsel %vm1749_vm9, %v1748_v32, %v3718_v54 }
 0x1d2   : > { %v1797_v35 = vpack.c.bf16 %v1781_v38, %v1780_v41 }
 0x1d3   : > { %3047 = vmatmul.msk.bf16.gmra.mxu2 %vm1817_vm10, %v1793_v43 }
 0x1d4   : > { %3051 = vmatmul.msk.bf16.gmra.mxu3 %vm1817_vm10, %v1797_v35 }
 0x1d5   : > { %v3726_v39 = vpop.permute.xlu1 %3725  ;;  %v3721_v19 = vpop.permute.xlu0 %3720 }
 0x1d6   : > { %v3723_v0 = vunpack.i.h.bf16 %v3721_v19  ;;  %v3722_v61 = vunpack.i.l.bf16 %v3721_v19  ;;  %v3728_v31 = vunpack.i.h.bf16 %v3726_v39  ;;  %v3727_v49 = vunpack.i.l.bf16 %v3726_v39 }
 0x1d8   : > { %v1698_v36 = vsel %vm1683_vm5, %v4731_v44, %v3722_v61  ;;  %v1699_v51 = vsel %vm1683_vm5, %v4734_v30, %v3723_v0  ;;  %v1723_v24 = vsel %vm1716_vm8, %v4843_v13, %v3727_v49  ;;  %v1724_v56 = vsel %vm1716_vm8, %v4846_v23, %v3728_v31 }
 0x1d9   : > { %v1731_v28 = vsel %vm1716_vm8, %v1698_v36, %v3732_v60  ;;  %v1732_v2 = vsel %vm1716_vm8, %v1699_v51, %v3733_v37 }
 0x1dd   : > { %v3741_v33 = vpop.permute.xlu1 %3740  ;;  %v3736_v15 = vpop.permute.xlu0 %3735 }
 0x1de   : > { %v3743_v58 = vunpack.i.h.bf16 %v3741_v33  ;;  %v3742_v27 = vunpack.i.l.bf16 %v3741_v33  ;;  %v3738_v11 = vunpack.i.h.bf16 %v3736_v15  ;;  %v3737_v16 = vunpack.i.l.bf16 %v3736_v15 }
 0x1e0   : > { %v1756_v44 = vsel %vm1749_vm9, %v1723_v24, %v3737_v16  ;;  %v1757_v30 = vsel %vm1749_vm9, %v1724_v56, %v3738_v11  ;;  %v1764_v10 = vsel %vm1749_vm9, %v1731_v28, %v3742_v27  ;;  %v1765_v26 = vsel %vm1749_vm9, %v1732_v2, %v3743_v58 }
 0x1e1   : > { %v1785_v53 = vpack.c.bf16 %v1757_v30, %v1756_v44  ;;  %v1789_v48 = vpack.c.bf16 %v1765_v26, %v1764_v10 }
 0x1e3   : > { %3039 = vmatmul.msk.bf16.gmra.mxu0 %vm1817_vm10, %v1785_v53  ;;  %3043 = vmatmul.msk.bf16.gmra.mxu1 %vm1817_vm10, %v1789_v48 }
 0x206   : > { %v1922_v13 = vpop.f32.mrf.mxu2  ;;  %v1942_v23 = vpop.f32.mrf.mxu3 }
 0x207   : > { %v1923_v59 = vadd.f32 %v5115_v50, %v1922_v13  ;;  %v1943_v21 = vadd.f32 %v5115_v50, %v1942_v23 }
 0x208   : > { %v1882_v1 = vpop.f32.mrf.mxu0 }
 0x209   : > { %v1902_v57 = vpop.f32.mrf.mxu1  ;;  %v1883_v25 = vadd.f32 %v5115_v50, %v1882_v1  ;;  %v1978_v52 = vmax.f32 %v1923_v59, 0.0  ;;  %v1986_v5 = vmax.f32 %v1943_v21, 0.0 }
 0x20a   : > { %v1903_v14 = vadd.f32 %v5115_v50, %v1902_v57 }
 0x20b   : > { %v1962_v29 = vmax.f32 %v1883_v25, 0.0  ;;  %v2019_v22 = vsel %vm1994_vm11, %v1978_v52, -inf  ;;  %v2031_v32 = vsel %vm1994_vm11, %v1986_v5, -inf }
 0x20c   : > { %v1970_v6 = vmax.f32 %v1903_v14, 0.0 }
 0x20d   : > { %v5131_v47 = vsel %vm1994_vm11, %v1962_v29, -inf }
 0x20e   : > { %v1924_v55 = vpop.f32.mrf.mxu2  ;;  %v1944_v9 = vpop.f32.mrf.mxu3  ;;  %v5134_v34 = vsel %vm1994_vm11, %v1970_v6, -inf }
 0x20f   : > { %v1925_v12 = vadd.f32 %v5115_v50, %v1924_v55  ;;  %v1945_v8 = vadd.f32 %v5115_v50, %v1944_v9 }
 0x210   : > { %v1884_v18 = vpop.f32.mrf.mxu0 }
 0x211   : > { %v1979_v20 = vmax.f32 %v1925_v12, 0.0  ;;  %v1987_v42 = vmax.f32 %v1945_v8, 0.0  ;;  %v1904_v45 = vpop.f32.mrf.mxu1  ;;  %v5138_v41 = vadd.f32 %v5115_v50, %v1884_v18 }
 0x212   : > { %v5141_v38 = vadd.f32 %v5115_v50, %v1904_v45 }
 0x213   : > { %v5145_v19 = vsel %vm1994_vm11, %v1979_v20, -inf  ;;  %v5148_v0 = vsel %vm1994_vm11, %v1987_v42, -inf  ;;  %v1963_v42 = vmax.f32 %v5138_v41, 0.0 }
 0x21e   : > { %v1927_v40 = vpop.f32.mrf.mxu2 }
 0x21f   : > { %v1928_v54 = vadd.f32 %v5115_v50, %v1927_v40  ;;  %v1947_v62 = vpop.f32.mrf.mxu3 }
 0x220   : > { %v1948_v7 = vadd.f32 %v5115_v50, %v1947_v62 }
 0x221   : > { %v1980_v17 = vmax.f32 %v1928_v54, 0.0  ;;  %v1887_v3 = vpop.f32.mrf.mxu0 }
 0x222   : > { %v1988_v63 = vmax.f32 %v1948_v7, 0.0  ;;  %v5127_v4 = vadd.f32 %v5115_v50, %v1887_v3  ;;  %v1971_v3 = vmax.f32 %v5141_v38, 0.0 }
 0x223   : > { %v2020_v43 = vsel %vm1994_vm11, %v1980_v17, -inf }
 0x224   : > { %v2021_v35 = vmax.f32 %v2019_v22, %v2020_v43  ;;  %v2032_v39 = vsel %vm1994_vm11, %v1988_v63, -inf  ;;  %v1964_v46 = vmax.f32 %v5127_v4, 0.0 }
 0x225   : > { %v2033_v61 = vmax.f32 %v2031_v32, %v2032_v39 }
 0x226   : > { %v2083_v31 = vrot.slane %v2021_v35, 2  ;;  %v2084_v49 = vrot.slane %v2021_v35, 4  ;;  %v2085_v37 = vrot.slane %v2021_v35, 6  ;;  %v2380_v60 = vsel %vm2155_vm12, %v2021_v35, -inf  ;;  %v1929_v32 = vpop.f32.mrf.mxu2 }
 0x227   : > { %v2381_v36 = vrot.slane %v2380_v60, 4  ;;  %v2095_v51 = vrot.slane %v2033_v61, 2  ;;  %v2096_v33 = vrot.slane %v2033_v61, 4  ;;  %v2097_v15 = vrot.slane %v2033_v61, 6 }
 0x228   : > { %v2387_v58 = vsel %vm2155_vm12, %v2083_v31, -inf  ;;  %v2394_v27 = vsel %vm2155_vm12, %v2084_v49, -inf  ;;  %v2401_v11 = vsel %vm2155_vm12, %v2085_v37, -inf  ;;  %v2492_v16 = vsel %vm2155_vm12, %v2033_v61, -inf }
 0x229   : > { %v2382_v24 = vmax.f32 %v2380_v60, %v2381_v36  ;;  %v2388_v56 = vrot.slane %v2387_v58, 4  ;;  %v2395_v28 = vrot.slane %v2394_v27, 4  ;;  %v2402_v2 = vrot.slane %v2401_v11, 4 }
 0x22a   : > { %v2493_v44 = vrot.slane %v2492_v16, 4  ;;  %v2499_v30 = vsel %vm2155_vm12, %v2095_v51, -inf  ;;  %v2506_v10 = vsel %vm2155_vm12, %v2096_v33, -inf  ;;  %v2513_v26 = vsel %vm2155_vm12, %v2097_v15, -inf }
 0x22b   : > { %v2383_v53 = vrot.slane %v2382_v24, 2  ;;  %v2389_v48 = vmax.f32 %v2387_v58, %v2388_v56  ;;  %v2396_v13 = vmax.f32 %v2394_v27, %v2395_v28  ;;  %v2403_v23 = vmax.f32 %v2401_v11, %v2402_v2 }
 0x22c   : > { %v2494_v1 = vmax.f32 %v2492_v16, %v2493_v44  ;;  %v2500_v55 = vrot.slane %v2499_v30, 4  ;;  %v2507_v57 = vrot.slane %v2506_v10, 4  ;;  %v2514_v9 = vrot.slane %v2513_v26, 4 }
 0x22d   : > { %v2384_v18 = vmax.f32 %v2382_v24, %v2383_v53  ;;  %v2390_v59 = vrot.slane %v2389_v48, 2  ;;  %v2397_v21 = vrot.slane %v2396_v13, 2  ;;  %v2404_v25 = vrot.slane %v2403_v23, 2 }
 0x22e   : > { %v2495_v14 = vrot.slane %v2494_v1, 2  ;;  %v2501_v12 = vmax.f32 %v2499_v30, %v2500_v55  ;;  %v2508_v8 = vmax.f32 %v2506_v10, %v2507_v57  ;;  %v2515_v52 = vmax.f32 %v2513_v26, %v2514_v9 }
 0x22f   : > { %v2385_v40 = vrot.slane %v2384_v18, 1  ;;  %v2391_v5 = vmax.f32 %v2389_v48, %v2390_v59  ;;  %v2398_v29 = vmax.f32 %v2396_v13, %v2397_v21  ;;  %v2405_v6 = vmax.f32 %v2403_v23, %v2404_v25  ;;  %v1949_v23 = vpop.f32.mrf.mxu3 }
 0x230   : > { %v2496_v54 = vmax.f32 %v2494_v1, %v2495_v14  ;;  %v2502_v62 = vrot.slane %v2501_v12, 2  ;;  %v2509_v7 = vrot.slane %v2508_v8, 2  ;;  %v2516_v20 = vrot.slane %v2515_v52, 2 }
 0x231   : > { %v2392_v45 = vrot.slane %v2391_v5, 1  ;;  %v2399_v17 = vrot.slane %v2398_v29, 1  ;;  %v2406_v22 = vrot.slane %v2405_v6, 1  ;;  %v2386_v43 = vmax.f32 %v2384_v18, %v2385_v40 }
 0x232   : > { %v2503_v63 = vmax.f32 %v2501_v12, %v2502_v62  ;;  %v2510_v4 = vmax.f32 %v2508_v8, %v2509_v7  ;;  %v2517_v39 = vmax.f32 %v2515_v52, %v2516_v20  ;;  %v1996_v61 = vsel %vm1994_vm11, %v1964_v46, -inf }
 0x233   : > { %v2393_v35 = vmax.f32 %v2391_v5, %v2392_v45  ;;  %v2400_v31 = vmax.f32 %v2398_v29, %v2399_v17  ;;  %v2497_v49 = vrot.slane %v2496_v54, 1  ;;  %v1997_v36 = vmax.f32 %v5131_v47, %v1996_v61 }
 0x234   : > { %v2504_v37 = vrot.slane %v2503_v63, 1  ;;  %v2511_v60 = vrot.slane %v2510_v4, 1  ;;  %v1930_v51 = vadd.f32 %v5115_v50, %v1929_v32  ;;  %v5166_v33 = vsel %vm1994_vm11, %v1963_v42, -inf }
 0x235   : > { %v2703_v41 = vsel %vm2668_vm13, %v2393_v35, %v2386_v43  ;;  %v2407_v15 = vmax.f32 %v2405_v6, %v2406_v22  ;;  %v2518_v27 = vrot.slane %v2517_v39, 1  ;;  %v2059_v11 = vrot.slane %v1997_v36, 2 }
 0x236   : > { %v2505_v58 = vmax.f32 %v2503_v63, %v2504_v37  ;;  %v2060_v46 = vrot.slane %v1997_v36, 4  ;;  %v2061_v16 = vrot.slane %v1997_v36, 6  ;;  %v2704_v24 = vsel %vm2670_vm14, %v2400_v31, %v2703_v41 }
 0x237   : > { %v2498_v56 = vmax.f32 %v2496_v54, %v2497_v49  ;;  %v2156_v28 = vsel %vm2155_vm12, %v1997_v36, -inf  ;;  %v1981_v2 = vmax.f32 %v1930_v51, 0.0  ;;  %v2512_v44 = vmax.f32 %v2510_v4, %v2511_v60  ;;  %v1907_v54 = vpop.f32.mrf.mxu1 }
 0x238   : > { %v2157_v47 = vrot.slane %v2156_v28, 4  ;;  %v2163_v30 = vsel %vm2155_vm12, %v2059_v11, -inf  ;;  %v2170_v10 = vsel %vm2155_vm12, %v2060_v46, -inf  ;;  %v2177_v13 = vsel %vm2155_vm12, %v2061_v16, -inf }
 0x239   : > { %v2717_v26 = vsel %vm2668_vm13, %v2505_v58, %v2498_v56  ;;  %v2164_v53 = vrot.slane %v2163_v30, 4  ;;  %v2171_v48 = vrot.slane %v2170_v10, 4  ;;  %v2519_v1 = vmax.f32 %v2517_v39, %v2518_v27 }
 0x23a   : > { %v2158_v55 = vmax.f32 %v2156_v28, %v2157_v47  ;;  %v2178_v57 = vrot.slane %v2177_v13, 4  ;;  %v2023_v9 = vsel %vm1994_vm11, %v1981_v2, -inf  ;;  %v5176_v18 = vsel %vm2672_vm15, %v2407_v15, %v2704_v24  ;;  %v1889_v2 = vpop.f32.mrf.mxu0 }
 0x23b   : > { %v2165_v59 = vmax.f32 %v2163_v30, %v2164_v53  ;;  %v2172_v21 = vmax.f32 %v2170_v10, %v2171_v48  ;;  %v2024_v25 = vmax.f32 %v5145_v19, %v2023_v9  ;;  %v2718_v14 = vsel %vm2670_vm14, %v2512_v44, %v2717_v26 }
 0x23c   : > { %v2159_v12 = vrot.slane %v2158_v55, 2  ;;  %v2179_v8 = vmax.f32 %v2177_v13, %v2178_v57  ;;  %v1950_v52 = vadd.f32 %v5115_v50, %v1949_v23  ;;  %v1908_v43 = vadd.f32 %v5115_v50, %v1907_v54 }
 0x23d   : > { %v2166_v40 = vrot.slane %v2165_v59, 2  ;;  %v2173_v5 = vrot.slane %v2172_v21, 2  ;;  %v2086_v29 = vrot.slane %v2024_v25, 2  ;;  %v2087_v6 = vrot.slane %v2024_v25, 4 }
 0x23e   : > { %v2160_v62 = vmax.f32 %v2158_v55, %v2159_v12  ;;  %v2180_v7 = vrot.slane %v2179_v8, 2  ;;  %v2088_v20 = vrot.slane %v2024_v25, 6  ;;  %v2408_v42 = vsel %vm2155_vm12, %v2024_v25, -inf }
 0x23f   : > { %v2167_v45 = vmax.f32 %v2165_v59, %v2166_v40  ;;  %v2174_v17 = vmax.f32 %v2172_v21, %v2173_v5  ;;  %v2409_v22 = vrot.slane %v2408_v42, 4  ;;  %v2415_v19 = vsel %vm2155_vm12, %v2086_v29, -inf }
 0x240   : > { %v2161_v63 = vrot.slane %v2160_v62, 1  ;;  %v2416_v4 = vrot.slane %v2415_v19, 4  ;;  %v2422_v32 = vsel %vm2155_vm12, %v2087_v6, -inf  ;;  %v5185_v39 = vmax.f32 %v2179_v8, %v2180_v7 }
 0x241   : > { %v2168_v35 = vrot.slane %v2167_v45, 1  ;;  %v2410_v61 = vmax.f32 %v2408_v42, %v2409_v22  ;;  %v2423_v31 = vrot.slane %v2422_v32, 4  ;;  %v5188_v49 = vsel %vm2672_vm15, %v2519_v1, %v2718_v14 }
 0x242   : > { %v2175_v37 = vrot.slane %v2174_v17, 1  ;;  %v2417_v41 = vmax.f32 %v2415_v19, %v2416_v4  ;;  %v2429_v60 = vsel %vm2155_vm12, %v2088_v20, -inf  ;;  %v2162_v58 = vmax.f32 %v2160_v62, %v2161_v63  ;;  %v1909_v20 = vpop.f32.mrf.mxu1 }
 0x243   : > { %v2169_v36 = vmax.f32 %v2167_v45, %v2168_v35  ;;  %v2411_v51 = vrot.slane %v2410_v61, 2  ;;  %v2424_v15 = vmax.f32 %v2422_v32, %v2423_v31  ;;  %v2430_v11 = vrot.slane %v2429_v60, 4 }
 0x244   : > { %v2418_v27 = vrot.slane %v2417_v41, 2  ;;  %v1989_v46 = vmax.f32 %v1950_v52, 0.0  ;;  %v2182_v16 = vrot.slane %v5185_v39, 1  ;;  %v1972_v28 = vmax.f32 %v1908_v43, 0.0 }
 0x245   : > { %v2412_v24 = vmax.f32 %v2410_v61, %v2411_v51  ;;  %v2425_v56 = vrot.slane %v2424_v15, 2  ;;  %v5192_v44 = vmax.f32 %v2174_v17, %v2175_v37  ;;  %v2431_v30 = vmax.f32 %v2429_v60, %v2430_v11 }
 0x246   : > { %v2419_v47 = vmax.f32 %v2417_v41, %v2418_v27  ;;  %v2035_v10 = vsel %vm1994_vm11, %v1989_v46, -inf  ;;  %v5196_v26 = vsel %vm2668_vm13, %v2169_v36, %v2162_v58  ;;  %v2008_v55 = vsel %vm1994_vm11, %v1972_v28, -inf }
 0x247   : > { %v2413_v53 = vrot.slane %v2412_v24, 1  ;;  %v2426_v48 = vmax.f32 %v2424_v15, %v2425_v56  ;;  %v2036_v13 = vmax.f32 %v5148_v0, %v2035_v10  ;;  %v2432_v1 = vrot.slane %v2431_v30, 2 }
 0x248   : > { %v2420_v23 = vrot.slane %v2419_v47, 1  ;;  %v5201_v57 = vadd.f32 %v5115_v50, %v1889_v2  ;;  %v2009_v4 = vmax.f32 %v5134_v34, %v2008_v55  ;;  %v5220_v61 = vadd.f32 %v5115_v50, %v1909_v20 }
 0x249   : > { %v2414_v9 = vmax.f32 %v2412_v24, %v2413_v53  ;;  %v2427_v59 = vrot.slane %v2426_v48, 1  ;;  %v2098_v21 = vrot.slane %v2036_v13, 2  ;;  %v2099_v25 = vrot.slane %v2036_v13, 4 }
 0x24a   : > { %v2421_v14 = vmax.f32 %v2419_v47, %v2420_v23  ;;  %v2433_v12 = vmax.f32 %v2431_v30, %v2432_v1  ;;  %v2100_v8 = vrot.slane %v2036_v13, 6  ;;  %v2520_v52 = vsel %vm2155_vm12, %v2036_v13, -inf }
 0x24b   : > { %v2428_v40 = vmax.f32 %v2426_v48, %v2427_v59  ;;  %v2706_v0 = vsel %vm2674_vm0, %v2414_v9, %v5176_v18  ;;  %v2521_v5 = vrot.slane %v2520_v52, 4  ;;  %v2527_v29 = vsel %vm2155_vm12, %v2098_v21, -inf  ;;  %v1932_v21 = vpop.f32.mrf.mxu2 }
 0x24c   : > { %v2434_v6 = vrot.slane %v2433_v12, 1  ;;  %v2707_v54 = vsel %vm2676_vm1, %v2421_v14, %v2706_v0  ;;  %v2528_v62 = vrot.slane %v2527_v29, 4  ;;  %v2534_v7 = vsel %vm2155_vm12, %v2099_v25, -inf }
 0x24d   : > { %v2708_v42 = vsel %vm2678_vm2, %v2428_v40, %v2707_v54  ;;  %v2522_v45 = vmax.f32 %v2520_v52, %v2521_v5  ;;  %v2535_v17 = vrot.slane %v2534_v7, 4  ;;  %v2541_v22 = vsel %vm2155_vm12, %v2100_v8, -inf  ;;  %v5231_v52 = vpop.f32.mrf.mxu3 }
 0x24e   : > { %v2435_v18 = vmax.f32 %v2433_v12, %v2434_v6  ;;  %v2529_v19 = vmax.f32 %v2527_v29, %v2528_v62  ;;  %v2542_v63 = vrot.slane %v2541_v22, 4  ;;  %v1965_v35 = vmax.f32 %v5201_v57, 0.0 }
 0x24f   : > { %v2523_v32 = vrot.slane %v2522_v45, 2  ;;  %v2536_v43 = vmax.f32 %v2534_v7, %v2535_v17  ;;  %v2071_v60 = vrot.slane %v2009_v4, 2  ;;  %v2072_v15 = vrot.slane %v2009_v4, 4 }
 0x250   : > { %v2709_v31 = vsel %vm2680_vm3, %v2435_v18, %v2708_v42  ;;  %v2530_v37 = vrot.slane %v2529_v19, 2  ;;  %v2543_v41 = vmax.f32 %v2541_v22, %v2542_v63  ;;  %v2073_v58 = vrot.slane %v2009_v4, 6 }
 0x251   : > { %2743 = vst.msk [vmem:[%s5215_s16 + $0x20] sm:$0xff] %vm1994_vm11, %v2709_v31  ;;  %v2524_v36 = vmax.f32 %v2522_v45, %v2523_v32  ;;  %v2537_v51 = vrot.slane %v2536_v43, 2  ;;  %v2268_v11 = vsel %vm2155_vm12, %v2009_v4, -inf  ;;  %v2275_v46 = vsel %vm2155_vm12, %v2071_v60, -inf }
 0x252   : > { %v2531_v27 = vmax.f32 %v2529_v19, %v2530_v37  ;;  %v2544_v34 = vrot.slane %v2543_v41, 2  ;;  %v2269_v28 = vrot.slane %v2268_v11, 4  ;;  %v2276_v2 = vrot.slane %v2275_v46, 4 }
 0x253   : > { %v2525_v24 = vrot.slane %v2524_v36, 1  ;;  %v2538_v56 = vmax.f32 %v2536_v43, %v2537_v51  ;;  %v2282_v10 = vsel %vm2155_vm12, %v2072_v15, -inf  ;;  %v2289_v53 = vsel %vm2155_vm12, %v2073_v58, -inf }
 0x254   : > { %v2532_v47 = vrot.slane %v2531_v27, 1  ;;  %v2545_v30 = vmax.f32 %v2543_v41, %v2544_v34  ;;  %v2270_v23 = vmax.f32 %v2268_v11, %v2269_v28  ;;  %v2277_v1 = vmax.f32 %v2275_v46, %v2276_v2 }
 0x255   : > { %v2526_v48 = vmax.f32 %v2524_v36, %v2525_v24  ;;  %v2539_v13 = vrot.slane %v2538_v56, 1  ;;  %v2283_v9 = vrot.slane %v2282_v10, 4  ;;  %v2290_v59 = vrot.slane %v2289_v53, 4  ;;  %v5259_v24 = vpop.f32.mrf.mxu3 }
 0x256   : > { %v2533_v55 = vmax.f32 %v2531_v27, %v2532_v47  ;;  %v2546_v57 = vrot.slane %v2545_v30, 1  ;;  %v2271_v12 = vrot.slane %v2270_v23, 2  ;;  %v2278_v8 = vrot.slane %v2277_v1, 2  ;;  %v1934_v27 = vpop.f32.mrf.mxu2 }
 0x257   : > { %v2540_v25 = vmax.f32 %v2538_v56, %v2539_v13  ;;  %v2720_v14 = vsel %vm2674_vm0, %v2526_v48, %v5188_v49  ;;  %v2284_v5 = vmax.f32 %v2282_v10, %v2283_v9  ;;  %v2291_v29 = vmax.f32 %v2289_v53, %v2290_v59  ;;  %v1892_v13 = vpop.f32.mrf.mxu0  ;;  %v1912_v9 = vpop.f32.mrf.mxu1 }
 0x258   : > { %v2547_v40 = vmax.f32 %v2545_v30, %v2546_v57  ;;  %v2721_v0 = vsel %vm2676_vm1, %v2533_v55, %v2720_v14  ;;  %v2272_v54 = vmax.f32 %v2270_v23, %v2271_v12  ;;  %v2279_v62 = vmax.f32 %v2277_v1, %v2278_v8 }
 0x259   : > { %v2722_v6 = vsel %vm2678_vm2, %v2540_v25, %v2721_v0  ;;  %v1999_v7 = vsel %vm1994_vm11, %v1965_v35, -inf  ;;  %v2010_v49 = vsel %vm1994_vm11, %v1971_v3, -inf  ;;  %v2285_v42 = vrot.slane %v2284_v5, 2 }
 0x25a   : > { %v2723_v20 = vsel %vm2680_vm3, %v2547_v40, %v2722_v6  ;;  %v2000_v45 = vmax.f32 %v5166_v33, %v1999_v7  ;;  %v2183_v17 = vmax.f32 %v5185_v39, %v2182_v16  ;;  %v2273_v22 = vrot.slane %v2272_v54, 1 }
 0x25b   : > { %2745 = vst.msk [vmem:[%s5215_s16 + $0x30] sm:$0xff] %vm1994_vm11, %v2723_v20  ;;  %v2280_v18 = vrot.slane %v2279_v62, 1  ;;  %v2292_v19 = vrot.slane %v2291_v29, 2  ;;  %v2671_v38 = vsel %vm2670_vm14, %v5192_v44, %v5196_v26  ;;  %v2286_v63 = vmax.f32 %v2284_v5, %v2285_v42 }
 0x25c   : > { %v2062_v3 = vrot.slane %v2000_v45, 2  ;;  %v2063_v4 = vrot.slane %v2000_v45, 4  ;;  %v2064_v43 = vrot.slane %v2000_v45, 6  ;;  %v2184_v33 = vsel %vm2155_vm12, %v2000_v45, -inf }
 0x25d   : > { %v2281_v32 = vmax.f32 %v2279_v62, %v2280_v18  ;;  %v1973_v35 = vmax.f32 %v5220_v61, 0.0  ;;  %v2274_v31 = vmax.f32 %v2272_v54, %v2273_v22  ;;  %v2287_v39 = vrot.slane %v2286_v63, 1 }
 0x25e   : > { %v2185_v16 = vrot.slane %v2184_v33, 4  ;;  %v2191_v37 = vsel %vm2155_vm12, %v2062_v3, -inf  ;;  %v5252_v41 = vmax.f32 %v2291_v29, %v2292_v19  ;;  %v2198_v36 = vsel %vm2155_vm12, %v2063_v4, -inf  ;;  %v1937_v42 = vpop.f32.mrf.mxu2  ;;  %v1957_v19 = vpop.f32.mrf.mxu3 }
 0x25f   : > { %v2192_v60 = vrot.slane %v2191_v37, 4  ;;  %v2205_v44 = vsel %vm2155_vm12, %v2064_v43, -inf  ;;  %v2288_v26 = vmax.f32 %v2286_v63, %v2287_v39  ;;  %v2689_v51 = vsel %vm2668_vm13, %v2281_v32, %v2274_v31 }
 0x260   : > { %v2186_v15 = vmax.f32 %v2184_v33, %v2185_v16  ;;  %v2199_v58 = vrot.slane %v2198_v36, 4  ;;  %v2673_v61 = vsel %vm2672_vm15, %v2183_v17, %v2671_v38  ;;  %v2206_v11 = vrot.slane %v2205_v44, 4 }
 0x261   : > { %v2193_v34 = vmax.f32 %v2191_v37, %v2192_v60  ;;  %v2011_v46 = vsel %vm1994_vm11, %v1973_v35, -inf  ;;  %v5262_v47 = vadd.f32 %v5115_v50, %v1932_v21  ;;  %v2294_v30 = vrot.slane %v5252_v41, 1 }
 0x262   : > { %v2187_v56 = vrot.slane %v2186_v15, 2  ;;  %v2200_v28 = vmax.f32 %v2198_v36, %v2199_v58  ;;  %v2012_v2 = vmax.f32 %v2010_v49, %v2011_v46  ;;  %v2690_v10 = vsel %vm2670_vm14, %v2288_v26, %v2689_v51  ;;  %v1894_v51 = vpop.f32.mrf.mxu0 }
 0x263   : > { %v2194_v53 = vrot.slane %v2193_v34, 2  ;;  %v2207_v48 = vmax.f32 %v2205_v44, %v2206_v11  ;;  %v1953_v37 = vadd.f32 %v5115_v50, %v5231_v52  ;;  %v1935_v26 = vadd.f32 %v5115_v50, %v1934_v27  ;;  %v5281_v11 = vpop.f32.mrf.mxu1 }
 0x264   : > { %v2188_v23 = vmax.f32 %v2186_v15, %v2187_v56  ;;  %v2201_v1 = vrot.slane %v2200_v28, 2  ;;  %v2074_v55 = vrot.slane %v2012_v2, 2  ;;  %v2075_v57 = vrot.slane %v2012_v2, 4 }
 0x265   : > { %v2195_v59 = vmax.f32 %v2193_v34, %v2194_v53  ;;  %v2208_v25 = vrot.slane %v2207_v48, 2  ;;  %v2076_v14 = vrot.slane %v2012_v2, 6  ;;  %v2296_v12 = vsel %vm2155_vm12, %v2012_v2, -inf }
 0x266   : > { %v2189_v8 = vrot.slane %v2188_v23, 1  ;;  %v2202_v21 = vmax.f32 %v2200_v28, %v2201_v1  ;;  %v2297_v40 = vrot.slane %v2296_v12, 4  ;;  %v2303_v0 = vsel %vm2155_vm12, %v2074_v55, -inf }
 0x267   : > { %v2196_v5 = vrot.slane %v2195_v59, 1  ;;  %v2209_v29 = vmax.f32 %v2207_v48, %v2208_v25  ;;  %v2304_v6 = vrot.slane %v2303_v0, 4  ;;  %v2310_v54 = vsel %vm2155_vm12, %v2075_v57, -inf  ;;  %v1939_v25 = vpop.f32.mrf.mxu2 }
 0x268   : > { %v2190_v62 = vmax.f32 %v2188_v23, %v2189_v8  ;;  %v2203_v7 = vrot.slane %v2202_v21, 1  ;;  %v2298_v49 = vmax.f32 %v2296_v12, %v2297_v40  ;;  %v2311_v20 = vrot.slane %v2310_v54, 4 }
 0x269   : > { %v2197_v45 = vmax.f32 %v2195_v59, %v2196_v5  ;;  %v2210_v17 = vrot.slane %v2209_v29, 1  ;;  %v2305_v22 = vmax.f32 %v2303_v0, %v2304_v6  ;;  %v2317_v18 = vsel %vm2155_vm12, %v2076_v14, -inf  ;;  %v1959_v14 = vpop.f32.mrf.mxu3 }
 0x26a   : > { %v2204_v38 = vmax.f32 %v2202_v21, %v2203_v7  ;;  %v2675_v63 = vsel %vm2674_vm0, %v2190_v62, %v2673_v61  ;;  %v2299_v3 = vrot.slane %v2298_v49, 2  ;;  %v2312_v4 = vmax.f32 %v2310_v54, %v2311_v20  ;;  %v1897_v6 = vpop.f32.mrf.mxu0 }
 0x26b   : > { %v2211_v32 = vmax.f32 %v2209_v29, %v2210_v17  ;;  %v2677_v43 = vsel %vm2676_vm1, %v2197_v45, %v2675_v63  ;;  %v2306_v33 = vrot.slane %v2305_v22, 2  ;;  %v2318_v35 = vrot.slane %v2317_v18, 4  ;;  %v1917_v20 = vpop.f32.mrf.mxu1 }
 0x26c   : > { %v2679_v31 = vsel %vm2678_vm2, %v2204_v38, %v2677_v43  ;;  %v2300_v39 = vmax.f32 %v2298_v49, %v2299_v3  ;;  %v2313_v16 = vrot.slane %v2312_v4, 2  ;;  %v2295_v15 = vmax.f32 %v5252_v41, %v2294_v30 }
 0x26d   : > { %v2681_v60 = vsel %vm2680_vm3, %v2211_v32, %v2679_v31  ;;  %v2307_v36 = vmax.f32 %v2305_v22, %v2306_v33  ;;  %v2319_v44 = vmax.f32 %v2317_v18, %v2318_v35  ;;  %v1893_v34 = vadd.f32 %v5115_v50, %v1892_v13 }
 0x26e   : > { %2739 = vst.msk [vmem:[%s5215_s16] sm:$0xff] %vm1994_vm11, %v2681_v60  ;;  %v2301_v58 = vrot.slane %v2300_v39, 1  ;;  %v2314_v61 = vmax.f32 %v2312_v4, %v2313_v16  ;;  %v1982_v52 = vmax.f32 %v5262_v47, 0.0  ;;  %v1913_v28 = vadd.f32 %v5115_v50, %v1912_v9 }
 0x26f   : > { %v2308_v46 = vrot.slane %v2307_v36, 1  ;;  %v2320_v56 = vrot.slane %v2319_v44, 2  ;;  %v2691_v2 = vsel %vm2672_vm15, %v2295_v15, %v2690_v10  ;;  %v1990_v48 = vmax.f32 %v1953_v37, 0.0 }
 0x270   : > { %v2302_v27 = vmax.f32 %v2300_v39, %v2301_v58  ;;  %v2315_v53 = vrot.slane %v2314_v61, 1  ;;  %v1983_v23 = vmax.f32 %v1935_v26, 0.0  ;;  %v1966_v1 = vmax.f32 %v1893_v34, 0.0 }
 0x271   : > { %v2309_v41 = vmax.f32 %v2307_v36, %v2308_v46  ;;  %v2321_v30 = vmax.f32 %v2319_v44, %v2320_v56  ;;  %v1974_v57 = vmax.f32 %v1913_v28, 0.0  ;;  %v1955_v59 = vadd.f32 %v5115_v50, %v5259_v24 }
 0x272   : > { %v2316_v55 = vmax.f32 %v2314_v61, %v2315_v53  ;;  %v2692_v13 = vsel %vm2674_vm0, %v2302_v27, %v2691_v2  ;;  %v2025_v10 = vsel %vm1994_vm11, %v1982_v52, -inf  ;;  %v2037_v8 = vsel %vm1994_vm11, %v1990_v48, -inf }
 0x273   : > { %v2322_v47 = vrot.slane %v2321_v30, 1  ;;  %v2693_v9 = vsel %vm2676_vm1, %v2309_v41, %v2692_v13  ;;  %v1991_v21 = vmax.f32 %v1955_v59, 0.0  ;;  %v1938_v40 = vadd.f32 %v5115_v50, %v1937_v42 }
 0x274   : > { %v2694_v12 = vsel %vm2678_vm2, %v2316_v55, %v2693_v9  ;;  %v2028_v5 = vsel %vm1994_vm11, %v1983_v23, -inf  ;;  %v1958_v24 = vadd.f32 %v5115_v50, %v1957_v19  ;;  %v1940_v29 = vadd.f32 %v5115_v50, %v1939_v25 }
 0x275   : > { %v2323_v0 = vmax.f32 %v2321_v30, %v2322_v47  ;;  %v5298_v54 = vsel %vm1994_vm11, %v1966_v1, -inf  ;;  %v5301_v62 = vsel %vm1994_vm11, %v1974_v57, -inf  ;;  %v1984_v7 = vmax.f32 %v1938_v40, 0.0 }
 0x276   : > { %v1960_v49 = vadd.f32 %v5115_v50, %v1959_v14  ;;  %v5306_v45 = vadd.f32 %v5115_v50, %v1894_v51  ;;  %v1992_v17 = vmax.f32 %v1958_v24, 0.0  ;;  %v1985_v22 = vmax.f32 %v1940_v29, 0.0 }
 0x277   : > { %v2695_v42 = vsel %vm2680_vm3, %v2323_v0, %v2694_v12  ;;  %v5311_v18 = vsel %vm1994_vm11, %v1991_v21, -inf  ;;  %v2026_v19 = vsel %vm1994_vm11, %v1984_v7, -inf  ;;  %v5315_v63 = vadd.f32 %v5115_v50, %v1897_v6 }
 0x278   : > { %2741 = vst.msk [vmem:[%s5215_s16 + $0x10] sm:$0xff] %vm1994_vm11, %v2695_v42  ;;  %v1993_v38 = vmax.f32 %v1960_v49, 0.0  ;;  %v2027_v3 = vmax.f32 %v2025_v10, %v2026_v19  ;;  %v2038_v4 = vsel %vm1994_vm11, %v1992_v17, -inf  ;;  %v2029_v32 = vsel %vm1994_vm11, %v1985_v22, -inf }
 0x279   : > { %v5320_v43 = vadd.f32 %v5115_v50, %v1917_v20  ;;  %v2039_v33 = vmax.f32 %v2037_v8, %v2038_v4  ;;  %v5322_v35 = vmax.f32 %v2028_v5, %v2029_v32  ;;  %v1968_v39 = vmax.f32 %v5315_v63, 0.0 }
 0x27a   : > { %v5325_v31 = vsel %vm1994_vm11, %v1993_v38, -inf  ;;  %v2089_v16 = vrot.slane %v2027_v3, 2  ;;  %v2090_v37 = vrot.slane %v2027_v3, 4  ;;  %v2091_v60 = vrot.slane %v2027_v3, 6 }
 0x27b   : > { %v2436_v36 = vsel %vm2155_vm12, %v2027_v3, -inf  ;;  %v2101_v26 = vrot.slane %v2039_v33, 2  ;;  %v2102_v51 = vrot.slane %v2039_v33, 4  ;;  %v2103_v15 = vrot.slane %v2039_v33, 6 }
 0x27c   : > { %v2437_v44 = vrot.slane %v2436_v36, 4  ;;  %v2443_v50 = vsel %vm2155_vm12, %v2089_v16, -inf  ;;  %v2450_v58 = vsel %vm2155_vm12, %v2090_v37, -inf  ;;  %v2457_v61 = vsel %vm2155_vm12, %v2091_v60, -inf }
 0x27d   : > { %v2548_v34 = vsel %vm2155_vm12, %v2039_v33, -inf  ;;  %v2444_v56 = vrot.slane %v2443_v50, 4  ;;  %v2451_v52 = vrot.slane %v2450_v58, 4  ;;  %v2458_v28 = vrot.slane %v2457_v61, 4 }
 0x27e   : > { %v2438_v46 = vmax.f32 %v2436_v36, %v2437_v44  ;;  %v2549_v2 = vrot.slane %v2548_v34, 4  ;;  %v2555_v27 = vsel %vm2155_vm12, %v2101_v26, -inf  ;;  %v2562_v53 = vsel %vm2155_vm12, %v2102_v51, -inf }
 0x27f   : > { %v2569_v48 = vsel %vm2155_vm12, %v2103_v15, -inf  ;;  %v2445_v30 = vmax.f32 %v2443_v50, %v2444_v56  ;;  %v2452_v23 = vmax.f32 %v2450_v58, %v2451_v52  ;;  %v2459_v1 = vmax.f32 %v2457_v61, %v2458_v28 }
 0x280   : > { %v2439_v41 = vrot.slane %v2438_v46, 2  ;;  %v2550_v55 = vmax.f32 %v2548_v34, %v2549_v2  ;;  %v2556_v13 = vrot.slane %v2555_v27, 4  ;;  %v2563_v57 = vrot.slane %v2562_v53, 4 }
 0x281   : > { %v2570_v59 = vrot.slane %v2569_v48, 4  ;;  %v2446_v47 = vrot.slane %v2445_v30, 2  ;;  %v2453_v9 = vrot.slane %v2452_v23, 2  ;;  %v2460_v10 = vrot.slane %v2459_v1, 2 }
 0x282   : > { %v2440_v25 = vmax.f32 %v2438_v46, %v2439_v41  ;;  %v2551_v14 = vrot.slane %v2550_v55, 2  ;;  %v2557_v12 = vmax.f32 %v2555_v27, %v2556_v13  ;;  %v2564_v8 = vmax.f32 %v2562_v53, %v2563_v57 }
 0x283   : > { %v2571_v21 = vmax.f32 %v2569_v48, %v2570_v59  ;;  %v2447_v0 = vmax.f32 %v2445_v30, %v2446_v47  ;;  %v2454_v5 = vmax.f32 %v2452_v23, %v2453_v9  ;;  %v2461_v24 = vmax.f32 %v2459_v1, %v2460_v10 }
 0x284   : > { %v2441_v40 = vrot.slane %v2440_v25, 1  ;;  %v2552_v29 = vmax.f32 %v2550_v55, %v2551_v14  ;;  %v2558_v6 = vrot.slane %v2557_v12, 2  ;;  %v2565_v7 = vrot.slane %v2564_v8, 2 }
 0x285   : > { %v2572_v49 = vrot.slane %v2571_v21, 2  ;;  %v2448_v42 = vrot.slane %v2447_v0, 1  ;;  %v2455_v17 = vrot.slane %v2454_v5, 1  ;;  %v2462_v22 = vrot.slane %v2461_v24, 1 }
 0x286   : > { %v2442_v20 = vmax.f32 %v2440_v25, %v2441_v40  ;;  %v2553_v19 = vrot.slane %v2552_v29, 1  ;;  %v2559_v38 = vmax.f32 %v2557_v12, %v2558_v6  ;;  %v2566_v3 = vmax.f32 %v2564_v8, %v2565_v7 }
 0x287   : > { %v2573_v4 = vmax.f32 %v2571_v21, %v2572_v49  ;;  %v2449_v32 = vmax.f32 %v2447_v0, %v2448_v42  ;;  %v2456_v33 = vmax.f32 %v2454_v5, %v2455_v17  ;;  %v2463_v16 = vmax.f32 %v2461_v24, %v2462_v22 }
 0x288   : > { %v2092_v37 = vrot.slane %v5322_v35, 2  ;;  %v2554_v60 = vmax.f32 %v2552_v29, %v2553_v19  ;;  %v2560_v36 = vrot.slane %v2559_v38, 1  ;;  %v2567_v44 = vrot.slane %v2566_v3, 1 }
 0x289   : > { %v2574_v26 = vrot.slane %v2573_v4, 1  ;;  %v2710_v51 = vsel %vm2668_vm13, %v2449_v32, %v2442_v20  ;;  %v2093_v15 = vrot.slane %v5322_v35, 4  ;;  %v2094_v50 = vrot.slane %v5322_v35, 6 }
 0x28a   : > { %v2464_v58 = vsel %vm2155_vm12, %v5322_v35, -inf  ;;  %v2711_v61 = vsel %vm2670_vm14, %v2456_v33, %v2710_v51  ;;  %v2561_v34 = vmax.f32 %v2559_v38, %v2560_v36  ;;  %v2568_v46 = vmax.f32 %v2566_v3, %v2567_v44 }
 0x28b   : > { %v2575_v56 = vmax.f32 %v2573_v4, %v2574_v26  ;;  %v2712_v52 = vsel %vm2672_vm15, %v2463_v16, %v2711_v61  ;;  %v2465_v28 = vrot.slane %v2464_v58, 4  ;;  %v2471_v2 = vsel %vm2155_vm12, %v2092_v37, -inf }
 0x28c   : > { %v2478_v27 = vsel %vm2155_vm12, %v2093_v15, -inf  ;;  %v2724_v53 = vsel %vm2668_vm13, %v2561_v34, %v2554_v60  ;;  %v2472_v48 = vrot.slane %v2471_v2, 4  ;;  %v2485_v30 = vsel %vm2155_vm12, %v2094_v50, -inf }
 0x28d   : > { %v2479_v41 = vrot.slane %v2478_v27, 4  ;;  %v2725_v35 = vsel %vm2670_vm14, %v2568_v46, %v2724_v53  ;;  %v2466_v23 = vmax.f32 %v2464_v58, %v2465_v28  ;;  %v2486_v1 = vrot.slane %v2485_v30, 4 }
 0x28e   : > { %v2042_v55 = vmax.f32 %v5311_v18, %v5325_v31  ;;  %v5352_v13 = vsel %vm2672_vm15, %v2575_v56, %v2725_v35  ;;  %v2473_v57 = vmax.f32 %v2471_v2, %v2472_v48  ;;  %v2002_v25 = vsel %vm1994_vm11, %v1968_v39, -inf }
 0x28f   : > { %v2480_v59 = vmax.f32 %v2478_v27, %v2479_v41  ;;  %v2467_v47 = vrot.slane %v2466_v23, 2  ;;  %v2487_v9 = vmax.f32 %v2485_v30, %v2486_v1  ;;  %v2003_v61 = vmax.f32 %v5298_v54, %v2002_v25 }
 0x290   : > { %v2104_v10 = vrot.slane %v2042_v55, 2  ;;  %v2105_v14 = vrot.slane %v2042_v55, 4  ;;  %v2474_v12 = vrot.slane %v2473_v57, 2  ;;  %v2106_v21 = vrot.slane %v2042_v55, 6 }
 0x291   : > { %v2481_v8 = vrot.slane %v2480_v59, 2  ;;  %v2576_v40 = vsel %vm2155_vm12, %v2042_v55, -inf  ;;  %v2468_v0 = vmax.f32 %v2466_v23, %v2467_v47  ;;  %v2488_v18 = vrot.slane %v2487_v9, 2  ;;  %v1899_v47 = vpop.f32.mrf.mxu0 }
 0x292   : > { %v2577_v31 = vrot.slane %v2576_v40, 4  ;;  %v2583_v5 = vsel %vm2155_vm12, %v2104_v10, -inf  ;;  %v2475_v24 = vmax.f32 %v2473_v57, %v2474_v12  ;;  %v2590_v63 = vsel %vm2155_vm12, %v2105_v14, -inf }
 0x293   : > { %v2482_v29 = vmax.f32 %v2480_v59, %v2481_v8  ;;  %v2584_v6 = vrot.slane %v2583_v5, 4  ;;  %v2469_v39 = vrot.slane %v2468_v0, 1  ;;  %v2489_v7 = vmax.f32 %v2487_v9, %v2488_v18 }
 0x294   : > { %v2578_v49 = vmax.f32 %v2576_v40, %v2577_v31  ;;  %v2591_v20 = vrot.slane %v2590_v63, 4  ;;  %v2476_v42 = vrot.slane %v2475_v24, 1  ;;  %v2597_v19 = vsel %vm2155_vm12, %v2106_v21, -inf }
 0x295   : > { %v2483_v17 = vrot.slane %v2482_v29, 1  ;;  %v2585_v22 = vmax.f32 %v2583_v5, %v2584_v6  ;;  %v2470_v38 = vmax.f32 %v2468_v0, %v2469_v39  ;;  %v2490_v3 = vrot.slane %v2489_v7, 1  ;;  %v3745_v5 = vld [vmem:[#allocation4] ss:$0 sm:$0xff] }
 0x296   : > { %v2579_v4 = vrot.slane %v2578_v49, 2  ;;  %v2592_v32 = vmax.f32 %v2590_v63, %v2591_v20  ;;  %v2477_v33 = vmax.f32 %v2475_v24, %v2476_v42  ;;  %v2598_v60 = vrot.slane %v2597_v19, 4 }
 0x297   : > { %v2484_v16 = vmax.f32 %v2482_v29, %v2483_v17  ;;  %v2586_v37 = vrot.slane %v2585_v22, 2  ;;  %v2491_v36 = vmax.f32 %v2489_v7, %v2490_v3  ;;  %v2713_v44 = vsel %vm2674_vm0, %v2470_v38, %v2712_v52 }
 0x298   : > { %v2580_v26 = vmax.f32 %v2578_v49, %v2579_v4  ;;  %v2593_v51 = vrot.slane %v2592_v32, 2  ;;  %v2714_v15 = vsel %vm2676_vm1, %v2477_v33, %v2713_v44  ;;  %v2599_v58 = vmax.f32 %v2597_v19, %v2598_v60 }
 0x299   : > { %v2587_v50 = vmax.f32 %v2585_v22, %v2586_v37  ;;  %v2715_v34 = vsel %vm2678_vm2, %v2484_v16, %v2714_v15  ;;  %v1976_v28 = vmax.f32 %v5320_v43, 0.0  ;;  %v2065_v48 = vrot.slane %v2003_v61, 2 }
 0x29a   : > { %v2581_v46 = vrot.slane %v2580_v26, 1  ;;  %v2594_v56 = vmax.f32 %v2592_v32, %v2593_v51  ;;  %v2716_v2 = vsel %vm2680_vm3, %v2491_v36, %v2715_v34  ;;  %v2600_v53 = vrot.slane %v2599_v58, 2 }
 0x29b   : > { %v2588_v27 = vrot.slane %v2587_v50, 1  ;;  %2744 = vst.msk [vmem:[%s5215_s16 + $0x28] sm:$0xff] %vm1994_vm11, %v2716_v2  ;;  %v2066_v30 = vrot.slane %v2003_v61, 4  ;;  %v2067_v35 = vrot.slane %v2003_v61, 6  ;;  %v2212_v54 = vsel %vm2155_vm12, %v2003_v61, -inf }
 0x29c   : > { %v2582_v52 = vmax.f32 %v2580_v26, %v2581_v46  ;;  %v2595_v41 = vrot.slane %v2594_v56, 1  ;;  %v2601_v1 = vmax.f32 %v2599_v58, %v2600_v53  ;;  %v2219_v55 = vsel %vm2155_vm12, %v2065_v48, -inf  ;;  %v1919_v26 = vpop.f32.mrf.mxu1 }
 0x29d   : > { %v2589_v23 = vmax.f32 %v2587_v50, %v2588_v27  ;;  %v2213_v59 = vrot.slane %v2212_v54, 4  ;;  %v2220_v25 = vrot.slane %v2219_v55, 4  ;;  %v2226_v14 = vsel %vm2155_vm12, %v2066_v30, -inf }
 0x29e   : > { %v2596_v57 = vmax.f32 %v2594_v56, %v2595_v41  ;;  %v2727_v43 = vsel %vm2674_vm0, %v2582_v52, %v5352_v13  ;;  %v2602_v9 = vrot.slane %v2601_v1, 1  ;;  %v2233_v12 = vsel %vm2155_vm12, %v2067_v35, -inf }
 0x29f   : > { %v2728_v10 = vsel %vm2676_vm1, %v2589_v23, %v2727_v43  ;;  %v2214_v21 = vmax.f32 %v2212_v54, %v2213_v59  ;;  %v2221_v40 = vmax.f32 %v2219_v55, %v2220_v25  ;;  %v2227_v0 = vrot.slane %v2226_v14, 4 }
 0x2a0   : > { %v2729_v8 = vsel %vm2678_vm2, %v2596_v57, %v2728_v10  ;;  %v2603_v18 = vmax.f32 %v2601_v1, %v2602_v9  ;;  %v2234_v31 = vrot.slane %v2233_v12, 4  ;;  %v2014_v13 = vsel %vm1994_vm11, %v1976_v28, -inf }
 0x2a1   : > { %v1900_v24 = vadd.f32 %v3745_v5, %v1899_v47  ;;  %v2215_v29 = vrot.slane %v2214_v21, 2  ;;  %v2222_v6 = vrot.slane %v2221_v40, 2  ;;  %v2228_v63 = vmax.f32 %v2226_v14, %v2227_v0 }
 0x2a2   : > { %v2015_v39 = vmax.f32 %v5301_v62, %v2014_v13  ;;  %v1967_v7 = vmax.f32 %v5306_v45, 0.0  ;;  %v2730_v49 = vsel %vm2680_vm3, %v2603_v18, %v2729_v8  ;;  %v2235_v20 = vmax.f32 %v2233_v12, %v2234_v31 }
 0x2a3   : > { %2746 = vst.msk [vmem:[%s5215_s16 + $0x38] sm:$0xff] %vm1994_vm11, %v2730_v49  ;;  %v2216_v42 = vmax.f32 %v2214_v21, %v2215_v29  ;;  %v2223_v17 = vmax.f32 %v2221_v40, %v2222_v6  ;;  %v2229_v22 = vrot.slane %v2228_v63, 2  ;;  %v1969_v32 = vmax.f32 %v1900_v24, 0.0 }
 0x2a4   : > { %v2077_v19 = vrot.slane %v2015_v39, 2  ;;  %v2078_v38 = vrot.slane %v2015_v39, 4  ;;  %v2079_v3 = vrot.slane %v2015_v39, 6  ;;  %v2324_v4 = vsel %vm2155_vm12, %v2015_v39, -inf }
 0x2a5   : > { %v2217_v33 = vrot.slane %v2216_v42, 1  ;;  %v2224_v16 = vrot.slane %v2223_v17, 1  ;;  %v2230_v37 = vmax.f32 %v2228_v63, %v2229_v22  ;;  %v2325_v62 = vrot.slane %v2324_v4, 4 }
 0x2a6   : > { %v2236_v60 = vrot.slane %v2235_v20, 2  ;;  %v2331_v45 = vsel %vm2155_vm12, %v2077_v19, -inf  ;;  %v2338_v36 = vsel %vm2155_vm12, %v2078_v38, -inf  ;;  %v2345_v44 = vsel %vm2155_vm12, %v2079_v3, -inf }
 0x2a7   : > { %v1915_v51 = vadd.f32 %v3745_v5, %v5281_v11  ;;  %v2225_v15 = vmax.f32 %v2223_v17, %v2224_v16  ;;  %v2231_v50 = vrot.slane %v2230_v37, 1  ;;  %v2326_v58 = vmax.f32 %v2324_v4, %v2325_v62 }
 0x2a8   : > { %v2004_v61 = vsel %vm1994_vm11, %v1967_v7, -inf  ;;  %v2332_v34 = vrot.slane %v2331_v45, 4  ;;  %v2339_v46 = vrot.slane %v2338_v36, 4  ;;  %v2346_v56 = vrot.slane %v2345_v44, 4 }
 0x2a9   : > { %v2218_v28 = vmax.f32 %v2216_v42, %v2217_v33  ;;  %v2327_v2 = vrot.slane %v2326_v58, 2  ;;  %v2005_v27 = vsel %vm1994_vm11, %v1969_v32, -inf  ;;  %v1920_v53 = vadd.f32 %v3745_v5, %v1919_v26 }
 0x2aa   : > { %v2237_v48 = vmax.f32 %v2235_v20, %v2236_v60  ;;  %v2333_v52 = vmax.f32 %v2331_v45, %v2332_v34  ;;  %v2340_v41 = vmax.f32 %v2338_v36, %v2339_v46  ;;  %v2347_v30 = vmax.f32 %v2345_v44, %v2346_v56 }
 0x2ab   : > { %v2232_v35 = vmax.f32 %v2230_v37, %v2231_v50  ;;  %v2682_v11 = vsel %vm2668_vm13, %v2225_v15, %v2218_v28  ;;  %v2006_v23 = vmax.f32 %v2004_v61, %v2005_v27  ;;  %v2328_v1 = vmax.f32 %v2326_v58, %v2327_v2 }
 0x2ac   : > { %v2334_v54 = vrot.slane %v2333_v52, 2  ;;  %v2341_v55 = vrot.slane %v2340_v41, 2  ;;  %v2348_v57 = vrot.slane %v2347_v30, 2  ;;  %v1977_v47 = vmax.f32 %v1920_v53, 0.0 }
 0x2ad   : > { %v2068_v43 = vrot.slane %v2006_v23, 2  ;;  %v2069_v59 = vrot.slane %v2006_v23, 4  ;;  %v2070_v25 = vrot.slane %v2006_v23, 6  ;;  %v1975_v9 = vmax.f32 %v1915_v51, 0.0 }
 0x2ae   : > { %v2238_v10 = vrot.slane %v2237_v48, 1  ;;  %v2335_v14 = vmax.f32 %v2333_v52, %v2334_v54  ;;  %v2240_v12 = vsel %vm2155_vm12, %v2006_v23, -inf  ;;  %v2683_v8 = vsel %vm2670_vm14, %v2232_v35, %v2682_v11 }
 0x2af   : > { %v2241_v21 = vrot.slane %v2240_v12, 4  ;;  %v2247_v40 = vsel %vm2155_vm12, %v2068_v43, -inf  ;;  %v2254_v0 = vsel %vm2155_vm12, %v2069_v59, -inf  ;;  %v2329_v18 = vrot.slane %v2328_v1, 1 }
 0x2b0   : > { %v2342_v31 = vmax.f32 %v2340_v41, %v2341_v55  ;;  %v5395_v13 = vmax.f32 %v2347_v30, %v2348_v57  ;;  %v2248_v5 = vrot.slane %v2247_v40, 4  ;;  %v2255_v29 = vrot.slane %v2254_v0, 4 }
 0x2b1   : > { %v2242_v24 = vmax.f32 %v2240_v12, %v2241_v21  ;;  %v2261_v6 = vsel %vm2155_vm12, %v2070_v25, -inf  ;;  %v2017_v63 = vsel %vm1994_vm11, %v1977_v47, -inf  ;;  %v2016_v39 = vsel %vm1994_vm11, %v1975_v9, -inf }
 0x2b2   : > { %v2239_v7 = vmax.f32 %v2237_v48, %v2238_v10  ;;  %v2336_v49 = vrot.slane %v2335_v14, 1  ;;  %v2249_v20 = vmax.f32 %v2247_v40, %v2248_v5  ;;  %v2256_v17 = vmax.f32 %v2254_v0, %v2255_v29 }
 0x2b3   : > { %v2243_v42 = vrot.slane %v2242_v24, 2  ;;  %v2262_v22 = vrot.slane %v2261_v6, 4  ;;  %v2018_v19 = vmax.f32 %v2016_v39, %v2017_v63  ;;  %v2330_v3 = vmax.f32 %v2328_v1, %v2329_v18 }
 0x2b4   : > { %v2684_v38 = vsel %vm2672_vm15, %v2239_v7, %v2683_v8  ;;  %v2343_v4 = vrot.slane %v2342_v31, 1  ;;  %v2250_v32 = vrot.slane %v2249_v20, 2  ;;  %v2350_v33 = vrot.slane %v5395_v13, 1 }
 0x2b5   : > { %v2244_v16 = vmax.f32 %v2242_v24, %v2243_v42  ;;  %v2257_v37 = vrot.slane %v2256_v17, 2  ;;  %v2263_v62 = vmax.f32 %v2261_v6, %v2262_v22  ;;  %v2337_v60 = vmax.f32 %v2335_v14, %v2336_v49 }
 0x2b6   : > { %v2251_v45 = vmax.f32 %v2249_v20, %v2250_v32  ;;  %v2080_v36 = vrot.slane %v2018_v19, 2  ;;  %v2081_v44 = vrot.slane %v2018_v19, 4  ;;  %v2082_v50 = vrot.slane %v2018_v19, 6 }
 0x2b7   : > { %v2245_v26 = vrot.slane %v2244_v16, 1  ;;  %v2258_v51 = vmax.f32 %v2256_v17, %v2257_v37  ;;  %v2264_v15 = vrot.slane %v2263_v62, 2  ;;  %v2352_v61 = vsel %vm2155_vm12, %v2018_v19, -inf }
 0x2b8   : > { %v2252_v58 = vrot.slane %v2251_v45, 1  ;;  %v2359_v34 = vsel %vm2155_vm12, %v2080_v36, -inf  ;;  %v2366_v46 = vsel %vm2155_vm12, %v2081_v44, -inf  ;;  %v2353_v27 = vrot.slane %v2352_v61, 4 }
 0x2b9   : > { %v2246_v56 = vmax.f32 %v2244_v16, %v2245_v26  ;;  %v2259_v28 = vrot.slane %v2258_v51, 1  ;;  %v2265_v2 = vmax.f32 %v2263_v62, %v2264_v15  ;;  %v2360_v48 = vrot.slane %v2359_v34, 4 }
 0x2ba   : > { %v2253_v53 = vmax.f32 %v2251_v45, %v2252_v58  ;;  %v2367_v52 = vrot.slane %v2366_v46, 4  ;;  %v2373_v41 = vsel %vm2155_vm12, %v2082_v50, -inf  ;;  %v2354_v23 = vmax.f32 %v2352_v61, %v2353_v27 }
 0x2bb   : > { %v2260_v30 = vmax.f32 %v2258_v51, %v2259_v28  ;;  %v2266_v35 = vrot.slane %v2265_v2, 1  ;;  %v2685_v11 = vsel %vm2674_vm0, %v2246_v56, %v2684_v38  ;;  %v2361_v54 = vmax.f32 %v2359_v34, %v2360_v48 }
 0x2bc   : > { %v2686_v1 = vsel %vm2676_vm1, %v2253_v53, %v2685_v11  ;;  %v2368_v55 = vmax.f32 %v2366_v46, %v2367_v52  ;;  %v2374_v57 = vrot.slane %v2373_v41, 4  ;;  %v2344_v43 = vmax.f32 %v2342_v31, %v2343_v4 }
 0x2bd   : > { %v2267_v59 = vmax.f32 %v2265_v2, %v2266_v35  ;;  %v2687_v25 = vsel %vm2678_vm2, %v2260_v30, %v2686_v1  ;;  %v2355_v47 = vrot.slane %v2354_v23, 2  ;;  %v2696_v9 = vsel %vm2668_vm13, %v2337_v60, %v2330_v3 }
 0x2be   : > { %v2362_v10 = vrot.slane %v2361_v54, 2  ;;  %v2369_v14 = vrot.slane %v2368_v55, 2  ;;  %v2375_v12 = vmax.f32 %v2373_v41, %v2374_v57  ;;  %v2697_v5 = vsel %vm2670_vm14, %v2344_v43, %v2696_v9 }
 0x2bf   : > { %v2688_v8 = vsel %vm2680_vm3, %v2267_v59, %v2687_v25  ;;  %v2356_v21 = vmax.f32 %v2354_v23, %v2355_v47  ;;  %v2351_v24 = vmax.f32 %v5395_v13, %v2350_v33 }
 0x2c0   : > { %2740 = vst.msk [vmem:[%s5215_s16 + $0x8] sm:$0xff] %vm1994_vm11, %v2688_v8  ;;  %v2363_v40 = vmax.f32 %v2361_v54, %v2362_v10  ;;  %v2370_v0 = vmax.f32 %v2368_v55, %v2369_v14  ;;  %v2376_v18 = vrot.slane %v2375_v12, 2 }
 0x2c1   : > { %v2357_v31 = vrot.slane %v2356_v21, 1  ;;  %v2698_v7 = vsel %vm2672_vm15, %v2351_v24, %v2697_v5 }
 0x2c2   : > { %v2364_v29 = vrot.slane %v2363_v40, 1  ;;  %v2371_v6 = vrot.slane %v2370_v0, 1  ;;  %v2377_v63 = vmax.f32 %v2375_v12, %v2376_v18 }
 0x2c3   : > { %v2358_v39 = vmax.f32 %v2356_v21, %v2357_v31 }
 0x2c4   : > { %v2365_v49 = vmax.f32 %v2363_v40, %v2364_v29  ;;  %v2372_v20 = vmax.f32 %v2370_v0, %v2371_v6  ;;  %v2378_v42 = vrot.slane %v2377_v63, 1 }
 0x2c5   : > { %v2699_v17 = vsel %vm2674_vm0, %v2358_v39, %v2698_v7 }
 0x2c6   : > { %v2379_v22 = vmax.f32 %v2377_v63, %v2378_v42  ;;  %v2700_v19 = vsel %vm2676_vm1, %v2365_v49, %v2699_v17 }
 0x2c7   : > { %v2701_v38 = vsel %vm2678_vm2, %v2372_v20, %v2700_v19 }
 0x2c8   : > { %v2702_v3 = vsel %vm2680_vm3, %v2379_v22, %v2701_v38 }
 0x2c9   : > { %2742 = vst.msk [vmem:[%s5215_s16 + $0x18] sm:$0xff] %vm1994_vm11, %v2702_v3 }
 0x2ca PF: > { %s15_s12 = sadd.s32 1, %s3820_s12  }
 0x2cb   : > { %p12_p7 = scmp.ge.s32.totalorder %s15_s12, 4  }
 0x2cd   :  { %14 = sbr.rel (!%p12_p7) target bundleno = 2 (0x2), region = 73 }
 0x2d2   :  { %2768 = vsyncpa [#allocation3], 1 }
 0x2d3   :  { %2770 = vsyncpa [#allocation3 + $0x1], 1 }
 0x2d4   :  { %2771 = vsyncpa [#allocation5], 1 }

// kernel: custom_alexnet_forward.5
= control target key start
LH: loop header
LB: loop body
LE: loop exit
PB: predicated region body
PF: predicated region fallthrough
CT: control target
= control target key end

     0   :  { %s4703_s18 = smov 0   ;;  %s4705_s19 = smov 0   ;;  %s5451_s0 = inlined_call_operand.vmem [shape: bf16[2,2048], index: 0, kind: input, shape index: {}]   ;;  %s5452_s1 = inlined_call_operand.vmem [shape: bf16[2048,256], index: 1, kind: input, shape index: {}]   ;;  %s5453_s2 = inlined_call_operand.vmem [shape: f32[1,256], index: 2, kind: input, shape index: {}]   ;;  %s5454_s3 = inlined_call_operand.vmem [shape: bf16[256,128], index: 3, kind: input, shape index: {}]   ;;  %s5455_s4 = inlined_call_operand.vmem [shape: f32[1,128], index: 4, kind: input, shape index: {}]   ;;  %s5456_s5 = inlined_call_operand.vmem [shape: f32[2,2,128], index: 5, kind: output, shape index: {}]  }
   0x1   :  { %s4707_s20 = smov 0   ;;  %s4709_s21 = smov 0  }
   0x2   :  { %s4711_s22 = smov 0  }
   0x3 LB: > { %s27_s23 = sadd.s32 1, %s4666_s21  ;;  %p69_p1 = scmp.ne.s32.totalorder %s4658_s19, %s4654_s18  ;;  %s4670_s22 = sphi %s4711_s22, %s15_s22   ;;  %s4666_s21 = sphi %s4709_s21, %s5460_s21   ;;  %s4662_s20 = sphi %s4707_s20, %s5459_s20   ;;  %s4658_s19 = sphi %s4705_s19, %s5458_s19   ;;  %s4654_s18 = sphi %s4703_s18, %s5457_s18  }
   0x4   : > { %p29_p0 = scmp.ge.s32.totalorder %s27_s23, 2  ;;  %p70_p2 = scmp.eq.s32.totalorder %s4670_s22, 0 }
   0x5   : > { %s62_s25 = sadd.s32 1, %s4658_s19  ;;  %p3900_p5 = scmp.ge.s32.totalorder %s4670_s22, 2 }
   0x6   : > { %s5462_s23 = smov (%p29_p0, %s27_s23), 0  ;;  %p71_p3 = por %p70_p2, %p69_p1 }
   0x7   : > { %s58_s24 = ssub.s32 %s4666_s21, %s5462_s23  ;;  %205 = sbr.rel (%p3900_p5) target bundleno = 272 (0x110), region = 24 }
   0x8   : > { %p60_p4 = scmp.eq.s32.totalorder %s58_s24, 0 }
   0xa   : > { %s4738_s26 = scalar_select %p60_p4, %s4658_s19, %s62_s25  }
   0xc   : > { %208 = sbr.rel (!%p71_p3) target bundleno = 272 (0x110), region = 28  ;;  %s210_s27 = sand.u32 (%p71_p3), 1, %s4658_s19  }
   0xd   : > { %s3902_s28 = sshll.u32 (%p71_p3), %s4666_s21, 2  ;;  %s3901_s29 = sshll.u32 (%p71_p3), %s210_s27, 10 }
   0xe   : > { %s4746_s7 = scalar_lea.vmem (%p71_p3), %s5452_s1, %s3902_s28  ;;  %s4750_s8 = scalar_lea.vmem (%p71_p3), [#allocation3], %s3901_s29 }
   0xf   : > { %v234_v0 = vld [vmem:[%s4746_s7] sm:$0xf] (%p71_p3)  ;;  %v236_v1 = vld [vmem:[%s4746_s7 + $0x8] sm:$0xf] (%p71_p3)  ;;  %v238_v2 = vld [vmem:[%s4746_s7 + $0x10] sm:$0xf] (%p71_p3) }
  0x10   : > { %235 = vst [vmem:[%s4750_s8] sm:$0xf] (%p71_p3), %v234_v0  ;;  %v240_v3 = vld [vmem:[%s4746_s7 + $0x18] sm:$0xf] (%p71_p3)  ;;  %v242_v4 = vld [vmem:[%s4746_s7 + $0x20] sm:$0xf] (%p71_p3) }
  0x11   : > { %237 = vst [vmem:[%s4750_s8 + $0x4] sm:$0xf] %v236_v1  ;;  %v244_v5 = vld [vmem:[%s4746_s7 + $0x28] sm:$0xf]  ;;  %v246_v6 = vld [vmem:[%s4746_s7 + $0x30] sm:$0xf] }
  0x12   : > { %239 = vst [vmem:[%s4750_s8 + $0x8] sm:$0xf] %v238_v2  ;;  %v248_v7 = vld [vmem:[%s4746_s7 + $0x38] sm:$0xf]  ;;  %v250_v8 = vld [vmem:[%s4746_s7 + $0x40] sm:$0xf] }
  0x13   : > { %241 = vst [vmem:[%s4750_s8 + $0xc] sm:$0xf] %v240_v3  ;;  %v252_v9 = vld [vmem:[%s4746_s7 + $0x48] sm:$0xf]  ;;  %v254_v10 = vld [vmem:[%s4746_s7 + $0x50] sm:$0xf] }
  0x14   : > { %243 = vst [vmem:[%s4750_s8 + $0x10] sm:$0xf] %v242_v4  ;;  %v256_v11 = vld [vmem:[%s4746_s7 + $0x58] sm:$0xf]  ;;  %v258_v12 = vld [vmem:[%s4746_s7 + $0x60] sm:$0xf] }
  0x15   : > { %245 = vst [vmem:[%s4750_s8 + $0x14] sm:$0xf] %v244_v5  ;;  %v260_v13 = vld [vmem:[%s4746_s7 + $0x68] sm:$0xf]  ;;  %v262_v14 = vld [vmem:[%s4746_s7 + $0x70] sm:$0xf] }
  0x16   : > { %247 = vst [vmem:[%s4750_s8 + $0x18] sm:$0xf] %v246_v6  ;;  %v264_v15 = vld [vmem:[%s4746_s7 + $0x78] sm:$0xf]  ;;  %v266_v16 = vld [vmem:[%s4746_s7 + $0x80] sm:$0xf] }
  0x17   : > { %249 = vst [vmem:[%s4750_s8 + $0x1c] sm:$0xf] %v248_v7  ;;  %v268_v17 = vld [vmem:[%s4746_s7 + $0x88] sm:$0xf]  ;;  %v270_v18 = vld [vmem:[%s4746_s7 + $0x90] sm:$0xf] }
  0x18   : > { %251 = vst [vmem:[%s4750_s8 + $0x20] sm:$0xf] %v250_v8  ;;  %v272_v19 = vld [vmem:[%s4746_s7 + $0x98] sm:$0xf]  ;;  %v274_v20 = vld [vmem:[%s4746_s7 + $0xa0] sm:$0xf] }
  0x19   : > { %253 = vst [vmem:[%s4750_s8 + $0x24] sm:$0xf] %v252_v9  ;;  %v276_v21 = vld [vmem:[%s4746_s7 + $0xa8] sm:$0xf]  ;;  %v278_v22 = vld [vmem:[%s4746_s7 + $0xb0] sm:$0xf] }
  0x1a   : > { %255 = vst [vmem:[%s4750_s8 + $0x28] sm:$0xf] %v254_v10  ;;  %v280_v23 = vld [vmem:[%s4746_s7 + $0xb8] sm:$0xf]  ;;  %v282_v24 = vld [vmem:[%s4746_s7 + $0xc0] sm:$0xf] }
  0x1b   : > { %257 = vst [vmem:[%s4750_s8 + $0x2c] sm:$0xf] %v256_v11  ;;  %v284_v25 = vld [vmem:[%s4746_s7 + $0xc8] sm:$0xf]  ;;  %v286_v26 = vld [vmem:[%s4746_s7 + $0xd0] sm:$0xf] }
  0x1c   : > { %259 = vst [vmem:[%s4750_s8 + $0x30] sm:$0xf] %v258_v12  ;;  %v288_v27 = vld [vmem:[%s4746_s7 + $0xd8] sm:$0xf]  ;;  %v290_v28 = vld [vmem:[%s4746_s7 + $0xe0] sm:$0xf] }
  0x1d   : > { %261 = vst [vmem:[%s4750_s8 + $0x34] sm:$0xf] %v260_v13  ;;  %v292_v29 = vld [vmem:[%s4746_s7 + $0xe8] sm:$0xf]  ;;  %v294_v30 = vld [vmem:[%s4746_s7 + $0xf0] sm:$0xf] }
  0x1e   : > { %263 = vst [vmem:[%s4750_s8 + $0x38] sm:$0xf] %v262_v14  ;;  %v296_v31 = vld [vmem:[%s4746_s7 + $0xf8] sm:$0xf]  ;;  %v298_v32 = vld [vmem:[%s4746_s7 + $0x100] sm:$0xf] }
  0x1f   : > { %265 = vst [vmem:[%s4750_s8 + $0x3c] sm:$0xf] %v264_v15  ;;  %v300_v33 = vld [vmem:[%s4746_s7 + $0x108] sm:$0xf]  ;;  %v302_v34 = vld [vmem:[%s4746_s7 + $0x110] sm:$0xf] }
  0x20   : > { %267 = vst [vmem:[%s4750_s8 + $0x40] sm:$0xf] %v266_v16  ;;  %v304_v35 = vld [vmem:[%s4746_s7 + $0x118] sm:$0xf]  ;;  %v306_v36 = vld [vmem:[%s4746_s7 + $0x120] sm:$0xf] }
  0x21   : > { %269 = vst [vmem:[%s4750_s8 + $0x44] sm:$0xf] %v268_v17  ;;  %v308_v37 = vld [vmem:[%s4746_s7 + $0x128] sm:$0xf]  ;;  %v310_v38 = vld [vmem:[%s4746_s7 + $0x130] sm:$0xf] }
  0x22   : > { %271 = vst [vmem:[%s4750_s8 + $0x48] sm:$0xf] %v270_v18  ;;  %v312_v39 = vld [vmem:[%s4746_s7 + $0x138] sm:$0xf]  ;;  %v314_v40 = vld [vmem:[%s4746_s7 + $0x140] sm:$0xf] }
  0x23   : > { %273 = vst [vmem:[%s4750_s8 + $0x4c] sm:$0xf] %v272_v19  ;;  %v316_v41 = vld [vmem:[%s4746_s7 + $0x148] sm:$0xf]  ;;  %v318_v42 = vld [vmem:[%s4746_s7 + $0x150] sm:$0xf] }
  0x24   : > { %275 = vst [vmem:[%s4750_s8 + $0x50] sm:$0xf] %v274_v20  ;;  %v320_v43 = vld [vmem:[%s4746_s7 + $0x158] sm:$0xf]  ;;  %v322_v44 = vld [vmem:[%s4746_s7 + $0x160] sm:$0xf] }
  0x25   : > { %277 = vst [vmem:[%s4750_s8 + $0x54] sm:$0xf] %v276_v21  ;;  %v324_v45 = vld [vmem:[%s4746_s7 + $0x168] sm:$0xf]  ;;  %v326_v46 = vld [vmem:[%s4746_s7 + $0x170] sm:$0xf] }
  0x26   : > { %279 = vst [vmem:[%s4750_s8 + $0x58] sm:$0xf] %v278_v22  ;;  %v328_v47 = vld [vmem:[%s4746_s7 + $0x178] sm:$0xf]  ;;  %v330_v48 = vld [vmem:[%s4746_s7 + $0x180] sm:$0xf] }
  0x27   : > { %281 = vst [vmem:[%s4750_s8 + $0x5c] sm:$0xf] %v280_v23  ;;  %v332_v49 = vld [vmem:[%s4746_s7 + $0x188] sm:$0xf]  ;;  %v334_v50 = vld [vmem:[%s4746_s7 + $0x190] sm:$0xf] }
  0x28   : > { %283 = vst [vmem:[%s4750_s8 + $0x60] sm:$0xf] %v282_v24  ;;  %v336_v51 = vld [vmem:[%s4746_s7 + $0x198] sm:$0xf]  ;;  %v338_v52 = vld [vmem:[%s4746_s7 + $0x1a0] sm:$0xf] }
  0x29   : > { %285 = vst [vmem:[%s4750_s8 + $0x64] sm:$0xf] %v284_v25  ;;  %v340_v53 = vld [vmem:[%s4746_s7 + $0x1a8] sm:$0xf]  ;;  %v342_v54 = vld [vmem:[%s4746_s7 + $0x1b0] sm:$0xf] }
  0x2a   : > { %287 = vst [vmem:[%s4750_s8 + $0x68] sm:$0xf] %v286_v26  ;;  %v344_v55 = vld [vmem:[%s4746_s7 + $0x1b8] sm:$0xf]  ;;  %v346_v56 = vld [vmem:[%s4746_s7 + $0x1c0] sm:$0xf] }
  0x2b   : > { %289 = vst [vmem:[%s4750_s8 + $0x6c] sm:$0xf] %v288_v27  ;;  %v348_v57 = vld [vmem:[%s4746_s7 + $0x1c8] sm:$0xf]  ;;  %v350_v58 = vld [vmem:[%s4746_s7 + $0x1d0] sm:$0xf] }
  0x2c   : > { %291 = vst [vmem:[%s4750_s8 + $0x70] sm:$0xf] %v290_v28  ;;  %v352_v59 = vld [vmem:[%s4746_s7 + $0x1d8] sm:$0xf]  ;;  %v354_v60 = vld [vmem:[%s4746_s7 + $0x1e0] sm:$0xf] }
  0x2d   : > { %293 = vst [vmem:[%s4750_s8 + $0x74] sm:$0xf] %v292_v29  ;;  %v356_v61 = vld [vmem:[%s4746_s7 + $0x1e8] sm:$0xf]  ;;  %v358_v62 = vld [vmem:[%s4746_s7 + $0x1f0] sm:$0xf] }
  0x2e   : > { %295 = vst [vmem:[%s4750_s8 + $0x78] sm:$0xf] %v294_v30  ;;  %v360_v63 = vld [vmem:[%s4746_s7 + $0x1f8] sm:$0xf]  ;;  %v362_v0 = vld [vmem:[%s4746_s7 + $0x200] sm:$0xf] }
  0x2f   : > { %297 = vst [vmem:[%s4750_s8 + $0x7c] sm:$0xf] %v296_v31  ;;  %v364_v1 = vld [vmem:[%s4746_s7 + $0x208] sm:$0xf]  ;;  %v366_v2 = vld [vmem:[%s4746_s7 + $0x210] sm:$0xf] }
  0x30   : > { %299 = vst [vmem:[%s4750_s8 + $0x80] sm:$0xf] %v298_v32  ;;  %v368_v3 = vld [vmem:[%s4746_s7 + $0x218] sm:$0xf]  ;;  %v370_v4 = vld [vmem:[%s4746_s7 + $0x220] sm:$0xf] }
  0x31   : > { %301 = vst [vmem:[%s4750_s8 + $0x84] sm:$0xf] %v300_v33  ;;  %v372_v5 = vld [vmem:[%s4746_s7 + $0x228] sm:$0xf]  ;;  %v374_v6 = vld [vmem:[%s4746_s7 + $0x230] sm:$0xf] }
  0x32   : > { %303 = vst [vmem:[%s4750_s8 + $0x88] sm:$0xf] %v302_v34  ;;  %v376_v7 = vld [vmem:[%s4746_s7 + $0x238] sm:$0xf]  ;;  %v378_v8 = vld [vmem:[%s4746_s7 + $0x240] sm:$0xf] }
  0x33   : > { %305 = vst [vmem:[%s4750_s8 + $0x8c] sm:$0xf] %v304_v35  ;;  %v380_v9 = vld [vmem:[%s4746_s7 + $0x248] sm:$0xf]  ;;  %v382_v10 = vld [vmem:[%s4746_s7 + $0x250] sm:$0xf] }
  0x34   : > { %307 = vst [vmem:[%s4750_s8 + $0x90] sm:$0xf] %v306_v36  ;;  %v384_v11 = vld [vmem:[%s4746_s7 + $0x258] sm:$0xf]  ;;  %v386_v12 = vld [vmem:[%s4746_s7 + $0x260] sm:$0xf] }
  0x35   : > { %309 = vst [vmem:[%s4750_s8 + $0x94] sm:$0xf] %v308_v37  ;;  %v388_v13 = vld [vmem:[%s4746_s7 + $0x268] sm:$0xf]  ;;  %v390_v14 = vld [vmem:[%s4746_s7 + $0x270] sm:$0xf] }
  0x36   : > { %311 = vst [vmem:[%s4750_s8 + $0x98] sm:$0xf] %v310_v38  ;;  %v392_v15 = vld [vmem:[%s4746_s7 + $0x278] sm:$0xf]  ;;  %v394_v16 = vld [vmem:[%s4746_s7 + $0x280] sm:$0xf] }
  0x37   : > { %313 = vst [vmem:[%s4750_s8 + $0x9c] sm:$0xf] %v312_v39  ;;  %v396_v17 = vld [vmem:[%s4746_s7 + $0x288] sm:$0xf]  ;;  %v398_v18 = vld [vmem:[%s4746_s7 + $0x290] sm:$0xf] }
  0x38   : > { %315 = vst [vmem:[%s4750_s8 + $0xa0] sm:$0xf] %v314_v40  ;;  %v400_v19 = vld [vmem:[%s4746_s7 + $0x298] sm:$0xf]  ;;  %v402_v20 = vld [vmem:[%s4746_s7 + $0x2a0] sm:$0xf] }
  0x39   : > { %317 = vst [vmem:[%s4750_s8 + $0xa4] sm:$0xf] %v316_v41  ;;  %v404_v21 = vld [vmem:[%s4746_s7 + $0x2a8] sm:$0xf]  ;;  %v406_v22 = vld [vmem:[%s4746_s7 + $0x2b0] sm:$0xf] }
  0x3a   : > { %319 = vst [vmem:[%s4750_s8 + $0xa8] sm:$0xf] %v318_v42  ;;  %v408_v23 = vld [vmem:[%s4746_s7 + $0x2b8] sm:$0xf]  ;;  %v410_v24 = vld [vmem:[%s4746_s7 + $0x2c0] sm:$0xf] }
  0x3b   : > { %321 = vst [vmem:[%s4750_s8 + $0xac] sm:$0xf] %v320_v43  ;;  %v412_v25 = vld [vmem:[%s4746_s7 + $0x2c8] sm:$0xf]  ;;  %v414_v26 = vld [vmem:[%s4746_s7 + $0x2d0] sm:$0xf] }
  0x3c   : > { %323 = vst [vmem:[%s4750_s8 + $0xb0] sm:$0xf] %v322_v44  ;;  %v416_v27 = vld [vmem:[%s4746_s7 + $0x2d8] sm:$0xf]  ;;  %v418_v28 = vld [vmem:[%s4746_s7 + $0x2e0] sm:$0xf] }
  0x3d   : > { %325 = vst [vmem:[%s4750_s8 + $0xb4] sm:$0xf] %v324_v45  ;;  %v420_v29 = vld [vmem:[%s4746_s7 + $0x2e8] sm:$0xf]  ;;  %v422_v30 = vld [vmem:[%s4746_s7 + $0x2f0] sm:$0xf] }
  0x3e   : > { %327 = vst [vmem:[%s4750_s8 + $0xb8] sm:$0xf] %v326_v46  ;;  %v424_v31 = vld [vmem:[%s4746_s7 + $0x2f8] sm:$0xf]  ;;  %v426_v32 = vld [vmem:[%s4746_s7 + $0x300] sm:$0xf] }
  0x3f   : > { %329 = vst [vmem:[%s4750_s8 + $0xbc] sm:$0xf] %v328_v47  ;;  %v428_v33 = vld [vmem:[%s4746_s7 + $0x308] sm:$0xf]  ;;  %v430_v34 = vld [vmem:[%s4746_s7 + $0x310] sm:$0xf] }
  0x40   : > { %331 = vst [vmem:[%s4750_s8 + $0xc0] sm:$0xf] %v330_v48  ;;  %v432_v35 = vld [vmem:[%s4746_s7 + $0x318] sm:$0xf]  ;;  %v434_v36 = vld [vmem:[%s4746_s7 + $0x320] sm:$0xf] }
  0x41   : > { %333 = vst [vmem:[%s4750_s8 + $0xc4] sm:$0xf] %v332_v49  ;;  %v436_v37 = vld [vmem:[%s4746_s7 + $0x328] sm:$0xf]  ;;  %v438_v38 = vld [vmem:[%s4746_s7 + $0x330] sm:$0xf] }
  0x42   : > { %335 = vst [vmem:[%s4750_s8 + $0xc8] sm:$0xf] %v334_v50  ;;  %v440_v39 = vld [vmem:[%s4746_s7 + $0x338] sm:$0xf]  ;;  %v442_v40 = vld [vmem:[%s4746_s7 + $0x340] sm:$0xf] }
  0x43   : > { %337 = vst [vmem:[%s4750_s8 + $0xcc] sm:$0xf] %v336_v51  ;;  %v444_v41 = vld [vmem:[%s4746_s7 + $0x348] sm:$0xf]  ;;  %v446_v42 = vld [vmem:[%s4746_s7 + $0x350] sm:$0xf] }
  0x44   : > { %339 = vst [vmem:[%s4750_s8 + $0xd0] sm:$0xf] %v338_v52  ;;  %v448_v43 = vld [vmem:[%s4746_s7 + $0x358] sm:$0xf]  ;;  %v450_v44 = vld [vmem:[%s4746_s7 + $0x360] sm:$0xf] }
  0x45   : > { %341 = vst [vmem:[%s4750_s8 + $0xd4] sm:$0xf] %v340_v53  ;;  %v452_v45 = vld [vmem:[%s4746_s7 + $0x368] sm:$0xf]  ;;  %v454_v46 = vld [vmem:[%s4746_s7 + $0x370] sm:$0xf] }
  0x46   : > { %343 = vst [vmem:[%s4750_s8 + $0xd8] sm:$0xf] %v342_v54  ;;  %v456_v47 = vld [vmem:[%s4746_s7 + $0x378] sm:$0xf]  ;;  %v458_v48 = vld [vmem:[%s4746_s7 + $0x380] sm:$0xf] }
  0x47   : > { %345 = vst [vmem:[%s4750_s8 + $0xdc] sm:$0xf] %v344_v55  ;;  %v460_v49 = vld [vmem:[%s4746_s7 + $0x388] sm:$0xf]  ;;  %v462_v50 = vld [vmem:[%s4746_s7 + $0x390] sm:$0xf] }
  0x48   : > { %347 = vst [vmem:[%s4750_s8 + $0xe0] sm:$0xf] %v346_v56  ;;  %v464_v51 = vld [vmem:[%s4746_s7 + $0x398] sm:$0xf]  ;;  %v466_v52 = vld [vmem:[%s4746_s7 + $0x3a0] sm:$0xf] }
  0x49   : > { %349 = vst [vmem:[%s4750_s8 + $0xe4] sm:$0xf] %v348_v57  ;;  %v468_v53 = vld [vmem:[%s4746_s7 + $0x3a8] sm:$0xf]  ;;  %v470_v54 = vld [vmem:[%s4746_s7 + $0x3b0] sm:$0xf] }
  0x4a   : > { %351 = vst [vmem:[%s4750_s8 + $0xe8] sm:$0xf] %v350_v58  ;;  %v472_v55 = vld [vmem:[%s4746_s7 + $0x3b8] sm:$0xf]  ;;  %v474_v56 = vld [vmem:[%s4746_s7 + $0x3c0] sm:$0xf] }
  0x4b   : > { %353 = vst [vmem:[%s4750_s8 + $0xec] sm:$0xf] %v352_v59  ;;  %v476_v57 = vld [vmem:[%s4746_s7 + $0x3c8] sm:$0xf]  ;;  %v478_v58 = vld [vmem:[%s4746_s7 + $0x3d0] sm:$0xf] }
  0x4c   : > { %355 = vst [vmem:[%s4750_s8 + $0xf0] sm:$0xf] %v354_v60  ;;  %v480_v59 = vld [vmem:[%s4746_s7 + $0x3d8] sm:$0xf]  ;;  %v482_v60 = vld [vmem:[%s4746_s7 + $0x3e0] sm:$0xf] }
  0x4d   : > { %357 = vst [vmem:[%s4750_s8 + $0xf4] sm:$0xf] %v356_v61  ;;  %v484_v61 = vld [vmem:[%s4746_s7 + $0x3e8] sm:$0xf] }
  0x4e   : > { %359 = vst [vmem:[%s4750_s8 + $0xf8] sm:$0xf] %v358_v62  ;;  %v486_v62 = vld [vmem:[%s4746_s7 + $0x3f0] sm:$0xf] }
  0x4f   : > { %361 = vst [vmem:[%s4750_s8 + $0xfc] sm:$0xf] %v360_v63  ;;  %v488_v63 = vld [vmem:[%s4746_s7 + $0x3f8] sm:$0xf] }
  0x50   : > { %363 = vst [vmem:[%s4750_s8 + $0x100] sm:$0xf] %v362_v0  ;;  %v490_v0 = vld [vmem:[%s4746_s7 + $0x400] sm:$0xf] }
  0x51   : > { %365 = vst [vmem:[%s4750_s8 + $0x104] sm:$0xf] %v364_v1  ;;  %v492_v1 = vld [vmem:[%s4746_s7 + $0x408] sm:$0xf] }
  0x52   : > { %367 = vst [vmem:[%s4750_s8 + $0x108] sm:$0xf] %v366_v2  ;;  %v494_v2 = vld [vmem:[%s4746_s7 + $0x410] sm:$0xf] }
  0x53   : > { %369 = vst [vmem:[%s4750_s8 + $0x10c] sm:$0xf] %v368_v3  ;;  %v496_v3 = vld [vmem:[%s4746_s7 + $0x418] sm:$0xf] }
  0x54   : > { %371 = vst [vmem:[%s4750_s8 + $0x110] sm:$0xf] %v370_v4  ;;  %v498_v4 = vld [vmem:[%s4746_s7 + $0x420] sm:$0xf] }
  0x55   : > { %373 = vst [vmem:[%s4750_s8 + $0x114] sm:$0xf] %v372_v5  ;;  %v500_v5 = vld [vmem:[%s4746_s7 + $0x428] sm:$0xf] }
  0x56   : > { %375 = vst [vmem:[%s4750_s8 + $0x118] sm:$0xf] %v374_v6  ;;  %v502_v6 = vld [vmem:[%s4746_s7 + $0x430] sm:$0xf] }
  0x57   : > { %377 = vst [vmem:[%s4750_s8 + $0x11c] sm:$0xf] %v376_v7  ;;  %v504_v7 = vld [vmem:[%s4746_s7 + $0x438] sm:$0xf] }
  0x58   : > { %379 = vst [vmem:[%s4750_s8 + $0x120] sm:$0xf] %v378_v8  ;;  %v506_v8 = vld [vmem:[%s4746_s7 + $0x440] sm:$0xf] }
  0x59   : > { %381 = vst [vmem:[%s4750_s8 + $0x124] sm:$0xf] %v380_v9  ;;  %v508_v9 = vld [vmem:[%s4746_s7 + $0x448] sm:$0xf] }
  0x5a   : > { %383 = vst [vmem:[%s4750_s8 + $0x128] sm:$0xf] %v382_v10  ;;  %v510_v10 = vld [vmem:[%s4746_s7 + $0x450] sm:$0xf] }
  0x5b   : > { %385 = vst [vmem:[%s4750_s8 + $0x12c] sm:$0xf] %v384_v11  ;;  %v512_v11 = vld [vmem:[%s4746_s7 + $0x458] sm:$0xf] }
  0x5c   : > { %387 = vst [vmem:[%s4750_s8 + $0x130] sm:$0xf] %v386_v12  ;;  %v514_v12 = vld [vmem:[%s4746_s7 + $0x460] sm:$0xf] }
  0x5d   : > { %389 = vst [vmem:[%s4750_s8 + $0x134] sm:$0xf] %v388_v13  ;;  %v516_v13 = vld [vmem:[%s4746_s7 + $0x468] sm:$0xf] }
  0x5e   : > { %391 = vst [vmem:[%s4750_s8 + $0x138] sm:$0xf] %v390_v14  ;;  %v518_v14 = vld [vmem:[%s4746_s7 + $0x470] sm:$0xf] }
  0x5f   : > { %393 = vst [vmem:[%s4750_s8 + $0x13c] sm:$0xf] %v392_v15  ;;  %v520_v15 = vld [vmem:[%s4746_s7 + $0x478] sm:$0xf] }
  0x60   : > { %395 = vst [vmem:[%s4750_s8 + $0x140] sm:$0xf] %v394_v16  ;;  %v522_v16 = vld [vmem:[%s4746_s7 + $0x480] sm:$0xf] }
  0x61   : > { %397 = vst [vmem:[%s4750_s8 + $0x144] sm:$0xf] %v396_v17  ;;  %v524_v17 = vld [vmem:[%s4746_s7 + $0x488] sm:$0xf] }
  0x62   : > { %399 = vst [vmem:[%s4750_s8 + $0x148] sm:$0xf] %v398_v18  ;;  %v526_v18 = vld [vmem:[%s4746_s7 + $0x490] sm:$0xf] }
  0x63   : > { %401 = vst [vmem:[%s4750_s8 + $0x14c] sm:$0xf] %v400_v19  ;;  %v528_v19 = vld [vmem:[%s4746_s7 + $0x498] sm:$0xf] }
  0x64   : > { %403 = vst [vmem:[%s4750_s8 + $0x150] sm:$0xf] %v402_v20  ;;  %v530_v20 = vld [vmem:[%s4746_s7 + $0x4a0] sm:$0xf] }
  0x65   : > { %405 = vst [vmem:[%s4750_s8 + $0x154] sm:$0xf] %v404_v21  ;;  %v532_v21 = vld [vmem:[%s4746_s7 + $0x4a8] sm:$0xf] }
  0x66   : > { %407 = vst [vmem:[%s4750_s8 + $0x158] sm:$0xf] %v406_v22  ;;  %v534_v22 = vld [vmem:[%s4746_s7 + $0x4b0] sm:$0xf] }
  0x67   : > { %409 = vst [vmem:[%s4750_s8 + $0x15c] sm:$0xf] %v408_v23  ;;  %v536_v23 = vld [vmem:[%s4746_s7 + $0x4b8] sm:$0xf] }
  0x68   : > { %411 = vst [vmem:[%s4750_s8 + $0x160] sm:$0xf] %v410_v24  ;;  %v538_v24 = vld [vmem:[%s4746_s7 + $0x4c0] sm:$0xf] }
  0x69   : > { %413 = vst [vmem:[%s4750_s8 + $0x164] sm:$0xf] %v412_v25  ;;  %v540_v25 = vld [vmem:[%s4746_s7 + $0x4c8] sm:$0xf] }
  0x6a   : > { %415 = vst [vmem:[%s4750_s8 + $0x168] sm:$0xf] %v414_v26  ;;  %v542_v26 = vld [vmem:[%s4746_s7 + $0x4d0] sm:$0xf] }
  0x6b   : > { %417 = vst [vmem:[%s4750_s8 + $0x16c] sm:$0xf] %v416_v27  ;;  %v544_v27 = vld [vmem:[%s4746_s7 + $0x4d8] sm:$0xf] }
  0x6c   : > { %419 = vst [vmem:[%s4750_s8 + $0x170] sm:$0xf] %v418_v28  ;;  %v546_v28 = vld [vmem:[%s4746_s7 + $0x4e0] sm:$0xf] }
  0x6d   : > { %421 = vst [vmem:[%s4750_s8 + $0x174] sm:$0xf] %v420_v29  ;;  %v548_v29 = vld [vmem:[%s4746_s7 + $0x4e8] sm:$0xf] }
  0x6e   : > { %423 = vst [vmem:[%s4750_s8 + $0x178] sm:$0xf] %v422_v30  ;;  %v550_v30 = vld [vmem:[%s4746_s7 + $0x4f0] sm:$0xf] }
  0x6f   : > { %425 = vst [vmem:[%s4750_s8 + $0x17c] sm:$0xf] %v424_v31  ;;  %v552_v31 = vld [vmem:[%s4746_s7 + $0x4f8] sm:$0xf] }
  0x70   : > { %427 = vst [vmem:[%s4750_s8 + $0x180] sm:$0xf] %v426_v32  ;;  %v554_v32 = vld [vmem:[%s4746_s7 + $0x500] sm:$0xf] }
  0x71   : > { %429 = vst [vmem:[%s4750_s8 + $0x184] sm:$0xf] %v428_v33  ;;  %v556_v33 = vld [vmem:[%s4746_s7 + $0x508] sm:$0xf] }
  0x72   : > { %431 = vst [vmem:[%s4750_s8 + $0x188] sm:$0xf] %v430_v34  ;;  %v558_v34 = vld [vmem:[%s4746_s7 + $0x510] sm:$0xf] }
  0x73   : > { %433 = vst [vmem:[%s4750_s8 + $0x18c] sm:$0xf] %v432_v35  ;;  %v560_v35 = vld [vmem:[%s4746_s7 + $0x518] sm:$0xf] }
  0x74   : > { %435 = vst [vmem:[%s4750_s8 + $0x190] sm:$0xf] %v434_v36  ;;  %v562_v36 = vld [vmem:[%s4746_s7 + $0x520] sm:$0xf] }
  0x75   : > { %437 = vst [vmem:[%s4750_s8 + $0x194] sm:$0xf] %v436_v37  ;;  %v564_v37 = vld [vmem:[%s4746_s7 + $0x528] sm:$0xf] }
  0x76   : > { %439 = vst [vmem:[%s4750_s8 + $0x198] sm:$0xf] %v438_v38  ;;  %v566_v38 = vld [vmem:[%s4746_s7 + $0x530] sm:$0xf] }
  0x77   : > { %441 = vst [vmem:[%s4750_s8 + $0x19c] sm:$0xf] %v440_v39  ;;  %v568_v39 = vld [vmem:[%s4746_s7 + $0x538] sm:$0xf] }
  0x78   : > { %443 = vst [vmem:[%s4750_s8 + $0x1a0] sm:$0xf] %v442_v40  ;;  %v570_v40 = vld [vmem:[%s4746_s7 + $0x540] sm:$0xf] }
  0x79   : > { %445 = vst [vmem:[%s4750_s8 + $0x1a4] sm:$0xf] %v444_v41  ;;  %v572_v41 = vld [vmem:[%s4746_s7 + $0x548] sm:$0xf] }
  0x7a   : > { %447 = vst [vmem:[%s4750_s8 + $0x1a8] sm:$0xf] %v446_v42  ;;  %v574_v42 = vld [vmem:[%s4746_s7 + $0x550] sm:$0xf] }
  0x7b   : > { %449 = vst [vmem:[%s4750_s8 + $0x1ac] sm:$0xf] %v448_v43  ;;  %v576_v43 = vld [vmem:[%s4746_s7 + $0x558] sm:$0xf] }
  0x7c   : > { %451 = vst [vmem:[%s4750_s8 + $0x1b0] sm:$0xf] %v450_v44  ;;  %v578_v44 = vld [vmem:[%s4746_s7 + $0x560] sm:$0xf] }
  0x7d   : > { %453 = vst [vmem:[%s4750_s8 + $0x1b4] sm:$0xf] %v452_v45  ;;  %v580_v45 = vld [vmem:[%s4746_s7 + $0x568] sm:$0xf] }
  0x7e   : > { %455 = vst [vmem:[%s4750_s8 + $0x1b8] sm:$0xf] %v454_v46  ;;  %v582_v46 = vld [vmem:[%s4746_s7 + $0x570] sm:$0xf] }
  0x7f   : > { %457 = vst [vmem:[%s4750_s8 + $0x1bc] sm:$0xf] %v456_v47  ;;  %v584_v47 = vld [vmem:[%s4746_s7 + $0x578] sm:$0xf] }
  0x80   : > { %459 = vst [vmem:[%s4750_s8 + $0x1c0] sm:$0xf] %v458_v48  ;;  %v586_v48 = vld [vmem:[%s4746_s7 + $0x580] sm:$0xf] }
  0x81   : > { %461 = vst [vmem:[%s4750_s8 + $0x1c4] sm:$0xf] %v460_v49  ;;  %v588_v49 = vld [vmem:[%s4746_s7 + $0x588] sm:$0xf] }
  0x82   : > { %463 = vst [vmem:[%s4750_s8 + $0x1c8] sm:$0xf] %v462_v50  ;;  %v590_v50 = vld [vmem:[%s4746_s7 + $0x590] sm:$0xf] }
  0x83   : > { %465 = vst [vmem:[%s4750_s8 + $0x1cc] sm:$0xf] %v464_v51  ;;  %v592_v51 = vld [vmem:[%s4746_s7 + $0x598] sm:$0xf] }
  0x84   : > { %467 = vst [vmem:[%s4750_s8 + $0x1d0] sm:$0xf] %v466_v52  ;;  %v594_v52 = vld [vmem:[%s4746_s7 + $0x5a0] sm:$0xf] }
  0x85   : > { %469 = vst [vmem:[%s4750_s8 + $0x1d4] sm:$0xf] %v468_v53  ;;  %v596_v53 = vld [vmem:[%s4746_s7 + $0x5a8] sm:$0xf] }
  0x86   : > { %471 = vst [vmem:[%s4750_s8 + $0x1d8] sm:$0xf] %v470_v54  ;;  %v598_v54 = vld [vmem:[%s4746_s7 + $0x5b0] sm:$0xf] }
  0x87   : > { %473 = vst [vmem:[%s4750_s8 + $0x1dc] sm:$0xf] %v472_v55  ;;  %v600_v55 = vld [vmem:[%s4746_s7 + $0x5b8] sm:$0xf] }
  0x88   : > { %475 = vst [vmem:[%s4750_s8 + $0x1e0] sm:$0xf] %v474_v56  ;;  %v602_v56 = vld [vmem:[%s4746_s7 + $0x5c0] sm:$0xf] }
  0x89   : > { %477 = vst [vmem:[%s4750_s8 + $0x1e4] sm:$0xf] %v476_v57  ;;  %v604_v57 = vld [vmem:[%s4746_s7 + $0x5c8] sm:$0xf] }
  0x8a   : > { %479 = vst [vmem:[%s4750_s8 + $0x1e8] sm:$0xf] %v478_v58  ;;  %v606_v58 = vld [vmem:[%s4746_s7 + $0x5d0] sm:$0xf] }
  0x8b   : > { %481 = vst [vmem:[%s4750_s8 + $0x1ec] sm:$0xf] %v480_v59  ;;  %v608_v59 = vld [vmem:[%s4746_s7 + $0x5d8] sm:$0xf] }
  0x8c   : > { %483 = vst [vmem:[%s4750_s8 + $0x1f0] sm:$0xf] %v482_v60  ;;  %v610_v60 = vld [vmem:[%s4746_s7 + $0x5e0] sm:$0xf] }
  0x8d   : > { %485 = vst [vmem:[%s4750_s8 + $0x1f4] sm:$0xf] %v484_v61  ;;  %v612_v61 = vld [vmem:[%s4746_s7 + $0x5e8] sm:$0xf] }
  0x8e   : > { %487 = vst [vmem:[%s4750_s8 + $0x1f8] sm:$0xf] %v486_v62  ;;  %v614_v62 = vld [vmem:[%s4746_s7 + $0x5f0] sm:$0xf] }
  0x8f   : > { %489 = vst [vmem:[%s4750_s8 + $0x1fc] sm:$0xf] %v488_v63  ;;  %v616_v63 = vld [vmem:[%s4746_s7 + $0x5f8] sm:$0xf] }
  0x90   : > { %491 = vst [vmem:[%s4750_s8 + $0x200] sm:$0xf] %v490_v0  ;;  %v618_v0 = vld [vmem:[%s4746_s7 + $0x600] sm:$0xf] }
  0x91   : > { %493 = vst [vmem:[%s4750_s8 + $0x204] sm:$0xf] %v492_v1  ;;  %v620_v1 = vld [vmem:[%s4746_s7 + $0x608] sm:$0xf] }
  0x92   : > { %495 = vst [vmem:[%s4750_s8 + $0x208] sm:$0xf] %v494_v2  ;;  %v622_v2 = vld [vmem:[%s4746_s7 + $0x610] sm:$0xf] }
  0x93   : > { %497 = vst [vmem:[%s4750_s8 + $0x20c] sm:$0xf] %v496_v3  ;;  %v624_v3 = vld [vmem:[%s4746_s7 + $0x618] sm:$0xf] }
  0x94   : > { %499 = vst [vmem:[%s4750_s8 + $0x210] sm:$0xf] %v498_v4  ;;  %v626_v4 = vld [vmem:[%s4746_s7 + $0x620] sm:$0xf] }
  0x95   : > { %501 = vst [vmem:[%s4750_s8 + $0x214] sm:$0xf] %v500_v5  ;;  %v628_v5 = vld [vmem:[%s4746_s7 + $0x628] sm:$0xf] }
  0x96   : > { %503 = vst [vmem:[%s4750_s8 + $0x218] sm:$0xf] %v502_v6  ;;  %v630_v6 = vld [vmem:[%s4746_s7 + $0x630] sm:$0xf] }
  0x97   : > { %505 = vst [vmem:[%s4750_s8 + $0x21c] sm:$0xf] %v504_v7  ;;  %v632_v7 = vld [vmem:[%s4746_s7 + $0x638] sm:$0xf] }
  0x98   : > { %507 = vst [vmem:[%s4750_s8 + $0x220] sm:$0xf] %v506_v8  ;;  %v634_v8 = vld [vmem:[%s4746_s7 + $0x640] sm:$0xf] }
  0x99   : > { %509 = vst [vmem:[%s4750_s8 + $0x224] sm:$0xf] %v508_v9  ;;  %v636_v9 = vld [vmem:[%s4746_s7 + $0x648] sm:$0xf] }
  0x9a   : > { %511 = vst [vmem:[%s4750_s8 + $0x228] sm:$0xf] %v510_v10  ;;  %v638_v10 = vld [vmem:[%s4746_s7 + $0x650] sm:$0xf] }
  0x9b   : > { %513 = vst [vmem:[%s4750_s8 + $0x22c] sm:$0xf] %v512_v11  ;;  %v640_v11 = vld [vmem:[%s4746_s7 + $0x658] sm:$0xf] }
  0x9c   : > { %515 = vst [vmem:[%s4750_s8 + $0x230] sm:$0xf] %v514_v12  ;;  %v642_v12 = vld [vmem:[%s4746_s7 + $0x660] sm:$0xf] }
  0x9d   : > { %517 = vst [vmem:[%s4750_s8 + $0x234] sm:$0xf] %v516_v13  ;;  %v644_v13 = vld [vmem:[%s4746_s7 + $0x668] sm:$0xf] }
  0x9e   : > { %519 = vst [vmem:[%s4750_s8 + $0x238] sm:$0xf] %v518_v14  ;;  %v646_v14 = vld [vmem:[%s4746_s7 + $0x670] sm:$0xf] }
  0x9f   : > { %521 = vst [vmem:[%s4750_s8 + $0x23c] sm:$0xf] %v520_v15  ;;  %v648_v15 = vld [vmem:[%s4746_s7 + $0x678] sm:$0xf] }
  0xa0   : > { %523 = vst [vmem:[%s4750_s8 + $0x240] sm:$0xf] %v522_v16  ;;  %v650_v16 = vld [vmem:[%s4746_s7 + $0x680] sm:$0xf] }
  0xa1   : > { %525 = vst [vmem:[%s4750_s8 + $0x244] sm:$0xf] %v524_v17  ;;  %v652_v17 = vld [vmem:[%s4746_s7 + $0x688] sm:$0xf] }
  0xa2   : > { %527 = vst [vmem:[%s4750_s8 + $0x248] sm:$0xf] %v526_v18  ;;  %v654_v18 = vld [vmem:[%s4746_s7 + $0x690] sm:$0xf] }
  0xa3   : > { %529 = vst [vmem:[%s4750_s8 + $0x24c] sm:$0xf] %v528_v19  ;;  %v656_v19 = vld [vmem:[%s4746_s7 + $0x698] sm:$0xf] }
  0xa4   : > { %531 = vst [vmem:[%s4750_s8 + $0x250] sm:$0xf] %v530_v20  ;;  %v658_v20 = vld [vmem:[%s4746_s7 + $0x6a0] sm:$0xf] }
  0xa5   : > { %533 = vst [vmem:[%s4750_s8 + $0x254] sm:$0xf] %v532_v21  ;;  %v660_v21 = vld [vmem:[%s4746_s7 + $0x6a8] sm:$0xf] }
  0xa6   : > { %535 = vst [vmem:[%s4750_s8 + $0x258] sm:$0xf] %v534_v22  ;;  %v662_v22 = vld [vmem:[%s4746_s7 + $0x6b0] sm:$0xf] }
  0xa7   : > { %537 = vst [vmem:[%s4750_s8 + $0x25c] sm:$0xf] %v536_v23  ;;  %v664_v23 = vld [vmem:[%s4746_s7 + $0x6b8] sm:$0xf] }
  0xa8   : > { %539 = vst [vmem:[%s4750_s8 + $0x260] sm:$0xf] %v538_v24  ;;  %v666_v24 = vld [vmem:[%s4746_s7 + $0x6c0] sm:$0xf] }
  0xa9   : > { %541 = vst [vmem:[%s4750_s8 + $0x264] sm:$0xf] %v540_v25  ;;  %v668_v25 = vld [vmem:[%s4746_s7 + $0x6c8] sm:$0xf] }
  0xaa   : > { %543 = vst [vmem:[%s4750_s8 + $0x268] sm:$0xf] %v542_v26  ;;  %v670_v26 = vld [vmem:[%s4746_s7 + $0x6d0] sm:$0xf] }
  0xab   : > { %545 = vst [vmem:[%s4750_s8 + $0x26c] sm:$0xf] %v544_v27  ;;  %v672_v27 = vld [vmem:[%s4746_s7 + $0x6d8] sm:$0xf] }
  0xac   : > { %547 = vst [vmem:[%s4750_s8 + $0x270] sm:$0xf] %v546_v28  ;;  %v674_v28 = vld [vmem:[%s4746_s7 + $0x6e0] sm:$0xf] }
  0xad   : > { %549 = vst [vmem:[%s4750_s8 + $0x274] sm:$0xf] %v548_v29  ;;  %v676_v29 = vld [vmem:[%s4746_s7 + $0x6e8] sm:$0xf] }
  0xae   : > { %551 = vst [vmem:[%s4750_s8 + $0x278] sm:$0xf] %v550_v30  ;;  %v678_v30 = vld [vmem:[%s4746_s7 + $0x6f0] sm:$0xf] }
  0xaf   : > { %553 = vst [vmem:[%s4750_s8 + $0x27c] sm:$0xf] %v552_v31  ;;  %v680_v31 = vld [vmem:[%s4746_s7 + $0x6f8] sm:$0xf] }
  0xb0   : > { %555 = vst [vmem:[%s4750_s8 + $0x280] sm:$0xf] %v554_v32  ;;  %v682_v32 = vld [vmem:[%s4746_s7 + $0x700] sm:$0xf] }
  0xb1   : > { %557 = vst [vmem:[%s4750_s8 + $0x284] sm:$0xf] %v556_v33  ;;  %v684_v33 = vld [vmem:[%s4746_s7 + $0x708] sm:$0xf] }
  0xb2   : > { %559 = vst [vmem:[%s4750_s8 + $0x288] sm:$0xf] %v558_v34  ;;  %v686_v34 = vld [vmem:[%s4746_s7 + $0x710] sm:$0xf] }
  0xb3   : > { %561 = vst [vmem:[%s4750_s8 + $0x28c] sm:$0xf] %v560_v35  ;;  %v688_v35 = vld [vmem:[%s4746_s7 + $0x718] sm:$0xf] }
  0xb4   : > { %563 = vst [vmem:[%s4750_s8 + $0x290] sm:$0xf] %v562_v36  ;;  %v690_v36 = vld [vmem:[%s4746_s7 + $0x720] sm:$0xf] }
  0xb5   : > { %565 = vst [vmem:[%s4750_s8 + $0x294] sm:$0xf] %v564_v37  ;;  %v692_v37 = vld [vmem:[%s4746_s7 + $0x728] sm:$0xf] }
  0xb6   : > { %567 = vst [vmem:[%s4750_s8 + $0x298] sm:$0xf] %v566_v38  ;;  %v694_v38 = vld [vmem:[%s4746_s7 + $0x730] sm:$0xf] }
  0xb7   : > { %569 = vst [vmem:[%s4750_s8 + $0x29c] sm:$0xf] %v568_v39  ;;  %v696_v39 = vld [vmem:[%s4746_s7 + $0x738] sm:$0xf] }
  0xb8   : > { %571 = vst [vmem:[%s4750_s8 + $0x2a0] sm:$0xf] %v570_v40  ;;  %v698_v40 = vld [vmem:[%s4746_s7 + $0x740] sm:$0xf] }
  0xb9   : > { %573 = vst [vmem:[%s4750_s8 + $0x2a4] sm:$0xf] %v572_v41  ;;  %v700_v41 = vld [vmem:[%s4746_s7 + $0x748] sm:$0xf] }
  0xba   : > { %575 = vst [vmem:[%s4750_s8 + $0x2a8] sm:$0xf] %v574_v42  ;;  %v702_v42 = vld [vmem:[%s4746_s7 + $0x750] sm:$0xf] }
  0xbb   : > { %577 = vst [vmem:[%s4750_s8 + $0x2ac] sm:$0xf] %v576_v43  ;;  %v704_v43 = vld [vmem:[%s4746_s7 + $0x758] sm:$0xf] }
  0xbc   : > { %579 = vst [vmem:[%s4750_s8 + $0x2b0] sm:$0xf] %v578_v44  ;;  %v706_v44 = vld [vmem:[%s4746_s7 + $0x760] sm:$0xf] }
  0xbd   : > { %581 = vst [vmem:[%s4750_s8 + $0x2b4] sm:$0xf] %v580_v45  ;;  %v708_v45 = vld [vmem:[%s4746_s7 + $0x768] sm:$0xf] }
  0xbe   : > { %583 = vst [vmem:[%s4750_s8 + $0x2b8] sm:$0xf] %v582_v46  ;;  %v710_v46 = vld [vmem:[%s4746_s7 + $0x770] sm:$0xf] }
  0xbf   : > { %585 = vst [vmem:[%s4750_s8 + $0x2bc] sm:$0xf] %v584_v47  ;;  %v712_v47 = vld [vmem:[%s4746_s7 + $0x778] sm:$0xf] }
  0xc0   : > { %587 = vst [vmem:[%s4750_s8 + $0x2c0] sm:$0xf] %v586_v48  ;;  %v714_v48 = vld [vmem:[%s4746_s7 + $0x780] sm:$0xf] }
  0xc1   : > { %589 = vst [vmem:[%s4750_s8 + $0x2c4] sm:$0xf] %v588_v49  ;;  %v716_v49 = vld [vmem:[%s4746_s7 + $0x788] sm:$0xf] }
  0xc2   : > { %591 = vst [vmem:[%s4750_s8 + $0x2c8] sm:$0xf] %v590_v50  ;;  %v718_v50 = vld [vmem:[%s4746_s7 + $0x790] sm:$0xf] }
  0xc3   : > { %593 = vst [vmem:[%s4750_s8 + $0x2cc] sm:$0xf] %v592_v51  ;;  %v720_v51 = vld [vmem:[%s4746_s7 + $0x798] sm:$0xf] }
  0xc4   : > { %595 = vst [vmem:[%s4750_s8 + $0x2d0] sm:$0xf] %v594_v52  ;;  %v722_v52 = vld [vmem:[%s4746_s7 + $0x7a0] sm:$0xf] }
  0xc5   : > { %597 = vst [vmem:[%s4750_s8 + $0x2d4] sm:$0xf] %v596_v53  ;;  %v724_v53 = vld [vmem:[%s4746_s7 + $0x7a8] sm:$0xf] }
  0xc6   : > { %599 = vst [vmem:[%s4750_s8 + $0x2d8] sm:$0xf] %v598_v54  ;;  %v726_v54 = vld [vmem:[%s4746_s7 + $0x7b0] sm:$0xf] }
  0xc7   : > { %601 = vst [vmem:[%s4750_s8 + $0x2dc] sm:$0xf] %v600_v55  ;;  %v728_v55 = vld [vmem:[%s4746_s7 + $0x7b8] sm:$0xf] }
  0xc8   : > { %603 = vst [vmem:[%s4750_s8 + $0x2e0] sm:$0xf] %v602_v56  ;;  %v730_v56 = vld [vmem:[%s4746_s7 + $0x7c0] sm:$0xf] }
  0xc9   : > { %605 = vst [vmem:[%s4750_s8 + $0x2e4] sm:$0xf] %v604_v57  ;;  %v732_v57 = vld [vmem:[%s4746_s7 + $0x7c8] sm:$0xf] }
  0xca   : > { %607 = vst [vmem:[%s4750_s8 + $0x2e8] sm:$0xf] %v606_v58  ;;  %v734_v58 = vld [vmem:[%s4746_s7 + $0x7d0] sm:$0xf] }
  0xcb   : > { %609 = vst [vmem:[%s4750_s8 + $0x2ec] sm:$0xf] %v608_v59  ;;  %v736_v59 = vld [vmem:[%s4746_s7 + $0x7d8] sm:$0xf] }
  0xcc   : > { %611 = vst [vmem:[%s4750_s8 + $0x2f0] sm:$0xf] %v610_v60  ;;  %v738_v60 = vld [vmem:[%s4746_s7 + $0x7e0] sm:$0xf] }
  0xcd   : > { %613 = vst [vmem:[%s4750_s8 + $0x2f4] sm:$0xf] %v612_v61  ;;  %v740_v61 = vld [vmem:[%s4746_s7 + $0x7e8] sm:$0xf] }
  0xce   : > { %615 = vst [vmem:[%s4750_s8 + $0x2f8] sm:$0xf] %v614_v62  ;;  %v742_v62 = vld [vmem:[%s4746_s7 + $0x7f0] sm:$0xf] }
  0xcf   : > { %617 = vst [vmem:[%s4750_s8 + $0x2fc] sm:$0xf] %v616_v63  ;;  %v744_v63 = vld [vmem:[%s4746_s7 + $0x7f8] sm:$0xf] }
  0xd0   : > { %619 = vst [vmem:[%s4750_s8 + $0x300] sm:$0xf] %v618_v0 }
  0xd1   : > { %621 = vst [vmem:[%s4750_s8 + $0x304] sm:$0xf] %v620_v1 }
  0xd2   : > { %623 = vst [vmem:[%s4750_s8 + $0x308] sm:$0xf] %v622_v2 }
  0xd3   : > { %625 = vst [vmem:[%s4750_s8 + $0x30c] sm:$0xf] %v624_v3 }
  0xd4   : > { %627 = vst [vmem:[%s4750_s8 + $0x310] sm:$0xf] %v626_v4 }
  0xd5   : > { %629 = vst [vmem:[%s4750_s8 + $0x314] sm:$0xf] %v628_v5 }
  0xd6   : > { %631 = vst [vmem:[%s4750_s8 + $0x318] sm:$0xf] %v630_v6 }
  0xd7   : > { %633 = vst [vmem:[%s4750_s8 + $0x31c] sm:$0xf] %v632_v7 }
  0xd8   : > { %635 = vst [vmem:[%s4750_s8 + $0x320] sm:$0xf] %v634_v8 }
  0xd9   : > { %637 = vst [vmem:[%s4750_s8 + $0x324] sm:$0xf] %v636_v9 }
  0xda   : > { %639 = vst [vmem:[%s4750_s8 + $0x328] sm:$0xf] %v638_v10 }
  0xdb   : > { %641 = vst [vmem:[%s4750_s8 + $0x32c] sm:$0xf] %v640_v11 }
  0xdc   : > { %643 = vst [vmem:[%s4750_s8 + $0x330] sm:$0xf] %v642_v12 }
  0xdd   : > { %645 = vst [vmem:[%s4750_s8 + $0x334] sm:$0xf] %v644_v13 }
  0xde   : > { %647 = vst [vmem:[%s4750_s8 + $0x338] sm:$0xf] %v646_v14 }
  0xdf   : > { %649 = vst [vmem:[%s4750_s8 + $0x33c] sm:$0xf] %v648_v15 }
  0xe0   : > { %651 = vst [vmem:[%s4750_s8 + $0x340] sm:$0xf] %v650_v16 }
  0xe1   : > { %653 = vst [vmem:[%s4750_s8 + $0x344] sm:$0xf] %v652_v17 }
  0xe2   : > { %655 = vst [vmem:[%s4750_s8 + $0x348] sm:$0xf] %v654_v18 }
  0xe3   : > { %657 = vst [vmem:[%s4750_s8 + $0x34c] sm:$0xf] %v656_v19 }
  0xe4   : > { %659 = vst [vmem:[%s4750_s8 + $0x350] sm:$0xf] %v658_v20 }
  0xe5   : > { %661 = vst [vmem:[%s4750_s8 + $0x354] sm:$0xf] %v660_v21 }
  0xe6   : > { %663 = vst [vmem:[%s4750_s8 + $0x358] sm:$0xf] %v662_v22 }
  0xe7   : > { %665 = vst [vmem:[%s4750_s8 + $0x35c] sm:$0xf] %v664_v23 }
  0xe8   : > { %667 = vst [vmem:[%s4750_s8 + $0x360] sm:$0xf] %v666_v24 }
  0xe9   : > { %669 = vst [vmem:[%s4750_s8 + $0x364] sm:$0xf] %v668_v25 }
  0xea   : > { %671 = vst [vmem:[%s4750_s8 + $0x368] sm:$0xf] %v670_v26 }
  0xeb   : > { %673 = vst [vmem:[%s4750_s8 + $0x36c] sm:$0xf] %v672_v27 }
  0xec   : > { %675 = vst [vmem:[%s4750_s8 + $0x370] sm:$0xf] %v674_v28 }
  0xed   : > { %677 = vst [vmem:[%s4750_s8 + $0x374] sm:$0xf] %v676_v29 }
  0xee   : > { %679 = vst [vmem:[%s4750_s8 + $0x378] sm:$0xf] %v678_v30 }
  0xef   : > { %681 = vst [vmem:[%s4750_s8 + $0x37c] sm:$0xf] %v680_v31 }
  0xf0   : > { %683 = vst [vmem:[%s4750_s8 + $0x380] sm:$0xf] %v682_v32 }
  0xf1   : > { %685 = vst [vmem:[%s4750_s8 + $0x384] sm:$0xf] %v684_v33 }
  0xf2   : > { %687 = vst [vmem:[%s4750_s8 + $0x388] sm:$0xf] %v686_v34 }
  0xf3   : > { %689 = vst [vmem:[%s4750_s8 + $0x38c] sm:$0xf] %v688_v35 }
  0xf4   : > { %691 = vst [vmem:[%s4750_s8 + $0x390] sm:$0xf] %v690_v36 }
  0xf5   : > { %693 = vst [vmem:[%s4750_s8 + $0x394] sm:$0xf] %v692_v37 }
  0xf6   : > { %695 = vst [vmem:[%s4750_s8 + $0x398] sm:$0xf] %v694_v38 }
  0xf7   : > { %697 = vst [vmem:[%s4750_s8 + $0x39c] sm:$0xf] %v696_v39 }
  0xf8   : > { %699 = vst [vmem:[%s4750_s8 + $0x3a0] sm:$0xf] %v698_v40 }
  0xf9   : > { %701 = vst [vmem:[%s4750_s8 + $0x3a4] sm:$0xf] %v700_v41 }
  0xfa   : > { %703 = vst [vmem:[%s4750_s8 + $0x3a8] sm:$0xf] %v702_v42 }
  0xfb   : > { %705 = vst [vmem:[%s4750_s8 + $0x3ac] sm:$0xf] %v704_v43 }
  0xfc   : > { %707 = vst [vmem:[%s4750_s8 + $0x3b0] sm:$0xf] %v706_v44 }
  0xfd   : > { %709 = vst [vmem:[%s4750_s8 + $0x3b4] sm:$0xf] %v708_v45 }
  0xfe   : > { %711 = vst [vmem:[%s4750_s8 + $0x3b8] sm:$0xf] %v710_v46 }
  0xff   : > { %713 = vst [vmem:[%s4750_s8 + $0x3bc] sm:$0xf] %v712_v47 }
 0x100   : > { %715 = vst [vmem:[%s4750_s8 + $0x3c0] sm:$0xf] %v714_v48 }
 0x101   : > { %717 = vst [vmem:[%s4750_s8 + $0x3c4] sm:$0xf] %v716_v49 }
 0x102   : > { %719 = vst [vmem:[%s4750_s8 + $0x3c8] sm:$0xf] %v718_v50 }
 0x103   : > { %721 = vst [vmem:[%s4750_s8 + $0x3cc] sm:$0xf] %v720_v51 }
 0x104   : > { %723 = vst [vmem:[%s4750_s8 + $0x3d0] sm:$0xf] %v722_v52 }
 0x105   : > { %725 = vst [vmem:[%s4750_s8 + $0x3d4] sm:$0xf] %v724_v53 }
 0x106   : > { %727 = vst [vmem:[%s4750_s8 + $0x3d8] sm:$0xf] %v726_v54 }
 0x107   : > { %729 = vst [vmem:[%s4750_s8 + $0x3dc] sm:$0xf] %v728_v55 }
 0x108   : > { %731 = vst [vmem:[%s4750_s8 + $0x3e0] sm:$0xf] %v730_v56 }
 0x109   : > { %733 = vst [vmem:[%s4750_s8 + $0x3e4] sm:$0xf] %v732_v57 }
 0x10a   : > { %735 = vst [vmem:[%s4750_s8 + $0x3e8] sm:$0xf] %v734_v58 }
 0x10b   : > { %737 = vst [vmem:[%s4750_s8 + $0x3ec] sm:$0xf] %v736_v59 }
 0x10c   : > { %739 = vst [vmem:[%s4750_s8 + $0x3f0] sm:$0xf] %v738_v60 }
 0x10d   : > { %741 = vst [vmem:[%s4750_s8 + $0x3f4] sm:$0xf] %v740_v61 }
 0x10e   : > { %743 = vst [vmem:[%s4750_s8 + $0x3f8] sm:$0xf] %v742_v62 }
 0x10f   : > { %745 = vst [vmem:[%s4750_s8 + $0x3fc] sm:$0xf] %v744_v63 }
 0x110 PF: > { %p3903_p6 = scmp.ge.s32.totalorder %s4670_s22, 1  ;;  %p2345_p7 = scmp.lt.s32.totalorder %s4670_s22, 3 }
 0x112   : > { %p2346_p8 = pnand %p3903_p6, %p2345_p7 }
 0x113   : > { %s2352_s9 = sand.u32 (!%p2346_p8), 1, %s4654_s18   ;;  %p2396_p9 = scmp.lt.s32.totalorder (!%p2346_p8), %s4662_s20, 1 }
 0x114   : > { %2349 = sbr.rel (%p2346_p8) target bundleno = 697 (0x2b9), region = 88  ;;  %s3904_s10 = sshll.u32 (!%p2346_p8), %s2352_s9, 10 }
 0x115   : > { %s5265_s11 = scalar_lea.vmem (!%p2346_p8), [#allocation3], %s3904_s10  ;;  %s3905_s25 = sshll.u32 (!%p2346_p8), %s4662_s20, 4 }
 0x116   : > { %p2400_p10 = scmp.lt.s32.totalorder (!%p2346_p8), %s3905_s25, 31  ;;  %p3715_p11 = scmp.eq.s32.totalorder (!%p2346_p8), %s4662_s20, 0 }
 0x119   : > { %v4461_v0 = vld [vmem:[%s5265_s11 + $0x38] sm:$0xff]  ;;  %v4460_v4 = vld [vmem:[%s5265_s11 + $0x30] sm:$0xff]  ;;  %v4459_v8 = vld [vmem:[%s5265_s11 + $0x28] sm:$0xff]  ;;  %s5403_s16 = scalar_select %p2396_p9, %s4662_s20, 1 }
 0x11a   : > { %v4469_v1 = vld [vmem:[%s5265_s11 + $0x78] sm:$0xff]  ;;  %3477 = vmatpush.bf16.msra.mxu0 %v4461_v0  ;;  %v4468_v5 = vld [vmem:[%s5265_s11 + $0x70] sm:$0xff]  ;;  %v4467_v9 = vld [vmem:[%s5265_s11 + $0x68] sm:$0xff]  ;;  %s5464_s25 = smov (!%p2400_p10, %s3905_s25), 31 }
 0x11b   : > { %v4477_v2 = vld [vmem:[%s5265_s11 + $0xb8] sm:$0xff]  ;;  %3490 = vmatpush.bf16.msra.mxu1 %v4469_v1  ;;  %v4476_v6 = vld [vmem:[%s5265_s11 + $0xb0] sm:$0xff]  ;;  %v4475_v10 = vld [vmem:[%s5265_s11 + $0xa8] sm:$0xff]  ;;  %s2398_s24 = scalar_lea.vmem %s5453_s2, %s5403_s16  ;;  %s3906_s27 = sshll.u32 %s5464_s25, 2 }
 0x11c   : > { %v4485_v3 = vld [vmem:[%s5265_s11 + $0xf8] sm:$0xff]  ;;  %3503 = vmatpush.bf16.msra.mxu2 %v4477_v2  ;;  %v4484_v7 = vld [vmem:[%s5265_s11 + $0xf0] sm:$0xff]  ;;  %v4483_v11 = vld [vmem:[%s5265_s11 + $0xe8] sm:$0xff]  ;;  %s5413_s30 = scalar_lea.vmem %s5454_s3, %s3906_s27  ;;  %s3907_s12 = sshll.u32 %s5403_s16, 1 }
 0x11d   : > { %3516 = vmatpush.bf16.msra.mxu3 %v4485_v3  ;;  %v4458_v12 = vld [vmem:[%s5265_s11 + $0x20] sm:$0xff]  ;;  %v4457_v16 = vld [vmem:[%s5265_s11 + $0x18] sm:$0xff]  ;;  %v4456_v21 = vld [vmem:[%s5265_s11 + $0x10] sm:$0xff]  ;;  %s3716_s8 = scalar_select %p3715_p11, 1, 0 }
 0x11e   : > { %3478 = vmatpush.bf16.msra.mxu0 %v4460_v4  ;;  %v4466_v13 = vld [vmem:[%s5265_s11 + $0x60] sm:$0xff]  ;;  %v4465_v17 = vld [vmem:[%s5265_s11 + $0x58] sm:$0xff]  ;;  %v4464_v22 = vld [vmem:[%s5265_s11 + $0x50] sm:$0xff]  ;;  %s2408_s15 = scalar_lea.vmem %s5456_s5, %s3907_s12 }
 0x11f   : > { %3491 = vmatpush.bf16.msra.mxu1 %v4468_v5  ;;  %v4474_v14 = vld [vmem:[%s5265_s11 + $0xa0] sm:$0xff]  ;;  %v4473_v18 = vld [vmem:[%s5265_s11 + $0x98] sm:$0xff]  ;;  %v4472_v23 = vld [vmem:[%s5265_s11 + $0x90] sm:$0xff]  ;;  %s3717_s9 = scvt.s32.f32 %s3716_s8 }
 0x120   : > { %3504 = vmatpush.bf16.msra.mxu2 %v4476_v6  ;;  %v4482_v15 = vld [vmem:[%s5265_s11 + $0xe0] sm:$0xff]  ;;  %v4481_v19 = vld [vmem:[%s5265_s11 + $0xd8] sm:$0xff]  ;;  %v4480_v24 = vld [vmem:[%s5265_s11 + $0xd0] sm:$0xff] }
 0x121   : > { %3517 = vmatpush.bf16.msra.mxu3 %v4484_v7  ;;  %v2415_v20 = vld [vmem:[%s5451_s0] sm:$0xff]  ;;  %v4455_v25 = vld [vmem:[%s5265_s11 + $0x8] sm:$0xff]  ;;  %v4454_v29 = vld [vmem:[%s5265_s11] sm:$0xff] }
 0x122   : > { %3479 = vmatpush.bf16.msra.mxu0 %v4459_v8  ;;  %2674 = vst [vmem:[#allocation1] ss:$9 sm:$0xff] %v2415_v20  ;;  %v4463_v26 = vld [vmem:[%s5265_s11 + $0x48] sm:$0xff]  ;;  %v4462_v30 = vld [vmem:[%s5265_s11 + $0x40] sm:$0xff]  ;;  %v4493_v33 = vld [vmem:[%s5265_s11 + $0x138] sm:$0xff] }
 0x123   : > { %3492 = vmatpush.bf16.msra.mxu1 %v4467_v9  ;;  %v4471_v27 = vld [vmem:[%s5265_s11 + $0x88] sm:$0xff]  ;;  %v4470_v31 = vld [vmem:[%s5265_s11 + $0x80] sm:$0xff]  ;;  %v4501_v34 = vld [vmem:[%s5265_s11 + $0x178] sm:$0xff] }
 0x124   : > { %3505 = vmatpush.bf16.msra.mxu2 %v4475_v10  ;;  %v4479_v28 = vld [vmem:[%s5265_s11 + $0xc8] sm:$0xff]  ;;  %v4478_v32 = vld [vmem:[%s5265_s11 + $0xc0] sm:$0xff]  ;;  %v4509_v35 = vld [vmem:[%s5265_s11 + $0x1b8] sm:$0xff] }
 0x125   : > { %3518 = vmatpush.bf16.msra.mxu3 %v4483_v11  ;;  %v4517_v36 = vld [vmem:[%s5265_s11 + $0x1f8] sm:$0xff]  ;;  %v4492_v37 = vld [vmem:[%s5265_s11 + $0x130] sm:$0xff]  ;;  %v4491_v45 = vld [vmem:[%s5265_s11 + $0x128] sm:$0xff] }
 0x126   : > { %3480 = vmatpush.bf16.msra.mxu0 %v4458_v12  ;;  %v4500_v40 = vld [vmem:[%s5265_s11 + $0x170] sm:$0xff]  ;;  %v4499_v46 = vld [vmem:[%s5265_s11 + $0x168] sm:$0xff]  ;;  %v2416_v52 = vld [vmem:[%s5451_s0 + $0x8] sm:$0xff] }
 0x127   : > { %3493 = vmatpush.bf16.msra.mxu1 %v4466_v13  ;;  %v4508_v43 = vld [vmem:[%s5265_s11 + $0x1b0] sm:$0xff]  ;;  %v4507_v47 = vld [vmem:[%s5265_s11 + $0x1a8] sm:$0xff]  ;;  %v4490_v54 = vld [vmem:[%s5265_s11 + $0x120] sm:$0xff] }
 0x128   : > { %3506 = vmatpush.bf16.msra.mxu2 %v4474_v14  ;;  %v4516_v44 = vld [vmem:[%s5265_s11 + $0x1f0] sm:$0xff]  ;;  %v4515_v48 = vld [vmem:[%s5265_s11 + $0x1e8] sm:$0xff]  ;;  %v4498_v55 = vld [vmem:[%s5265_s11 + $0x160] sm:$0xff] }
 0x129   : > { %3519 = vmatpush.bf16.msra.mxu3 %v4482_v15  ;;  %v2677_v38 = vld [vmem:[#allocation1 + $0x12] sm:$0xff]  ;;  %v2675_v39 = vld [vmem:[#allocation1] sm:$0xff]  ;;  %v2676_v42 = vld [vmem:[#allocation1 + $0x9] sm:$0xff] }
 0x12a   : > { %3481 = vmatpush.bf16.msra.mxu0 %v4457_v16  ;;  %v2678_v41 = vld [vmem:[#allocation1 + $0x1b] sm:$0xff]  ;;  %v2679_v50 = vld [vmem:[#allocation1 + $0x24] sm:$0xff]  ;;  %v2680_v53 = vld [vmem:[#allocation1 + $0x2d] sm:$0xff] }
 0x12b   : > { %3494 = vmatpush.bf16.msra.mxu1 %v4465_v17  ;;  %v2681_v49 = vld [vmem:[#allocation1 + $0x36] sm:$0xff]  ;;  %v2682_v51 = vld [vmem:[#allocation1 + $0x3f] sm:$0xff]  ;;  %v4506_v56 = vld [vmem:[%s5265_s11 + $0x1a0] sm:$0xff] }
 0x12c   : > { %3507 = vmatpush.bf16.msra.mxu2 %v4473_v18  ;;  %2684 = vst [vmem:[#allocation1] ss:$9 sm:$0xff] %v2416_v52  ;;  %v4514_v57 = vld [vmem:[%s5265_s11 + $0x1e0] sm:$0xff]  ;;  %v4489_v58 = vld [vmem:[%s5265_s11 + $0x118] sm:$0xff]  ;;  %v4488_v62 = vld [vmem:[%s5265_s11 + $0x110] sm:$0xff] }
 0x12d   : > { %3520 = vmatpush.bf16.msra.mxu3 %v4481_v19  ;;  %v4497_v59 = vld [vmem:[%s5265_s11 + $0x158] sm:$0xff]  ;;  %v4496_v63 = vld [vmem:[%s5265_s11 + $0x150] sm:$0xff]  ;;  %v4487_v2 = vld [vmem:[%s5265_s11 + $0x108] sm:$0xff] }
 0x12e   : > { %3482 = vmatpush.bf16.msra.mxu0 %v4456_v21  ;;  %v4505_v60 = vld [vmem:[%s5265_s11 + $0x198] sm:$0xff]  ;;  %v4504_v0 = vld [vmem:[%s5265_s11 + $0x190] sm:$0xff]  ;;  %v4495_v3 = vld [vmem:[%s5265_s11 + $0x148] sm:$0xff] }
 0x12f   : > { %3495 = vmatpush.bf16.msra.mxu1 %v4464_v22  ;;  %v4513_v61 = vld [vmem:[%s5265_s11 + $0x1d8] sm:$0xff]  ;;  %v4512_v1 = vld [vmem:[%s5265_s11 + $0x1d0] sm:$0xff]  ;;  %v4503_v4 = vld [vmem:[%s5265_s11 + $0x188] sm:$0xff] }
 0x130   : > { %3508 = vmatpush.bf16.msra.mxu2 %v4472_v23  ;;  %v4511_v5 = vld [vmem:[%s5265_s11 + $0x1c8] sm:$0xff]  ;;  %v4486_v6 = vld [vmem:[%s5265_s11 + $0x100] sm:$0xff]  ;;  %v4525_v10 = vld [vmem:[%s5265_s11 + $0x238] sm:$0xff] }
 0x131   : > { %3521 = vmatpush.bf16.msra.mxu3 %v4480_v24  ;;  %v4494_v7 = vld [vmem:[%s5265_s11 + $0x140] sm:$0xff]  ;;  %v4533_v11 = vld [vmem:[%s5265_s11 + $0x278] sm:$0xff]  ;;  %v4524_v14 = vld [vmem:[%s5265_s11 + $0x230] sm:$0xff] }
 0x132   : > { %3483 = vmatpush.bf16.msra.mxu0 %v4455_v25  ;;  %v4502_v8 = vld [vmem:[%s5265_s11 + $0x180] sm:$0xff]  ;;  %v4541_v12 = vld [vmem:[%s5265_s11 + $0x2b8] sm:$0xff]  ;;  %v4532_v15 = vld [vmem:[%s5265_s11 + $0x270] sm:$0xff] }
 0x133   : > { %3496 = vmatpush.bf16.msra.mxu1 %v4463_v26  ;;  %v4510_v9 = vld [vmem:[%s5265_s11 + $0x1c0] sm:$0xff]  ;;  %v4549_v13 = vld [vmem:[%s5265_s11 + $0x2f8] sm:$0xff]  ;;  %v4540_v16 = vld [vmem:[%s5265_s11 + $0x2b0] sm:$0xff] }
 0x134   : > { %3509 = vmatpush.bf16.msra.mxu2 %v4471_v27  ;;  %v4548_v17 = vld [vmem:[%s5265_s11 + $0x2f0] sm:$0xff]  ;;  %v4523_v18 = vld [vmem:[%s5265_s11 + $0x228] sm:$0xff]  ;;  %v4522_v22 = vld [vmem:[%s5265_s11 + $0x220] sm:$0xff] }
 0x135   : > { %3522 = vmatpush.bf16.msra.mxu3 %v4479_v28  ;;  %v4531_v19 = vld [vmem:[%s5265_s11 + $0x268] sm:$0xff]  ;;  %v4530_v23 = vld [vmem:[%s5265_s11 + $0x260] sm:$0xff]  ;;  %v4521_v26 = vld [vmem:[%s5265_s11 + $0x218] sm:$0xff] }
 0x136   : > { %3484 = vmatpush.bf16.msra.mxu0 %v4454_v29  ;;  %v4539_v20 = vld [vmem:[%s5265_s11 + $0x2a8] sm:$0xff]  ;;  %v4538_v24 = vld [vmem:[%s5265_s11 + $0x2a0] sm:$0xff]  ;;  %v4529_v27 = vld [vmem:[%s5265_s11 + $0x258] sm:$0xff] }
 0x137   : > { %3497 = vmatpush.bf16.msra.mxu1 %v4462_v30  ;;  %v4547_v21 = vld [vmem:[%s5265_s11 + $0x2e8] sm:$0xff]  ;;  %v4546_v25 = vld [vmem:[%s5265_s11 + $0x2e0] sm:$0xff]  ;;  %v4537_v28 = vld [vmem:[%s5265_s11 + $0x298] sm:$0xff] }
 0x138   : > { %3510 = vmatpush.bf16.msra.mxu2 %v4470_v31  ;;  %v4545_v29 = vld [vmem:[%s5265_s11 + $0x2d8] sm:$0xff]  ;;  %v4520_v30 = vld [vmem:[%s5265_s11 + $0x210] sm:$0xff] }
 0x139   : > { %3523 = vmatpush.bf16.msra.mxu3 %v4478_v32  ;;  %3485 = vmatmul.bf16.vlgmr.msra.gmra.mxu0 %v2675_v39  ;;  %v4528_v31 = vld [vmem:[%s5265_s11 + $0x250] sm:$0xff]  ;;  %v4526_v39 = vld [vmem:[%s5265_s11 + $0x240] sm:$0xff] }
 0x13a   : > { %3529 = vmatpush.bf16.msrb.mxu0 %v4493_v33  ;;  %3498 = vmatmul.bf16.vlgmr.msra.gmra.mxu1 %v2676_v42  ;;  %v4536_v32 = vld [vmem:[%s5265_s11 + $0x290] sm:$0xff]  ;;  %v4557_v42 = vld [vmem:[%s5265_s11 + $0x338] sm:$0xff] }
 0x13b   : > { %3542 = vmatpush.bf16.msrb.mxu1 %v4501_v34  ;;  %3511 = vmatmul.bf16.vlgmr.msra.gmra.mxu2 %v2677_v38  ;;  %v4544_v33 = vld [vmem:[%s5265_s11 + $0x2d0] sm:$0xff]  ;;  %v4519_v34 = vld [vmem:[%s5265_s11 + $0x208] sm:$0xff]  ;;  %v4518_v38 = vld [vmem:[%s5265_s11 + $0x200] sm:$0xff] }
 0x13c   : > { %3555 = vmatpush.bf16.msrb.mxu2 %v4509_v35  ;;  %3524 = vmatmul.bf16.vlgmr.msra.gmra.mxu3 %v2678_v41  ;;  %v4527_v35 = vld [vmem:[%s5265_s11 + $0x248] sm:$0xff]  ;;  %v4542_v41 = vld [vmem:[%s5265_s11 + $0x2c0] sm:$0xff]  ;;  %v4572_v52 = vld [vmem:[%s5265_s11 + $0x3b0] sm:$0xff] }
 0x13d   : > { %3568 = vmatpush.bf16.msrb.mxu3 %v4517_v36  ;;  %v4535_v36 = vld [vmem:[%s5265_s11 + $0x288] sm:$0xff] }
 0x13e   : > { %3530 = vmatpush.bf16.msrb.mxu0 %v4492_v37  ;;  %v4543_v37 = vld [vmem:[%s5265_s11 + $0x2c8] sm:$0xff] }
 0x13f   : > { %3543 = vmatpush.bf16.msrb.mxu1 %v4500_v40  ;;  %v4534_v40 = vld [vmem:[%s5265_s11 + $0x280] sm:$0xff] }
 0x140   : > { %3556 = vmatpush.bf16.msrb.mxu2 %v4508_v43  ;;  %v4565_v43 = vld [vmem:[%s5265_s11 + $0x378] sm:$0xff] }
 0x141   : > { %3569 = vmatpush.bf16.msrb.mxu3 %v4516_v44  ;;  %v4573_v44 = vld [vmem:[%s5265_s11 + $0x3b8] sm:$0xff] }
 0x142   : > { %3531 = vmatpush.bf16.msrb.mxu0 %v4491_v45  ;;  %v4581_v45 = vld [vmem:[%s5265_s11 + $0x3f8] sm:$0xff] }
 0x143   : > { %3544 = vmatpush.bf16.msrb.mxu1 %v4499_v46  ;;  %v2685_v46 = vld [vmem:[#allocation1] sm:$0xff] }
 0x144   : > { %3557 = vmatpush.bf16.msrb.mxu2 %v4507_v47  ;;  %v2687_v47 = vld [vmem:[#allocation1 + $0x12] sm:$0xff] }
 0x145   : > { %3570 = vmatpush.bf16.msrb.mxu3 %v4515_v48  ;;  %v2686_v48 = vld [vmem:[#allocation1 + $0x9] sm:$0xff] }
 0x146   : > { %3532 = vmatpush.bf16.msrb.mxu0 %v4490_v54  ;;  %v4555_v54 = vld [vmem:[%s5265_s11 + $0x328] sm:$0xff] }
 0x147   : > { %3545 = vmatpush.bf16.msrb.mxu1 %v4498_v55  ;;  %v4563_v55 = vld [vmem:[%s5265_s11 + $0x368] sm:$0xff] }
 0x148   : > { %3558 = vmatpush.bf16.msrb.mxu2 %v4506_v56  ;;  %v4571_v56 = vld [vmem:[%s5265_s11 + $0x3a8] sm:$0xff] }
 0x149   : > { %3571 = vmatpush.bf16.msrb.mxu3 %v4514_v57  ;;  %v4579_v57 = vld [vmem:[%s5265_s11 + $0x3e8] sm:$0xff] }
 0x14a   : > { %3533 = vmatpush.bf16.msrb.mxu0 %v4489_v58  ;;  %v4554_v58 = vld [vmem:[%s5265_s11 + $0x320] sm:$0xff] }
 0x14b   : > { %3546 = vmatpush.bf16.msrb.mxu1 %v4497_v59  ;;  %v4562_v59 = vld [vmem:[%s5265_s11 + $0x360] sm:$0xff] }
 0x14c   : > { %3559 = vmatpush.bf16.msrb.mxu2 %v4505_v60  ;;  %v4570_v60 = vld [vmem:[%s5265_s11 + $0x3a0] sm:$0xff] }
 0x14d   : > { %3572 = vmatpush.bf16.msrb.mxu3 %v4513_v61  ;;  %v4578_v61 = vld [vmem:[%s5265_s11 + $0x3e0] sm:$0xff] }
 0x14e   : > { %3534 = vmatpush.bf16.msrb.mxu0 %v4488_v62  ;;  %v4553_v62 = vld [vmem:[%s5265_s11 + $0x318] sm:$0xff] }
 0x14f   : > { %3547 = vmatpush.bf16.msrb.mxu1 %v4496_v63  ;;  %v4561_v63 = vld [vmem:[%s5265_s11 + $0x358] sm:$0xff] }
 0x150   : > { %3560 = vmatpush.bf16.msrb.mxu2 %v4504_v0  ;;  %v4569_v0 = vld [vmem:[%s5265_s11 + $0x398] sm:$0xff] }
 0x151   : > { %3573 = vmatpush.bf16.msrb.mxu3 %v4512_v1  ;;  %v4577_v1 = vld [vmem:[%s5265_s11 + $0x3d8] sm:$0xff] }
 0x152   : > { %3535 = vmatpush.bf16.msrb.mxu0 %v4487_v2  ;;  %v4552_v2 = vld [vmem:[%s5265_s11 + $0x310] sm:$0xff] }
 0x153   : > { %3548 = vmatpush.bf16.msrb.mxu1 %v4495_v3  ;;  %v4560_v3 = vld [vmem:[%s5265_s11 + $0x350] sm:$0xff] }
 0x154   : > { %3561 = vmatpush.bf16.msrb.mxu2 %v4503_v4  ;;  %v4568_v4 = vld [vmem:[%s5265_s11 + $0x390] sm:$0xff] }
 0x155   : > { %3574 = vmatpush.bf16.msrb.mxu3 %v4511_v5  ;;  %v4576_v5 = vld [vmem:[%s5265_s11 + $0x3d0] sm:$0xff] }
 0x156   : > { %3536 = vmatpush.bf16.msrb.mxu0 %v4486_v6  ;;  %v4551_v6 = vld [vmem:[%s5265_s11 + $0x308] sm:$0xff] }
 0x157   : > { %3549 = vmatpush.bf16.msrb.mxu1 %v4494_v7  ;;  %v4559_v7 = vld [vmem:[%s5265_s11 + $0x348] sm:$0xff] }
 0x158   : > { %3562 = vmatpush.bf16.msrb.mxu2 %v4502_v8  ;;  %v4567_v8 = vld [vmem:[%s5265_s11 + $0x388] sm:$0xff] }
 0x159   : > { %3575 = vmatpush.bf16.msrb.mxu3 %v4510_v9  ;;  %3537 = vmatmul.bf16.vlgmr.msrb.gmra.mxu0 %v2679_v50  ;;  %v4556_v50 = vld [vmem:[%s5265_s11 + $0x330] sm:$0xff]  ;;  %v4575_v9 = vld [vmem:[%s5265_s11 + $0x3c8] sm:$0xff] }
 0x15a   : > { %3581 = vmatpush.bf16.msra.mxu0 %v4525_v10  ;;  %3550 = vmatmul.bf16.vlgmr.msrb.gmra.mxu1 %v2680_v53  ;;  %v4580_v53 = vld [vmem:[%s5265_s11 + $0x3f0] sm:$0xff]  ;;  %v4550_v10 = vld [vmem:[%s5265_s11 + $0x300] sm:$0xff] }
 0x15b   : > { %3594 = vmatpush.bf16.msra.mxu1 %v4533_v11  ;;  %3563 = vmatmul.bf16.vlgmr.msrb.gmra.mxu2 %v2681_v49  ;;  %v2688_v49 = vld [vmem:[#allocation1 + $0x1b] sm:$0xff]  ;;  %v4558_v11 = vld [vmem:[%s5265_s11 + $0x340] sm:$0xff] }
 0x15c   : > { %3607 = vmatpush.bf16.msra.mxu2 %v4541_v12  ;;  %3576 = vmatmul.bf16.vlgmr.msrb.gmra.mxu3 %v2682_v51  ;;  %v4564_v51 = vld [vmem:[%s5265_s11 + $0x370] sm:$0xff]  ;;  %v4566_v12 = vld [vmem:[%s5265_s11 + $0x380] sm:$0xff] }
 0x15d   : > { %3620 = vmatpush.bf16.msra.mxu3 %v4549_v13  ;;  %v4574_v13 = vld [vmem:[%s5265_s11 + $0x3c0] sm:$0xff] }
 0x15e   : > { %3582 = vmatpush.bf16.msra.mxu0 %v4524_v14  ;;  %v2689_v14 = vld [vmem:[#allocation1 + $0x24] sm:$0xff] }
 0x15f   : > { %3595 = vmatpush.bf16.msra.mxu1 %v4532_v15  ;;  %v2690_v15 = vld [vmem:[#allocation1 + $0x2d] sm:$0xff] }
 0x160   : > { %3608 = vmatpush.bf16.msra.mxu2 %v4540_v16  ;;  %v2691_v16 = vld [vmem:[#allocation1 + $0x36] sm:$0xff] }
 0x161   : > { %3621 = vmatpush.bf16.msra.mxu3 %v4548_v17  ;;  %v2692_v17 = vld [vmem:[#allocation1 + $0x3f] sm:$0xff] }
 0x162   : > { %3583 = vmatpush.bf16.msra.mxu0 %v4523_v18 }
 0x163   : > { %3596 = vmatpush.bf16.msra.mxu1 %v4531_v19 }
 0x164   : > { %3609 = vmatpush.bf16.msra.mxu2 %v4539_v20 }
 0x165   : > { %3622 = vmatpush.bf16.msra.mxu3 %v4547_v21 }
 0x166   : > { %3584 = vmatpush.bf16.msra.mxu0 %v4522_v22 }
 0x167   : > { %3597 = vmatpush.bf16.msra.mxu1 %v4530_v23 }
 0x168   : > { %3610 = vmatpush.bf16.msra.mxu2 %v4538_v24 }
 0x169   : > { %3623 = vmatpush.bf16.msra.mxu3 %v4546_v25 }
 0x16a   : > { %3585 = vmatpush.bf16.msra.mxu0 %v4521_v26 }
 0x16b   : > { %3598 = vmatpush.bf16.msra.mxu1 %v4529_v27 }
 0x16c   : > { %3611 = vmatpush.bf16.msra.mxu2 %v4537_v28 }
 0x16d   : > { %3624 = vmatpush.bf16.msra.mxu3 %v4545_v29 }
 0x16e   : > { %3586 = vmatpush.bf16.msra.mxu0 %v4520_v30 }
 0x16f   : > { %3599 = vmatpush.bf16.msra.mxu1 %v4528_v31 }
 0x170   : > { %3612 = vmatpush.bf16.msra.mxu2 %v4536_v32 }
 0x171   : > { %3625 = vmatpush.bf16.msra.mxu3 %v4544_v33 }
 0x172   : > { %3587 = vmatpush.bf16.msra.mxu0 %v4519_v34 }
 0x173   : > { %3600 = vmatpush.bf16.msra.mxu1 %v4527_v35  ;;  %v4589_v35 = vld [vmem:[%s5413_s30 + $0x38] sm:$0xff] }
 0x174   : > { %3613 = vmatpush.bf16.msra.mxu2 %v4535_v36 }
 0x175   : > { %3626 = vmatpush.bf16.msra.mxu3 %v4543_v37 }
 0x176   : > { %3588 = vmatpush.bf16.msra.mxu0 %v4518_v38  ;;  %v4588_v38 = vld [vmem:[%s5413_s30 + $0x30] sm:$0xff] }
 0x177   : > { %3601 = vmatpush.bf16.msra.mxu1 %v4526_v39 }
 0x178   : > { %3614 = vmatpush.bf16.msra.mxu2 %v4534_v40  ;;  %v4587_v40 = vld [vmem:[%s5413_s30 + $0x28] sm:$0xff] }
 0x179   : > { %3627 = vmatpush.bf16.msra.mxu3 %v4542_v41  ;;  %3589 = vmatmul.bf16.vlgmr.msra.gmra.mxu0 %v2685_v46 }
 0x17a   : > { %3633 = vmatpush.bf16.msrb.mxu0 %v4557_v42  ;;  %3602 = vmatmul.bf16.vlgmr.msra.gmra.mxu1 %v2686_v48  ;;  %v4672_v42 = vmov 0.0   ;;  %v4585_v48 = vld [vmem:[%s5413_s30 + $0x18] sm:$0xff] }
 0x17b   : > { %3646 = vmatpush.bf16.msrb.mxu1 %v4565_v43  ;;  %3615 = vmatmul.bf16.vlgmr.msra.gmra.mxu2 %v2687_v47  ;;  %2413 = vst [vmem:[#allocation2] sm:$0x3] %v4672_v42  ;;  %v4586_v43 = vld [vmem:[%s5413_s30 + $0x20] sm:$0xff] }
 0x17c   : > { %3659 = vmatpush.bf16.msrb.mxu2 %v4573_v44  ;;  %3628 = vmatmul.bf16.vlgmr.msra.gmra.mxu3 %v2688_v49 }
 0x17d   : > { %3672 = vmatpush.bf16.msrb.mxu3 %v4581_v45 }
 0x17e   : > { %3634 = vmatpush.bf16.msrb.mxu0 %v4556_v50 }
 0x17f   : > { %3647 = vmatpush.bf16.msrb.mxu1 %v4564_v51  ;;  %v4584_v51 = vld [vmem:[%s5413_s30 + $0x10] sm:$0xff] }
 0x180   : > { %3660 = vmatpush.bf16.msrb.mxu2 %v4572_v52 }
 0x181   : > { %3673 = vmatpush.bf16.msrb.mxu3 %v4580_v53 }
 0x182   : > { %3635 = vmatpush.bf16.msrb.mxu0 %v4555_v54  ;;  %v4583_v54 = vld [vmem:[%s5413_s30 + $0x8] sm:$0xff] }
 0x183   : > { %3648 = vmatpush.bf16.msrb.mxu1 %v4563_v55 }
 0x184   : > { %3661 = vmatpush.bf16.msrb.mxu2 %v4571_v56 }
 0x185   : > { %3674 = vmatpush.bf16.msrb.mxu3 %v4579_v57  ;;  %v4582_v57 = vld [vmem:[%s5413_s30] sm:$0xff] }
 0x186   : > { %3636 = vmatpush.bf16.msrb.mxu0 %v4554_v58 }
 0x187   : > { %3649 = vmatpush.bf16.msrb.mxu1 %v4562_v59 }
 0x188   : > { %3662 = vmatpush.bf16.msrb.mxu2 %v4570_v60 }
 0x189   : > { %3675 = vmatpush.bf16.msrb.mxu3 %v4578_v61 }
 0x18a   : > { %3637 = vmatpush.bf16.msrb.mxu0 %v4553_v62 }
 0x18b   : > { %3650 = vmatpush.bf16.msrb.mxu1 %v4561_v63 }
 0x18c   : > { %3663 = vmatpush.bf16.msrb.mxu2 %v4569_v0 }
 0x18d   : > { %3676 = vmatpush.bf16.msrb.mxu3 %v4577_v1 }
 0x18e   : > { %3638 = vmatpush.bf16.msrb.mxu0 %v4552_v2 }
 0x18f   : > { %3651 = vmatpush.bf16.msrb.mxu1 %v4560_v3 }
 0x190   : > { %3664 = vmatpush.bf16.msrb.mxu2 %v4568_v4 }
 0x191   : > { %3677 = vmatpush.bf16.msrb.mxu3 %v4576_v5 }
 0x192   : > { %3639 = vmatpush.bf16.msrb.mxu0 %v4551_v6 }
 0x193   : > { %3652 = vmatpush.bf16.msrb.mxu1 %v4559_v7  ;;  %v2414_v7 = vld [vmem:[#allocation2] sm:$0x3] }
 0x194   : > { %3665 = vmatpush.bf16.msrb.mxu2 %v4567_v8 }
 0x195   : > { %3678 = vmatpush.bf16.msrb.mxu3 %v4575_v9 }
 0x196   : > { %3640 = vmatpush.bf16.msrb.mxu0 %v4550_v10 }
 0x197   : > { %3653 = vmatpush.bf16.msrb.mxu1 %v4558_v11 }
 0x198   : > { %3666 = vmatpush.bf16.msrb.mxu2 %v4566_v12  ;;  %v4631_v12 = vld [vmem:[%s2398_s24] ss:$0 sm:$0xff] }
 0x199   : > { %3679 = vmatpush.bf16.msrb.mxu3 %v4574_v13  ;;  %3641 = vmatmul.bf16.vlgmr.msrb.gmra.mxu0 %v2689_v14 }
 0x19a   : > { %3654 = vmatmul.bf16.vlgmr.msrb.gmra.mxu1 %v2690_v15  ;;  %3771 = vmatpush.bf16.msra.mxu0 %v4589_v35 }
 0x19b   : > { %3667 = vmatmul.bf16.vlgmr.msrb.gmra.mxu2 %v2691_v16 }
 0x19c   : > { %3680 = vmatmul.bf16.vlgmr.msrb.gmra.mxu3 %v2692_v17  ;;  %v3714_v17 = vld [vmem:[%s5455_s4] sm:$0x1] }
 0x19e   : > { %3772 = vmatpush.bf16.msra.mxu0 %v4588_v38 }
 0x1a2   : > { %3773 = vmatpush.bf16.msra.mxu0 %v4587_v40 }
 0x1a6   : > { %3774 = vmatpush.bf16.msra.mxu0 %v4586_v43 }
 0x1aa   : > { %3775 = vmatpush.bf16.msra.mxu0 %v4585_v48 }
 0x1ae   : > { %3776 = vmatpush.bf16.msra.mxu0 %v4584_v51 }
 0x1b2   : > { %3777 = vmatpush.bf16.msra.mxu0 %v4583_v54 }
 0x1b6   : > { %v3486_v18 = vpop.f32.mrf.mxu0  ;;  %3778 = vmatpush.bf16.msra.mxu0 %v4582_v57 }
 0x1b7   : > { %v3499_v19 = vpop.f32.mrf.mxu1 }
 0x1b8   : > { %v3500_v20 = vadd.f32 %v3499_v19, %v3486_v18  ;;  %v3718_v18 = vstv %s3717_s9 }
 0x1b9   : > { %v3719_v19 = vmul.f32 %v3718_v18, %v3714_v17 }
 0x1be   : > { %v3512_v21 = vpop.f32.mrf.mxu2  ;;  %v3488_v24 = vpop.f32.mrf.mxu0 }
 0x1bf   : > { %v3513_v22 = vadd.f32 %v3512_v21, %v3500_v20  ;;  %v3525_v23 = vpop.f32.mrf.mxu3  ;;  %v3501_v26 = vpop.f32.mrf.mxu1  ;;  %v3721_v20 = vperm.slane %v3719_v19, 0 }
 0x1c1   : > { %v3526_v25 = vadd.f32 %v3525_v23, %v3513_v22 }
 0x1c6   : > { %v3514_v27 = vpop.f32.mrf.mxu2 }
 0x1c7   : > { %v3527_v28 = vpop.f32.mrf.mxu3 }
 0x1d6   : > { %v3538_v29 = vpop.f32.mrf.mxu0 }
 0x1d7   : > { %v3551_v30 = vpop.f32.mrf.mxu1  ;;  %v3539_v44 = vadd.f32 %v3538_v29, %v3526_v25 }
 0x1d9   : > { %v3552_v49 = vadd.f32 %v3551_v30, %v3539_v44 }
 0x1de   : > { %v3564_v31 = vpop.f32.mrf.mxu2  ;;  %v3540_v33 = vpop.f32.mrf.mxu0 }
 0x1df   : > { %v3577_v32 = vpop.f32.mrf.mxu3  ;;  %v3553_v34 = vpop.f32.mrf.mxu1  ;;  %v3565_v52 = vadd.f32 %v3564_v31, %v3552_v49 }
 0x1e1   : > { %v3578_v56 = vadd.f32 %v3577_v32, %v3565_v52 }
 0x1e6   : > { %v3566_v36 = vpop.f32.mrf.mxu2 }
 0x1e7   : > { %v3579_v37 = vpop.f32.mrf.mxu3 }
 0x1f6   : > { %v3590_v39 = vpop.f32.mrf.mxu0 }
 0x1f7   : > { %v3603_v41 = vpop.f32.mrf.mxu1  ;;  %v3591_v58 = vadd.f32 %v3590_v39, %v3578_v56 }
 0x1f9   : > { %v3604_v59 = vadd.f32 %v3603_v41, %v3591_v58 }
 0x1fe   : > { %v3616_v45 = vpop.f32.mrf.mxu2  ;;  %v3592_v47 = vpop.f32.mrf.mxu0 }
 0x1ff   : > { %v3629_v46 = vpop.f32.mrf.mxu3  ;;  %v3605_v50 = vpop.f32.mrf.mxu1  ;;  %v3617_v60 = vadd.f32 %v3616_v45, %v3604_v59 }
 0x201   : > { %v3630_v61 = vadd.f32 %v3629_v46, %v3617_v60 }
 0x206   : > { %v3618_v53 = vpop.f32.mrf.mxu2 }
 0x207   : > { %v3631_v55 = vpop.f32.mrf.mxu3 }
 0x216   : > { %v3642_v62 = vpop.f32.mrf.mxu0 }
 0x217   : > { %v3655_v63 = vpop.f32.mrf.mxu1  ;;  %v3643_v0 = vadd.f32 %v3642_v62, %v3630_v61 }
 0x219   : > { %v3656_v1 = vadd.f32 %v3655_v63, %v3643_v0 }
 0x21e   : > { %v3668_v2 = vpop.f32.mrf.mxu2  ;;  %v3644_v5 = vpop.f32.mrf.mxu0 }
 0x21f   : > { %v3681_v3 = vpop.f32.mrf.mxu3  ;;  %v3669_v4 = vadd.f32 %v3668_v2, %v3656_v1  ;;  %v3657_v6 = vpop.f32.mrf.mxu1 }
 0x221   : > { %v3682_v8 = vadd.f32 %v3681_v3, %v3669_v4 }
 0x223   : > { %v3685_v9 = vadd.f32 %v3682_v8, %v2414_v7 }
 0x225   : > { %3686 = vst [vmem:[#allocation2] sm:$0x3] %v3685_v9 }
 0x226   : > { %v3670_v10 = vpop.f32.mrf.mxu2 }
 0x227   : > { %v3683_v11 = vpop.f32.mrf.mxu3 }
 0x22c   : > { %v3690_v13 = vld [vmem:[#allocation2] sm:$0x3] }
 0x22d   : > { %v3695_v14 = vadd.f32 %v4631_v12, %v3690_v13 }
 0x22f   : > { %v3696_v15 = vmax.f32 %v3695_v14, 0.0 }
 0x231   : > { %v3697_v16 = vpack.c.bf16 %v3696_v15, %v3696_v15 }
 0x233   : > { %3779 = vmatmul.bf16.vlgmr.msra.gmra.mxu0 %v3697_v16 }
 0x2b0   : > { %v3780_v21 = vpop.f32.mrf.mxu0 }
 0x2b1   : > { %v3781_v22 = vadd.f32 %v3780_v21, %v3721_v20 }
 0x2b3   : > { %3784 = vst [vmem:[%s2408_s15] sm:$0x3] %v3781_v22 }
 0x2b8   : > { %v3782_v23 = vpop.f32.mrf.mxu0 }
 0x2b9 PF: > { %s15_s22 = sadd.s32 1, %s4670_s22   ;;  %s5457_s18 = smov %s4658_s19 }
 0x2ba   : > { %p12_p12 = scmp.ge.s32.totalorder %s15_s22, 4   ;;  %s5458_s19 = smov %s4738_s26 }
 0x2bb   : > { %s5459_s20 = smov %s4666_s21  ;;  %s5460_s21 = smov %s5462_s23 }
 0x2bc   :  { %14 = sbr.rel (!%p12_p12) target bundleno = 3 (0x3), region = 148 }

</bundles_post_ra>
